<compile_context>
chip_gen: v7x
topology: tpu7x:2x2x1
jax: 0.10.0
libtpu: 0.0.40
codegen_flags: <defaults>
</compile_context>

<pallas_src>
import functools

import jax
import jax.numpy as jnp
from jax import lax
from jax.experimental import pallas as pl
from jax.experimental.pallas import tpu as pltpu  # noqa: F401  (TPU backend)

ALPHA = 0.2        # LeakyReLU negative slope used by GCN(..., alpha=0.2)
MASK_BIAS = -9e15  # additive mask for non-edges (matches torch's -9e15 fill)


# --------------------------------------------------------------------------
# In-kernel helpers (trace-time inlined)
# --------------------------------------------------------------------------
def _elu(z):
    # ELU(alpha=1); clamp the exp argument so the unselected branch never overflows.
    return jnp.where(z > 0, z, jnp.exp(jnp.minimum(z, 0.0)) - 1.0)


def _leaky_relu(z):
    return jnp.where(z > 0, z, ALPHA * z)


def _masked_softmax(e, adj_bias):
    e = e + adj_bias
    m = jnp.max(e, axis=-1, keepdims=True)
    p = jnp.exp(e - m)
    s = jnp.sum(p, axis=-1, keepdims=True)
    return p * pl.reciprocal(s, approx=True)   # EUP reciprocal, overlaps with MXU


def _graph_atten(x, adj_bias, w_all, u1, u2t, wout, u1o, u2ot, *, nheads, nhid):
    """GraphAtten(nfeat, nhid, nfeat, alpha, nheads) block, fully in VMEM."""
    # --- hidden heads: one batched matmul for all H heads -----------------
    wh_all = jnp.dot(x, w_all, preferred_element_type=jnp.float32)         # (N, H*nhid)
    wh1 = jnp.dot(x, u1, preferred_element_type=jnp.float32)               # (N, H)
    wh2t = lax.dot_general(u2t, x, (((1,), (1,)), ((), ())),
                           preferred_element_type=jnp.float32)             # (H, N)
    head_outs = []
    for h in range(nheads):                                                # unrolled
        e = _leaky_relu(wh1[:, h:h + 1] + wh2t[h:h + 1, :])                # (N, N)
        attn = _masked_softmax(e, adj_bias)
        hp = jnp.dot(attn, wh_all[:, h * nhid:(h + 1) * nhid],
                     preferred_element_type=jnp.float32)                   # (N, nhid)
        head_outs.append(_elu(hp))
    x_cat = jnp.concatenate(head_outs, axis=-1)                            # (N, H*nhid)

    # --- output head (concat=False) + outer F.elu --------------------------
    who = jnp.dot(x_cat, wout, preferred_element_type=jnp.float32)         # (N, nfeat)
    wh1o = jnp.dot(x_cat, u1o, preferred_element_type=jnp.float32)         # (N, 1)
    wh2to = lax.dot_general(u2ot, x_cat, (((1,), (1,)), ((), ())),
                            preferred_element_type=jnp.float32)            # (1, N)
    e = _leaky_relu(wh1o + wh2to)
    attn = _masked_softmax(e, adj_bias)
    out = jnp.dot(attn, who, preferred_element_type=jnp.float32)           # (N, nfeat)
    return _elu(out)


# --------------------------------------------------------------------------
# Fused GCN forward kernel (single pallas_call, no grid — everything in VMEM)
# --------------------------------------------------------------------------
def _gcn_fused_kernel(
    # data
    x_ref, adj_ref,
    # atten1 (head-batched / folded weights)
    wa1, u1a1, u2ta1, wo1, u1o1, u2to1,
    # atten2
    wa2, u1a2, u2ta2, wo2, u1o2, u2to2,
    # tran1
    wt, bt,
    # sparsification (branch-concat first layer, block-diag second layer)
    w1s, b1s, w2s, b2s,
    # out
    o_ref,
    *, nheads, nhid, nout):
    x = x_ref[...]
    # mask bias computed ONCE and reused by every head of both attention layers
    adj_bias = jnp.where(adj_ref[...] > 0,
                         jnp.float32(0.0), jnp.float32(MASK_BIAS))

    x = _graph_atten(x, adj_bias, wa1[...], u1a1[...], u2ta1[...],
                     wo1[...], u1o1[...], u2to1[...], nheads=nheads, nhid=nhid)
    x = _graph_atten(x, adj_bias, wa2[...], u1a2[...], u2ta2[...],
                     wo2[...], u1o2[...], u2to2[...], nheads=nheads, nhid=nhid)

    # tran1 + ReLU
    y = jnp.maximum(
        jnp.dot(x, wt[...], preferred_element_type=jnp.float32) + bt[...], 0.0)

    # Sparsification: [feature | location] branches packed side by side
    h1 = jnp.maximum(
        jnp.dot(y, w1s[...], preferred_element_type=jnp.float32) + b1s[...], 0.0)
    h2 = jnp.maximum(
        jnp.dot(h1, w2s[...], preferred_element_type=jnp.float32) + b2s[...], 0.0)
    o_ref[...] = h2[:, :nout] * h2[:, nout:]       # descriptor * locations


def gcn_forward_fn(prep, x, adj):
    N = x.shape[0]
    nheads = prep["u1a1"].shape[1]
    nhid = prep["wa1"].shape[1] // nheads
    nout = prep["b2s"].shape[1] // 2
    kernel = functools.partial(_gcn_fused_kernel,
                               nheads=nheads, nhid=nhid, nout=nout)
    return pl.pallas_call(
        kernel,
        out_shape=jax.ShapeDtypeStruct((N, nout), jnp.float32),
    )(x, adj,
      prep["wa1"], prep["u1a1"], prep["u2ta1"],
      prep["wo1"], prep["u1o1"], prep["u2to1"],
      prep["wa2"], prep["u1a2"], prep["u2ta2"],
      prep["wo2"], prep["u1o2"], prep["u2to2"],
      prep["wt"], prep["bt"],
      prep["w1s"], prep["b1s"], prep["w2s"], prep["b2s"])


gcn_forward = jax.jit(gcn_forward_fn)


# --------------------------------------------------------------------------
# One-time (outside jit) weight re-layout: transposes, head batching,
# a1/a2 folding, sparsification branch concat / block-diag.
# --------------------------------------------------------------------------
def _prep_graph_atten(p):
    W = p["W_heads"]             # (H, Fin, nhid), (in, out) per head, no bias
    a1 = p["a1_heads"][..., 0]   # (H, nhid)
    a2 = p["a2_heads"][..., 0]   # (H, nhid)
    H, Fin, nhid = W.shape
    w_all = jnp.transpose(W, (1, 0, 2)).reshape(Fin, H * nhid)   # (Fin, H*nhid)
    u1 = jnp.einsum("hfo,ho->fh", W, a1)                         # (Fin, H)
    u2t = jnp.einsum("hfo,ho->hf", W, a2)                        # (H, Fin)
    wout = p["W_out"]                                            # (H*nhid, nfeat)
    u1o = wout @ p["a1_out"]                                     # (H*nhid, 1)
    u2ot = (wout @ p["a2_out"]).T                                # (1, H*nhid)
    return w_all, u1, u2t, wout, u1o, u2ot


def prepare_params(params):
    wa1, u1a1, u2ta1, wo1, u1o1, u2to1 = _prep_graph_atten(params["atten1"])
    wa2, u1a2, u2ta2, wo2, u1o2, u2to2 = _prep_graph_atten(params["atten2"])
    sp = params["sparse"]
    nfeat = sp["fe1_W"].shape[1]
    nout = sp["fe2_W"].shape[0]
    w1s = jnp.concatenate([sp["fe1_W"].T, sp["le1_W"].T], axis=1)       # (nfeat, 2*nfeat)
    b1s = jnp.concatenate([sp["fe1_b"], sp["le1_b"]]).reshape(1, -1)
    z = jnp.zeros((nfeat, nout), jnp.float32)
    w2s = jnp.block([[sp["fe2_W"].T, z], [z, sp["le2_W"].T]])           # (2*nfeat, 2*nout)
    b2s = jnp.concatenate([sp["fe2_b"], sp["le2_b"]]).reshape(1, -1)
    return dict(
        wa1=wa1, u1a1=u1a1, u2ta1=u2ta1, wo1=wo1, u1o1=u1o1, u2to1=u2to1,
        wa2=wa2, u1a2=u1a2, u2ta2=u2ta2, wo2=wo2, u1o2=u1o2, u2to2=u2to2,
        wt=params["tran1_W"].T, bt=params["tran1_b"].reshape(1, -1),
        w1s=w1s, b1s=b1s, w2s=w2s, b2s=b2s)


# --------------------------------------------------------------------------
# Deterministic parameter construction (synthetic, torch-style layouts)
# --------------------------------------------------------------------------
def _init_graph_atten(key, nfeat, nhid, nheads):
    ks = jax.random.split(key, 6)
    s = 0.1
    return {
        "W_heads": s * jax.random.normal(ks[0], (nheads, nfeat, nhid), jnp.float32),
        "a1_heads": s * jax.random.normal(ks[1], (nheads, nhid, 1), jnp.float32),
        "a2_heads": s * jax.random.normal(ks[2], (nheads, nhid, 1), jnp.float32),
        "W_out": s * jax.random.normal(ks[3], (nhid * nheads, nfeat), jnp.float32),
        "a1_out": s * jax.random.normal(ks[4], (nfeat, 1), jnp.float32),
        "a2_out": s * jax.random.normal(ks[5], (nfeat, 1), jnp.float32),
    }


def init_gcn_params(key, nfeat, nhid, nout, nheads):
    k1, k2, k3, k4 = jax.random.split(key, 4)
    s = 0.1
    ks = jax.random.split(k4, 8)
    return {
        "atten1": _init_graph_atten(k1, nfeat, nhid, nheads),
        "atten2": _init_graph_atten(k2, nfeat, nhid, nheads),
        "tran1_W": s * jax.random.normal(k3, (nfeat, nfeat), jnp.float32),
        "tran1_b": jnp.zeros((nfeat,), jnp.float32),
        "sparse": {
            "fe1_W": s * jax.random.normal(ks[0], (nfeat, nfeat), jnp.float32),
            "fe1_b": s * jax.random.normal(ks[1], (nfeat,), jnp.float32),
            "fe2_W": s * jax.random.normal(ks[2], (nout, nfeat), jnp.float32),
            "fe2_b": s * jax.random.normal(ks[3], (nout,), jnp.float32),
            "le1_W": s * jax.random.normal(ks[4], (nfeat, nfeat), jnp.float32),
            "le1_b": s * jax.random.normal(ks[5], (nfeat,), jnp.float32),
            "le2_W": s * jax.random.normal(ks[6], (nout, nfeat), jnp.float32),
            "le2_b": s * jax.random.normal(ks[7], (nout,), jnp.float32),
        },
    }


if __name__ == "__main__":
    N, NFEAT, NHID, NOUT, NHEADS = 16, 32, 8, 32, 8

    key = jax.random.PRNGKey(0)
    kx, kadj, kp = jax.random.split(key, 3)

    x = jax.random.normal(kx, (N, NFEAT), jnp.float32)
    adj = (jax.random.uniform(kadj, (N, N)) > 0.5).astype(jnp.float32)
    adj = jnp.clip(adj + jnp.eye(N, dtype=jnp.float32), 0.0, 1.0)

    params = init_gcn_params(kp, NFEAT, NHID, NOUT, NHEADS)
    prep = prepare_params(params)          # one-time re-layout, outside jit

    feats = gcn_forward(prep, x, adj)
    jax.block_until_ready(feats)
    assert feats.shape == (N, NOUT) and feats.dtype == jnp.float32
    print("KERNEL_OK")
</pallas_src>

<mosaic_0001>
module attributes {stable_mosaic.version = 11 : i64} {
  func.func @_gcn_fused_kernel(%arg0: memref<16x32xf32, #tpu.memory_space<vmem>>, %arg1: memref<16x16xf32, #tpu.memory_space<vmem>>, %arg2: memref<32x64xf32, #tpu.memory_space<vmem>>, %arg3: memref<32x8xf32, #tpu.memory_space<vmem>>, %arg4: memref<8x32xf32, #tpu.memory_space<vmem>>, %arg5: memref<64x32xf32, #tpu.memory_space<vmem>>, %arg6: memref<64x1xf32, #tpu.memory_space<vmem>>, %arg7: memref<1x64xf32, #tpu.memory_space<vmem>>, %arg8: memref<32x64xf32, #tpu.memory_space<vmem>>, %arg9: memref<32x8xf32, #tpu.memory_space<vmem>>, %arg10: memref<8x32xf32, #tpu.memory_space<vmem>>, %arg11: memref<64x32xf32, #tpu.memory_space<vmem>>, %arg12: memref<64x1xf32, #tpu.memory_space<vmem>>, %arg13: memref<1x64xf32, #tpu.memory_space<vmem>>, %arg14: memref<32x32xf32, #tpu.memory_space<vmem>>, %arg15: memref<1x32xf32, #tpu.memory_space<vmem>>, %arg16: memref<32x64xf32, #tpu.memory_space<vmem>>, %arg17: memref<1x64xf32, #tpu.memory_space<vmem>>, %arg18: memref<64x64xf32, #tpu.memory_space<vmem>>, %arg19: memref<1x64xf32, #tpu.memory_space<vmem>>, %arg20: memref<16x32xf32, #tpu.memory_space<vmem>>) attributes {dimension_semantics = [], scalar_prefetch = 0 : i64, scratch_operands = 0 : i64, tpu.core_type = #tpu.core_type<tc>} {
    %c0 = arith.constant 0 : index
    %c0_0 = arith.constant 0 : index
    %0 = vector.load %arg0[%c0, %c0_0] : memref<16x32xf32, #tpu.memory_space<vmem>>, vector<16x32xf32>
    %c0_1 = arith.constant 0 : index
    %c0_2 = arith.constant 0 : index
    %1 = vector.load %arg1[%c0_1, %c0_2] : memref<16x16xf32, #tpu.memory_space<vmem>>, vector<16x16xf32>
    %cst = arith.constant 0.000000e+00 : f32
    %2 = vector.broadcast %cst : f32 to vector<16x16xf32>
    %3 = arith.cmpf ogt, %1, %2 : vector<16x16xf32>
    %cst_3 = arith.constant 0.000000e+00 : f32
    %cst_4 = arith.constant -9.000000e+15 : f32
    %4 = vector.broadcast %cst_3 : f32 to vector<16x16xf32>
    %5 = vector.broadcast %cst_4 : f32 to vector<16x16xf32>
    %6 = arith.select %3, %4, %5 : vector<16x16xi1>, vector<16x16xf32>
    %c0_5 = arith.constant 0 : index
    %c0_6 = arith.constant 0 : index
    %7 = vector.load %arg2[%c0_5, %c0_6] : memref<32x64xf32, #tpu.memory_space<vmem>>, vector<32x64xf32>
    %c0_7 = arith.constant 0 : index
    %c0_8 = arith.constant 0 : index
    %8 = vector.load %arg3[%c0_7, %c0_8] : memref<32x8xf32, #tpu.memory_space<vmem>>, vector<32x8xf32>
    %c0_9 = arith.constant 0 : index
    %c0_10 = arith.constant 0 : index
    %9 = vector.load %arg4[%c0_9, %c0_10] : memref<8x32xf32, #tpu.memory_space<vmem>>, vector<8x32xf32>
    %c0_11 = arith.constant 0 : index
    %c0_12 = arith.constant 0 : index
    %10 = vector.load %arg5[%c0_11, %c0_12] : memref<64x32xf32, #tpu.memory_space<vmem>>, vector<64x32xf32>
    %c0_13 = arith.constant 0 : index
    %c0_14 = arith.constant 0 : index
    %11 = vector.load %arg6[%c0_13, %c0_14] : memref<64x1xf32, #tpu.memory_space<vmem>>, vector<64x1xf32>
    %c0_15 = arith.constant 0 : index
    %c0_16 = arith.constant 0 : index
    %12 = vector.load %arg7[%c0_15, %c0_16] : memref<1x64xf32, #tpu.memory_space<vmem>>, vector<1x64xf32>
    %cst_17 = arith.constant dense<0.000000e+00> : vector<16x64xf32>
    %13 = tpu.matmul %0, %7, %cst_17 {dimension_numbers = #tpu.dot_dimension_numbers<[1], [0], [0], [1], [0, 0, 1, 1], [], []>} : vector<16x32xf32>, vector<32x64xf32>, vector<16x64xf32> -> vector<16x64xf32>
    %cst_18 = arith.constant dense<0.000000e+00> : vector<16x8xf32>
    %14 = tpu.matmul %0, %8, %cst_18 {dimension_numbers = #tpu.dot_dimension_numbers<[1], [0], [0], [1], [0, 0, 1, 1], [], []>} : vector<16x32xf32>, vector<32x8xf32>, vector<16x8xf32> -> vector<16x8xf32>
    %cst_19 = arith.constant dense<0.000000e+00> : vector<8x16xf32>
    %15 = tpu.matmul %9, %0, %cst_19 {dimension_numbers = #tpu.dot_dimension_numbers<[1], [1], [0], [0], [0, 0, 1, 0], [], []>} : vector<8x32xf32>, vector<16x32xf32>, vector<8x16xf32> -> vector<8x16xf32>
    %16 = vector.extract_strided_slice %14 {offsets = [0, 0], sizes = [16, 1], strides = [1, 1]} : vector<16x8xf32> to vector<16x1xf32>
    %17 = vector.extract_strided_slice %15 {offsets = [0, 0], sizes = [1, 16], strides = [1, 1]} : vector<8x16xf32> to vector<1x16xf32>
    %18 = vector.broadcast %16 : vector<16x1xf32> to vector<16x16xf32>
    %19 = vector.broadcast %17 : vector<1x16xf32> to vector<16x16xf32>
    %20 = arith.addf %18, %19 : vector<16x16xf32>
    %cst_20 = arith.constant 0.000000e+00 : f32
    %21 = vector.broadcast %cst_20 : f32 to vector<16x16xf32>
    %22 = arith.cmpf ogt, %20, %21 : vector<16x16xf32>
    %cst_21 = arith.constant 2.000000e-01 : f32
    %23 = vector.broadcast %cst_21 : f32 to vector<16x16xf32>
    %24 = arith.mulf %23, %20 : vector<16x16xf32>
    %25 = arith.select %22, %20, %24 : vector<16x16xi1>, vector<16x16xf32>
    %26 = arith.addf %25, %6 : vector<16x16xf32>
    %cst_22 = arith.constant dense<0xFF800000> : vector<16xf32>
    %27 = vector.multi_reduction <maximumf>, %26, %cst_22 [1] : vector<16x16xf32> to vector<16xf32>
    %28 = vector.shape_cast %27 : vector<16xf32> to vector<16x1xf32>
    %29 = vector.broadcast %28 : vector<16x1xf32> to vector<16x16xf32>
    %30 = arith.subf %26, %29 : vector<16x16xf32>
    %31 = math.exp %30 : vector<16x16xf32>
    %cst_23 = arith.constant dense<0.000000e+00> : vector<16xf32>
    %32 = vector.multi_reduction <add>, %31, %cst_23 [1] : vector<16x16xf32> to vector<16xf32>
    %33 = vector.shape_cast %32 : vector<16xf32> to vector<16x1xf32>
    %34 = tpu.reciprocal %33 {approx = true} : vector<16x1xf32> -> vector<16x1xf32>
    %35 = vector.broadcast %34 : vector<16x1xf32> to vector<16x16xf32>
    %36 = arith.mulf %31, %35 : vector<16x16xf32>
    %37 = vector.extract_strided_slice %13 {offsets = [0, 0], sizes = [16, 8], strides = [1, 1]} : vector<16x64xf32> to vector<16x8xf32>
    %cst_24 = arith.constant dense<0.000000e+00> : vector<16x8xf32>
    %38 = tpu.matmul %36, %37, %cst_24 {dimension_numbers = #tpu.dot_dimension_numbers<[1], [0], [0], [1], [0, 0, 1, 1], [], []>} : vector<16x16xf32>, vector<16x8xf32>, vector<16x8xf32> -> vector<16x8xf32>
    %cst_25 = arith.constant 0.000000e+00 : f32
    %39 = vector.broadcast %cst_25 : f32 to vector<16x8xf32>
    %40 = arith.cmpf ogt, %38, %39 : vector<16x8xf32>
    %cst_26 = arith.constant 0.000000e+00 : f32
    %41 = vector.broadcast %cst_26 : f32 to vector<16x8xf32>
    %42 = arith.minimumf %38, %41 : vector<16x8xf32>
    %43 = math.exp %42 : vector<16x8xf32>
    %cst_27 = arith.constant 1.000000e+00 : f32
    %44 = vector.broadcast %cst_27 : f32 to vector<16x8xf32>
    %45 = arith.subf %43, %44 : vector<16x8xf32>
    %46 = arith.select %40, %38, %45 : vector<16x8xi1>, vector<16x8xf32>
    %47 = vector.extract_strided_slice %14 {offsets = [0, 1], sizes = [16, 1], strides = [1, 1]} : vector<16x8xf32> to vector<16x1xf32>
    %48 = vector.extract_strided_slice %15 {offsets = [1, 0], sizes = [1, 16], strides = [1, 1]} : vector<8x16xf32> to vector<1x16xf32>
    %49 = vector.broadcast %47 : vector<16x1xf32> to vector<16x16xf32>
    %50 = vector.broadcast %48 : vector<1x16xf32> to vector<16x16xf32>
    %51 = arith.addf %49, %50 : vector<16x16xf32>
    %cst_28 = arith.constant 0.000000e+00 : f32
    %52 = vector.broadcast %cst_28 : f32 to vector<16x16xf32>
    %53 = arith.cmpf ogt, %51, %52 : vector<16x16xf32>
    %cst_29 = arith.constant 2.000000e-01 : f32
    %54 = vector.broadcast %cst_29 : f32 to vector<16x16xf32>
    %55 = arith.mulf %54, %51 : vector<16x16xf32>
    %56 = arith.select %53, %51, %55 : vector<16x16xi1>, vector<16x16xf32>
    %57 = arith.addf %56, %6 : vector<16x16xf32>
    %cst_30 = arith.constant dense<0xFF800000> : vector<16xf32>
    %58 = vector.multi_reduction <maximumf>, %57, %cst_30 [1] : vector<16x16xf32> to vector<16xf32>
    %59 = vector.shape_cast %58 : vector<16xf32> to vector<16x1xf32>
    %60 = vector.broadcast %59 : vector<16x1xf32> to vector<16x16xf32>
    %61 = arith.subf %57, %60 : vector<16x16xf32>
    %62 = math.exp %61 : vector<16x16xf32>
    %cst_31 = arith.constant dense<0.000000e+00> : vector<16xf32>
    %63 = vector.multi_reduction <add>, %62, %cst_31 [1] : vector<16x16xf32> to vector<16xf32>
    %64 = vector.shape_cast %63 : vector<16xf32> to vector<16x1xf32>
    %65 = tpu.reciprocal %64 {approx = true} : vector<16x1xf32> -> vector<16x1xf32>
    %66 = vector.broadcast %65 : vector<16x1xf32> to vector<16x16xf32>
    %67 = arith.mulf %62, %66 : vector<16x16xf32>
    %68 = vector.extract_strided_slice %13 {offsets = [0, 8], sizes = [16, 8], strides = [1, 1]} : vector<16x64xf32> to vector<16x8xf32>
    %cst_32 = arith.constant dense<0.000000e+00> : vector<16x8xf32>
    %69 = tpu.matmul %67, %68, %cst_32 {dimension_numbers = #tpu.dot_dimension_numbers<[1], [0], [0], [1], [0, 0, 1, 1], [], []>} : vector<16x16xf32>, vector<16x8xf32>, vector<16x8xf32> -> vector<16x8xf32>
    %cst_33 = arith.constant 0.000000e+00 : f32
    %70 = vector.broadcast %cst_33 : f32 to vector<16x8xf32>
    %71 = arith.cmpf ogt, %69, %70 : vector<16x8xf32>
    %cst_34 = arith.constant 0.000000e+00 : f32
    %72 = vector.broadcast %cst_34 : f32 to vector<16x8xf32>
    %73 = arith.minimumf %69, %72 : vector<16x8xf32>
    %74 = math.exp %73 : vector<16x8xf32>
    %cst_35 = arith.constant 1.000000e+00 : f32
    %75 = vector.broadcast %cst_35 : f32 to vector<16x8xf32>
    %76 = arith.subf %74, %75 : vector<16x8xf32>
    %77 = arith.select %71, %69, %76 : vector<16x8xi1>, vector<16x8xf32>
    %78 = vector.extract_strided_slice %14 {offsets = [0, 2], sizes = [16, 1], strides = [1, 1]} : vector<16x8xf32> to vector<16x1xf32>
    %79 = vector.extract_strided_slice %15 {offsets = [2, 0], sizes = [1, 16], strides = [1, 1]} : vector<8x16xf32> to vector<1x16xf32>
    %80 = vector.broadcast %78 : vector<16x1xf32> to vector<16x16xf32>
    %81 = vector.broadcast %79 : vector<1x16xf32> to vector<16x16xf32>
    %82 = arith.addf %80, %81 : vector<16x16xf32>
    %cst_36 = arith.constant 0.000000e+00 : f32
    %83 = vector.broadcast %cst_36 : f32 to vector<16x16xf32>
    %84 = arith.cmpf ogt, %82, %83 : vector<16x16xf32>
    %cst_37 = arith.constant 2.000000e-01 : f32
    %85 = vector.broadcast %cst_37 : f32 to vector<16x16xf32>
    %86 = arith.mulf %85, %82 : vector<16x16xf32>
    %87 = arith.select %84, %82, %86 : vector<16x16xi1>, vector<16x16xf32>
    %88 = arith.addf %87, %6 : vector<16x16xf32>
    %cst_38 = arith.constant dense<0xFF800000> : vector<16xf32>
    %89 = vector.multi_reduction <maximumf>, %88, %cst_38 [1] : vector<16x16xf32> to vector<16xf32>
    %90 = vector.shape_cast %89 : vector<16xf32> to vector<16x1xf32>
    %91 = vector.broadcast %90 : vector<16x1xf32> to vector<16x16xf32>
    %92 = arith.subf %88, %91 : vector<16x16xf32>
    %93 = math.exp %92 : vector<16x16xf32>
    %cst_39 = arith.constant dense<0.000000e+00> : vector<16xf32>
    %94 = vector.multi_reduction <add>, %93, %cst_39 [1] : vector<16x16xf32> to vector<16xf32>
    %95 = vector.shape_cast %94 : vector<16xf32> to vector<16x1xf32>
    %96 = tpu.reciprocal %95 {approx = true} : vector<16x1xf32> -> vector<16x1xf32>
    %97 = vector.broadcast %96 : vector<16x1xf32> to vector<16x16xf32>
    %98 = arith.mulf %93, %97 : vector<16x16xf32>
    %99 = vector.extract_strided_slice %13 {offsets = [0, 16], sizes = [16, 8], strides = [1, 1]} : vector<16x64xf32> to vector<16x8xf32>
    %cst_40 = arith.constant dense<0.000000e+00> : vector<16x8xf32>
    %100 = tpu.matmul %98, %99, %cst_40 {dimension_numbers = #tpu.dot_dimension_numbers<[1], [0], [0], [1], [0, 0, 1, 1], [], []>} : vector<16x16xf32>, vector<16x8xf32>, vector<16x8xf32> -> vector<16x8xf32>
    %cst_41 = arith.constant 0.000000e+00 : f32
    %101 = vector.broadcast %cst_41 : f32 to vector<16x8xf32>
    %102 = arith.cmpf ogt, %100, %101 : vector<16x8xf32>
    %cst_42 = arith.constant 0.000000e+00 : f32
    %103 = vector.broadcast %cst_42 : f32 to vector<16x8xf32>
    %104 = arith.minimumf %100, %103 : vector<16x8xf32>
    %105 = math.exp %104 : vector<16x8xf32>
    %cst_43 = arith.constant 1.000000e+00 : f32
    %106 = vector.broadcast %cst_43 : f32 to vector<16x8xf32>
    %107 = arith.subf %105, %106 : vector<16x8xf32>
    %108 = arith.select %102, %100, %107 : vector<16x8xi1>, vector<16x8xf32>
    %109 = vector.extract_strided_slice %14 {offsets = [0, 3], sizes = [16, 1], strides = [1, 1]} : vector<16x8xf32> to vector<16x1xf32>
    %110 = vector.extract_strided_slice %15 {offsets = [3, 0], sizes = [1, 16], strides = [1, 1]} : vector<8x16xf32> to vector<1x16xf32>
    %111 = vector.broadcast %109 : vector<16x1xf32> to vector<16x16xf32>
    %112 = vector.broadcast %110 : vector<1x16xf32> to vector<16x16xf32>
    %113 = arith.addf %111, %112 : vector<16x16xf32>
    %cst_44 = arith.constant 0.000000e+00 : f32
    %114 = vector.broadcast %cst_44 : f32 to vector<16x16xf32>
    %115 = arith.cmpf ogt, %113, %114 : vector<16x16xf32>
    %cst_45 = arith.constant 2.000000e-01 : f32
    %116 = vector.broadcast %cst_45 : f32 to vector<16x16xf32>
    %117 = arith.mulf %116, %113 : vector<16x16xf32>
    %118 = arith.select %115, %113, %117 : vector<16x16xi1>, vector<16x16xf32>
    %119 = arith.addf %118, %6 : vector<16x16xf32>
    %cst_46 = arith.constant dense<0xFF800000> : vector<16xf32>
    %120 = vector.multi_reduction <maximumf>, %119, %cst_46 [1] : vector<16x16xf32> to vector<16xf32>
    %121 = vector.shape_cast %120 : vector<16xf32> to vector<16x1xf32>
    %122 = vector.broadcast %121 : vector<16x1xf32> to vector<16x16xf32>
    %123 = arith.subf %119, %122 : vector<16x16xf32>
    %124 = math.exp %123 : vector<16x16xf32>
    %cst_47 = arith.constant dense<0.000000e+00> : vector<16xf32>
    %125 = vector.multi_reduction <add>, %124, %cst_47 [1] : vector<16x16xf32> to vector<16xf32>
    %126 = vector.shape_cast %125 : vector<16xf32> to vector<16x1xf32>
    %127 = tpu.reciprocal %126 {approx = true} : vector<16x1xf32> -> vector<16x1xf32>
    %128 = vector.broadcast %127 : vector<16x1xf32> to vector<16x16xf32>
    %129 = arith.mulf %124, %128 : vector<16x16xf32>
    %130 = vector.extract_strided_slice %13 {offsets = [0, 24], sizes = [16, 8], strides = [1, 1]} : vector<16x64xf32> to vector<16x8xf32>
    %cst_48 = arith.constant dense<0.000000e+00> : vector<16x8xf32>
    %131 = tpu.matmul %129, %130, %cst_48 {dimension_numbers = #tpu.dot_dimension_numbers<[1], [0], [0], [1], [0, 0, 1, 1], [], []>} : vector<16x16xf32>, vector<16x8xf32>, vector<16x8xf32> -> vector<16x8xf32>
    %cst_49 = arith.constant 0.000000e+00 : f32
    %132 = vector.broadcast %cst_49 : f32 to vector<16x8xf32>
    %133 = arith.cmpf ogt, %131, %132 : vector<16x8xf32>
    %cst_50 = arith.constant 0.000000e+00 : f32
    %134 = vector.broadcast %cst_50 : f32 to vector<16x8xf32>
    %135 = arith.minimumf %131, %134 : vector<16x8xf32>
    %136 = math.exp %135 : vector<16x8xf32>
    %cst_51 = arith.constant 1.000000e+00 : f32
    %137 = vector.broadcast %cst_51 : f32 to vector<16x8xf32>
    %138 = arith.subf %136, %137 : vector<16x8xf32>
    %139 = arith.select %133, %131, %138 : vector<16x8xi1>, vector<16x8xf32>
    %140 = vector.extract_strided_slice %14 {offsets = [0, 4], sizes = [16, 1], strides = [1, 1]} : vector<16x8xf32> to vector<16x1xf32>
    %141 = vector.extract_strided_slice %15 {offsets = [4, 0], sizes = [1, 16], strides = [1, 1]} : vector<8x16xf32> to vector<1x16xf32>
    %142 = vector.broadcast %140 : vector<16x1xf32> to vector<16x16xf32>
    %143 = vector.broadcast %141 : vector<1x16xf32> to vector<16x16xf32>
    %144 = arith.addf %142, %143 : vector<16x16xf32>
    %cst_52 = arith.constant 0.000000e+00 : f32
    %145 = vector.broadcast %cst_52 : f32 to vector<16x16xf32>
    %146 = arith.cmpf ogt, %144, %145 : vector<16x16xf32>
    %cst_53 = arith.constant 2.000000e-01 : f32
    %147 = vector.broadcast %cst_53 : f32 to vector<16x16xf32>
    %148 = arith.mulf %147, %144 : vector<16x16xf32>
    %149 = arith.select %146, %144, %148 : vector<16x16xi1>, vector<16x16xf32>
    %150 = arith.addf %149, %6 : vector<16x16xf32>
    %cst_54 = arith.constant dense<0xFF800000> : vector<16xf32>
    %151 = vector.multi_reduction <maximumf>, %150, %cst_54 [1] : vector<16x16xf32> to vector<16xf32>
    %152 = vector.shape_cast %151 : vector<16xf32> to vector<16x1xf32>
    %153 = vector.broadcast %152 : vector<16x1xf32> to vector<16x16xf32>
    %154 = arith.subf %150, %153 : vector<16x16xf32>
    %155 = math.exp %154 : vector<16x16xf32>
    %cst_55 = arith.constant dense<0.000000e+00> : vector<16xf32>
    %156 = vector.multi_reduction <add>, %155, %cst_55 [1] : vector<16x16xf32> to vector<16xf32>
    %157 = vector.shape_cast %156 : vector<16xf32> to vector<16x1xf32>
    %158 = tpu.reciprocal %157 {approx = true} : vector<16x1xf32> -> vector<16x1xf32>
    %159 = vector.broadcast %158 : vector<16x1xf32> to vector<16x16xf32>
    %160 = arith.mulf %155, %159 : vector<16x16xf32>
    %161 = vector.extract_strided_slice %13 {offsets = [0, 32], sizes = [16, 8], strides = [1, 1]} : vector<16x64xf32> to vector<16x8xf32>
    %cst_56 = arith.constant dense<0.000000e+00> : vector<16x8xf32>
    %162 = tpu.matmul %160, %161, %cst_56 {dimension_numbers = #tpu.dot_dimension_numbers<[1], [0], [0], [1], [0, 0, 1, 1], [], []>} : vector<16x16xf32>, vector<16x8xf32>, vector<16x8xf32> -> vector<16x8xf32>
    %cst_57 = arith.constant 0.000000e+00 : f32
    %163 = vector.broadcast %cst_57 : f32 to vector<16x8xf32>
    %164 = arith.cmpf ogt, %162, %163 : vector<16x8xf32>
    %cst_58 = arith.constant 0.000000e+00 : f32
    %165 = vector.broadcast %cst_58 : f32 to vector<16x8xf32>
    %166 = arith.minimumf %162, %165 : vector<16x8xf32>
    %167 = math.exp %166 : vector<16x8xf32>
    %cst_59 = arith.constant 1.000000e+00 : f32
    %168 = vector.broadcast %cst_59 : f32 to vector<16x8xf32>
    %169 = arith.subf %167, %168 : vector<16x8xf32>
    %170 = arith.select %164, %162, %169 : vector<16x8xi1>, vector<16x8xf32>
    %171 = vector.extract_strided_slice %14 {offsets = [0, 5], sizes = [16, 1], strides = [1, 1]} : vector<16x8xf32> to vector<16x1xf32>
    %172 = vector.extract_strided_slice %15 {offsets = [5, 0], sizes = [1, 16], strides = [1, 1]} : vector<8x16xf32> to vector<1x16xf32>
    %173 = vector.broadcast %171 : vector<16x1xf32> to vector<16x16xf32>
    %174 = vector.broadcast %172 : vector<1x16xf32> to vector<16x16xf32>
    %175 = arith.addf %173, %174 : vector<16x16xf32>
    %cst_60 = arith.constant 0.000000e+00 : f32
    %176 = vector.broadcast %cst_60 : f32 to vector<16x16xf32>
    %177 = arith.cmpf ogt, %175, %176 : vector<16x16xf32>
    %cst_61 = arith.constant 2.000000e-01 : f32
    %178 = vector.broadcast %cst_61 : f32 to vector<16x16xf32>
    %179 = arith.mulf %178, %175 : vector<16x16xf32>
    %180 = arith.select %177, %175, %179 : vector<16x16xi1>, vector<16x16xf32>
    %181 = arith.addf %180, %6 : vector<16x16xf32>
    %cst_62 = arith.constant dense<0xFF800000> : vector<16xf32>
    %182 = vector.multi_reduction <maximumf>, %181, %cst_62 [1] : vector<16x16xf32> to vector<16xf32>
    %183 = vector.shape_cast %182 : vector<16xf32> to vector<16x1xf32>
    %184 = vector.broadcast %183 : vector<16x1xf32> to vector<16x16xf32>
    %185 = arith.subf %181, %184 : vector<16x16xf32>
    %186 = math.exp %185 : vector<16x16xf32>
    %cst_63 = arith.constant dense<0.000000e+00> : vector<16xf32>
    %187 = vector.multi_reduction <add>, %186, %cst_63 [1] : vector<16x16xf32> to vector<16xf32>
    %188 = vector.shape_cast %187 : vector<16xf32> to vector<16x1xf32>
    %189 = tpu.reciprocal %188 {approx = true} : vector<16x1xf32> -> vector<16x1xf32>
    %190 = vector.broadcast %189 : vector<16x1xf32> to vector<16x16xf32>
    %191 = arith.mulf %186, %190 : vector<16x16xf32>
    %192 = vector.extract_strided_slice %13 {offsets = [0, 40], sizes = [16, 8], strides = [1, 1]} : vector<16x64xf32> to vector<16x8xf32>
    %cst_64 = arith.constant dense<0.000000e+00> : vector<16x8xf32>
    %193 = tpu.matmul %191, %192, %cst_64 {dimension_numbers = #tpu.dot_dimension_numbers<[1], [0], [0], [1], [0, 0, 1, 1], [], []>} : vector<16x16xf32>, vector<16x8xf32>, vector<16x8xf32> -> vector<16x8xf32>
    %cst_65 = arith.constant 0.000000e+00 : f32
    %194 = vector.broadcast %cst_65 : f32 to vector<16x8xf32>
    %195 = arith.cmpf ogt, %193, %194 : vector<16x8xf32>
    %cst_66 = arith.constant 0.000000e+00 : f32
    %196 = vector.broadcast %cst_66 : f32 to vector<16x8xf32>
    %197 = arith.minimumf %193, %196 : vector<16x8xf32>
    %198 = math.exp %197 : vector<16x8xf32>
    %cst_67 = arith.constant 1.000000e+00 : f32
    %199 = vector.broadcast %cst_67 : f32 to vector<16x8xf32>
    %200 = arith.subf %198, %199 : vector<16x8xf32>
    %201 = arith.select %195, %193, %200 : vector<16x8xi1>, vector<16x8xf32>
    %202 = vector.extract_strided_slice %14 {offsets = [0, 6], sizes = [16, 1], strides = [1, 1]} : vector<16x8xf32> to vector<16x1xf32>
    %203 = vector.extract_strided_slice %15 {offsets = [6, 0], sizes = [1, 16], strides = [1, 1]} : vector<8x16xf32> to vector<1x16xf32>
    %204 = vector.broadcast %202 : vector<16x1xf32> to vector<16x16xf32>
    %205 = vector.broadcast %203 : vector<1x16xf32> to vector<16x16xf32>
    %206 = arith.addf %204, %205 : vector<16x16xf32>
    %cst_68 = arith.constant 0.000000e+00 : f32
    %207 = vector.broadcast %cst_68 : f32 to vector<16x16xf32>
    %208 = arith.cmpf ogt, %206, %207 : vector<16x16xf32>
    %cst_69 = arith.constant 2.000000e-01 : f32
    %209 = vector.broadcast %cst_69 : f32 to vector<16x16xf32>
    %210 = arith.mulf %209, %206 : vector<16x16xf32>
    %211 = arith.select %208, %206, %210 : vector<16x16xi1>, vector<16x16xf32>
    %212 = arith.addf %211, %6 : vector<16x16xf32>
    %cst_70 = arith.constant dense<0xFF800000> : vector<16xf32>
    %213 = vector.multi_reduction <maximumf>, %212, %cst_70 [1] : vector<16x16xf32> to vector<16xf32>
    %214 = vector.shape_cast %213 : vector<16xf32> to vector<16x1xf32>
    %215 = vector.broadcast %214 : vector<16x1xf32> to vector<16x16xf32>
    %216 = arith.subf %212, %215 : vector<16x16xf32>
    %217 = math.exp %216 : vector<16x16xf32>
    %cst_71 = arith.constant dense<0.000000e+00> : vector<16xf32>
    %218 = vector.multi_reduction <add>, %217, %cst_71 [1] : vector<16x16xf32> to vector<16xf32>
    %219 = vector.shape_cast %218 : vector<16xf32> to vector<16x1xf32>
    %220 = tpu.reciprocal %219 {approx = true} : vector<16x1xf32> -> vector<16x1xf32>
    %221 = vector.broadcast %220 : vector<16x1xf32> to vector<16x16xf32>
    %222 = arith.mulf %217, %221 : vector<16x16xf32>
    %223 = vector.extract_strided_slice %13 {offsets = [0, 48], sizes = [16, 8], strides = [1, 1]} : vector<16x64xf32> to vector<16x8xf32>
    %cst_72 = arith.constant dense<0.000000e+00> : vector<16x8xf32>
    %224 = tpu.matmul %222, %223, %cst_72 {dimension_numbers = #tpu.dot_dimension_numbers<[1], [0], [0], [1], [0, 0, 1, 1], [], []>} : vector<16x16xf32>, vector<16x8xf32>, vector<16x8xf32> -> vector<16x8xf32>
    %cst_73 = arith.constant 0.000000e+00 : f32
    %225 = vector.broadcast %cst_73 : f32 to vector<16x8xf32>
    %226 = arith.cmpf ogt, %224, %225 : vector<16x8xf32>
    %cst_74 = arith.constant 0.000000e+00 : f32
    %227 = vector.broadcast %cst_74 : f32 to vector<16x8xf32>
    %228 = arith.minimumf %224, %227 : vector<16x8xf32>
    %229 = math.exp %228 : vector<16x8xf32>
    %cst_75 = arith.constant 1.000000e+00 : f32
    %230 = vector.broadcast %cst_75 : f32 to vector<16x8xf32>
    %231 = arith.subf %229, %230 : vector<16x8xf32>
    %232 = arith.select %226, %224, %231 : vector<16x8xi1>, vector<16x8xf32>
    %233 = vector.extract_strided_slice %14 {offsets = [0, 7], sizes = [16, 1], strides = [1, 1]} : vector<16x8xf32> to vector<16x1xf32>
    %234 = vector.extract_strided_slice %15 {offsets = [7, 0], sizes = [1, 16], strides = [1, 1]} : vector<8x16xf32> to vector<1x16xf32>
    %235 = vector.broadcast %233 : vector<16x1xf32> to vector<16x16xf32>
    %236 = vector.broadcast %234 : vector<1x16xf32> to vector<16x16xf32>
    %237 = arith.addf %235, %236 : vector<16x16xf32>
    %cst_76 = arith.constant 0.000000e+00 : f32
    %238 = vector.broadcast %cst_76 : f32 to vector<16x16xf32>
    %239 = arith.cmpf ogt, %237, %238 : vector<16x16xf32>
    %cst_77 = arith.constant 2.000000e-01 : f32
    %240 = vector.broadcast %cst_77 : f32 to vector<16x16xf32>
    %241 = arith.mulf %240, %237 : vector<16x16xf32>
    %242 = arith.select %239, %237, %241 : vector<16x16xi1>, vector<16x16xf32>
    %243 = arith.addf %242, %6 : vector<16x16xf32>
    %cst_78 = arith.constant dense<0xFF800000> : vector<16xf32>
    %244 = vector.multi_reduction <maximumf>, %243, %cst_78 [1] : vector<16x16xf32> to vector<16xf32>
    %245 = vector.shape_cast %244 : vector<16xf32> to vector<16x1xf32>
    %246 = vector.broadcast %245 : vector<16x1xf32> to vector<16x16xf32>
    %247 = arith.subf %243, %246 : vector<16x16xf32>
    %248 = math.exp %247 : vector<16x16xf32>
    %cst_79 = arith.constant dense<0.000000e+00> : vector<16xf32>
    %249 = vector.multi_reduction <add>, %248, %cst_79 [1] : vector<16x16xf32> to vector<16xf32>
    %250 = vector.shape_cast %249 : vector<16xf32> to vector<16x1xf32>
    %251 = tpu.reciprocal %250 {approx = true} : vector<16x1xf32> -> vector<16x1xf32>
    %252 = vector.broadcast %251 : vector<16x1xf32> to vector<16x16xf32>
    %253 = arith.mulf %248, %252 : vector<16x16xf32>
    %254 = vector.extract_strided_slice %13 {offsets = [0, 56], sizes = [16, 8], strides = [1, 1]} : vector<16x64xf32> to vector<16x8xf32>
    %cst_80 = arith.constant dense<0.000000e+00> : vector<16x8xf32>
    %255 = tpu.matmul %253, %254, %cst_80 {dimension_numbers = #tpu.dot_dimension_numbers<[1], [0], [0], [1], [0, 0, 1, 1], [], []>} : vector<16x16xf32>, vector<16x8xf32>, vector<16x8xf32> -> vector<16x8xf32>
    %cst_81 = arith.constant 0.000000e+00 : f32
    %256 = vector.broadcast %cst_81 : f32 to vector<16x8xf32>
    %257 = arith.cmpf ogt, %255, %256 : vector<16x8xf32>
    %cst_82 = arith.constant 0.000000e+00 : f32
    %258 = vector.broadcast %cst_82 : f32 to vector<16x8xf32>
    %259 = arith.minimumf %255, %258 : vector<16x8xf32>
    %260 = math.exp %259 : vector<16x8xf32>
    %cst_83 = arith.constant 1.000000e+00 : f32
    %261 = vector.broadcast %cst_83 : f32 to vector<16x8xf32>
    %262 = arith.subf %260, %261 : vector<16x8xf32>
    %263 = arith.select %257, %255, %262 : vector<16x8xi1>, vector<16x8xf32>
    %264 = tpu.concatenate %46, %77, %108, %139, %170, %201, %232, %263 in 1 : vector<16x8xf32>, vector<16x8xf32>, vector<16x8xf32>, vector<16x8xf32>, vector<16x8xf32>, vector<16x8xf32>, vector<16x8xf32>, vector<16x8xf32> -> vector<16x64xf32>
    %cst_84 = arith.constant dense<0.000000e+00> : vector<16x32xf32>
    %265 = tpu.matmul %264, %10, %cst_84 {dimension_numbers = #tpu.dot_dimension_numbers<[1], [0], [0], [1], [0, 0, 1, 1], [], []>} : vector<16x64xf32>, vector<64x32xf32>, vector<16x32xf32> -> vector<16x32xf32>
    %cst_85 = arith.constant dense<0.000000e+00> : vector<16x1xf32>
    %266 = tpu.matmul %264, %11, %cst_85 {dimension_numbers = #tpu.dot_dimension_numbers<[1], [0], [0], [1], [0, 0, 1, 1], [], []>} : vector<16x64xf32>, vector<64x1xf32>, vector<16x1xf32> -> vector<16x1xf32>
    %cst_86 = arith.constant dense<0.000000e+00> : vector<1x16xf32>
    %267 = tpu.matmul %12, %264, %cst_86 {dimension_numbers = #tpu.dot_dimension_numbers<[1], [1], [0], [0], [0, 0, 1, 0], [], []>} : vector<1x64xf32>, vector<16x64xf32>, vector<1x16xf32> -> vector<1x16xf32>
    %268 = vector.broadcast %266 : vector<16x1xf32> to vector<16x16xf32>
    %269 = vector.broadcast %267 : vector<1x16xf32> to vector<16x16xf32>
    %270 = arith.addf %268, %269 : vector<16x16xf32>
    %cst_87 = arith.constant 0.000000e+00 : f32
    %271 = vector.broadcast %cst_87 : f32 to vector<16x16xf32>
    %272 = arith.cmpf ogt, %270, %271 : vector<16x16xf32>
    %cst_88 = arith.constant 2.000000e-01 : f32
    %273 = vector.broadcast %cst_88 : f32 to vector<16x16xf32>
    %274 = arith.mulf %273, %270 : vector<16x16xf32>
    %275 = arith.select %272, %270, %274 : vector<16x16xi1>, vector<16x16xf32>
    %276 = arith.addf %275, %6 : vector<16x16xf32>
    %cst_89 = arith.constant dense<0xFF800000> : vector<16xf32>
    %277 = vector.multi_reduction <maximumf>, %276, %cst_89 [1] : vector<16x16xf32> to vector<16xf32>
    %278 = vector.shape_cast %277 : vector<16xf32> to vector<16x1xf32>
    %279 = vector.broadcast %278 : vector<16x1xf32> to vector<16x16xf32>
    %280 = arith.subf %276, %279 : vector<16x16xf32>
    %281 = math.exp %280 : vector<16x16xf32>
    %cst_90 = arith.constant dense<0.000000e+00> : vector<16xf32>
    %282 = vector.multi_reduction <add>, %281, %cst_90 [1] : vector<16x16xf32> to vector<16xf32>
    %283 = vector.shape_cast %282 : vector<16xf32> to vector<16x1xf32>
    %284 = tpu.reciprocal %283 {approx = true} : vector<16x1xf32> -> vector<16x1xf32>
    %285 = vector.broadcast %284 : vector<16x1xf32> to vector<16x16xf32>
    %286 = arith.mulf %281, %285 : vector<16x16xf32>
    %cst_91 = arith.constant dense<0.000000e+00> : vector<16x32xf32>
    %287 = tpu.matmul %286, %265, %cst_91 {dimension_numbers = #tpu.dot_dimension_numbers<[1], [0], [0], [1], [0, 0, 1, 1], [], []>} : vector<16x16xf32>, vector<16x32xf32>, vector<16x32xf32> -> vector<16x32xf32>
    %cst_92 = arith.constant 0.000000e+00 : f32
    %288 = vector.broadcast %cst_92 : f32 to vector<16x32xf32>
    %289 = arith.cmpf ogt, %287, %288 : vector<16x32xf32>
    %cst_93 = arith.constant 0.000000e+00 : f32
    %290 = vector.broadcast %cst_93 : f32 to vector<16x32xf32>
    %291 = arith.minimumf %287, %290 : vector<16x32xf32>
    %292 = math.exp %291 : vector<16x32xf32>
    %cst_94 = arith.constant 1.000000e+00 : f32
    %293 = vector.broadcast %cst_94 : f32 to vector<16x32xf32>
    %294 = arith.subf %292, %293 : vector<16x32xf32>
    %295 = arith.select %289, %287, %294 : vector<16x32xi1>, vector<16x32xf32>
    %c0_95 = arith.constant 0 : index
    %c0_96 = arith.constant 0 : index
    %296 = vector.load %arg8[%c0_95, %c0_96] : memref<32x64xf32, #tpu.memory_space<vmem>>, vector<32x64xf32>
    %c0_97 = arith.constant 0 : index
    %c0_98 = arith.constant 0 : index
    %297 = vector.load %arg9[%c0_97, %c0_98] : memref<32x8xf32, #tpu.memory_space<vmem>>, vector<32x8xf32>
    %c0_99 = arith.constant 0 : index
    %c0_100 = arith.constant 0 : index
    %298 = vector.load %arg10[%c0_99, %c0_100] : memref<8x32xf32, #tpu.memory_space<vmem>>, vector<8x32xf32>
    %c0_101 = arith.constant 0 : index
    %c0_102 = arith.constant 0 : index
    %299 = vector.load %arg11[%c0_101, %c0_102] : memref<64x32xf32, #tpu.memory_space<vmem>>, vector<64x32xf32>
    %c0_103 = arith.constant 0 : index
    %c0_104 = arith.constant 0 : index
    %300 = vector.load %arg12[%c0_103, %c0_104] : memref<64x1xf32, #tpu.memory_space<vmem>>, vector<64x1xf32>
    %c0_105 = arith.constant 0 : index
    %c0_106 = arith.constant 0 : index
    %301 = vector.load %arg13[%c0_105, %c0_106] : memref<1x64xf32, #tpu.memory_space<vmem>>, vector<1x64xf32>
    %cst_107 = arith.constant dense<0.000000e+00> : vector<16x64xf32>
    %302 = tpu.matmul %295, %296, %cst_107 {dimension_numbers = #tpu.dot_dimension_numbers<[1], [0], [0], [1], [0, 0, 1, 1], [], []>} : vector<16x32xf32>, vector<32x64xf32>, vector<16x64xf32> -> vector<16x64xf32>
    %cst_108 = arith.constant dense<0.000000e+00> : vector<16x8xf32>
    %303 = tpu.matmul %295, %297, %cst_108 {dimension_numbers = #tpu.dot_dimension_numbers<[1], [0], [0], [1], [0, 0, 1, 1], [], []>} : vector<16x32xf32>, vector<32x8xf32>, vector<16x8xf32> -> vector<16x8xf32>
    %cst_109 = arith.constant dense<0.000000e+00> : vector<8x16xf32>
    %304 = tpu.matmul %298, %295, %cst_109 {dimension_numbers = #tpu.dot_dimension_numbers<[1], [1], [0], [0], [0, 0, 1, 0], [], []>} : vector<8x32xf32>, vector<16x32xf32>, vector<8x16xf32> -> vector<8x16xf32>
    %305 = vector.extract_strided_slice %303 {offsets = [0, 0], sizes = [16, 1], strides = [1, 1]} : vector<16x8xf32> to vector<16x1xf32>
    %306 = vector.extract_strided_slice %304 {offsets = [0, 0], sizes = [1, 16], strides = [1, 1]} : vector<8x16xf32> to vector<1x16xf32>
    %307 = vector.broadcast %305 : vector<16x1xf32> to vector<16x16xf32>
    %308 = vector.broadcast %306 : vector<1x16xf32> to vector<16x16xf32>
    %309 = arith.addf %307, %308 : vector<16x16xf32>
    %cst_110 = arith.constant 0.000000e+00 : f32
    %310 = vector.broadcast %cst_110 : f32 to vector<16x16xf32>
    %311 = arith.cmpf ogt, %309, %310 : vector<16x16xf32>
    %cst_111 = arith.constant 2.000000e-01 : f32
    %312 = vector.broadcast %cst_111 : f32 to vector<16x16xf32>
    %313 = arith.mulf %312, %309 : vector<16x16xf32>
    %314 = arith.select %311, %309, %313 : vector<16x16xi1>, vector<16x16xf32>
    %315 = arith.addf %314, %6 : vector<16x16xf32>
    %cst_112 = arith.constant dense<0xFF800000> : vector<16xf32>
    %316 = vector.multi_reduction <maximumf>, %315, %cst_112 [1] : vector<16x16xf32> to vector<16xf32>
    %317 = vector.shape_cast %316 : vector<16xf32> to vector<16x1xf32>
    %318 = vector.broadcast %317 : vector<16x1xf32> to vector<16x16xf32>
    %319 = arith.subf %315, %318 : vector<16x16xf32>
    %320 = math.exp %319 : vector<16x16xf32>
    %cst_113 = arith.constant dense<0.000000e+00> : vector<16xf32>
    %321 = vector.multi_reduction <add>, %320, %cst_113 [1] : vector<16x16xf32> to vector<16xf32>
    %322 = vector.shape_cast %321 : vector<16xf32> to vector<16x1xf32>
    %323 = tpu.reciprocal %322 {approx = true} : vector<16x1xf32> -> vector<16x1xf32>
    %324 = vector.broadcast %323 : vector<16x1xf32> to vector<16x16xf32>
    %325 = arith.mulf %320, %324 : vector<16x16xf32>
    %326 = vector.extract_strided_slice %302 {offsets = [0, 0], sizes = [16, 8], strides = [1, 1]} : vector<16x64xf32> to vector<16x8xf32>
    %cst_114 = arith.constant dense<0.000000e+00> : vector<16x8xf32>
    %327 = tpu.matmul %325, %326, %cst_114 {dimension_numbers = #tpu.dot_dimension_numbers<[1], [0], [0], [1], [0, 0, 1, 1], [], []>} : vector<16x16xf32>, vector<16x8xf32>, vector<16x8xf32> -> vector<16x8xf32>
    %cst_115 = arith.constant 0.000000e+00 : f32
    %328 = vector.broadcast %cst_115 : f32 to vector<16x8xf32>
    %329 = arith.cmpf ogt, %327, %328 : vector<16x8xf32>
    %cst_116 = arith.constant 0.000000e+00 : f32
    %330 = vector.broadcast %cst_116 : f32 to vector<16x8xf32>
    %331 = arith.minimumf %327, %330 : vector<16x8xf32>
    %332 = math.exp %331 : vector<16x8xf32>
    %cst_117 = arith.constant 1.000000e+00 : f32
    %333 = vector.broadcast %cst_117 : f32 to vector<16x8xf32>
    %334 = arith.subf %332, %333 : vector<16x8xf32>
    %335 = arith.select %329, %327, %334 : vector<16x8xi1>, vector<16x8xf32>
    %336 = vector.extract_strided_slice %303 {offsets = [0, 1], sizes = [16, 1], strides = [1, 1]} : vector<16x8xf32> to vector<16x1xf32>
    %337 = vector.extract_strided_slice %304 {offsets = [1, 0], sizes = [1, 16], strides = [1, 1]} : vector<8x16xf32> to vector<1x16xf32>
    %338 = vector.broadcast %336 : vector<16x1xf32> to vector<16x16xf32>
    %339 = vector.broadcast %337 : vector<1x16xf32> to vector<16x16xf32>
    %340 = arith.addf %338, %339 : vector<16x16xf32>
    %cst_118 = arith.constant 0.000000e+00 : f32
    %341 = vector.broadcast %cst_118 : f32 to vector<16x16xf32>
    %342 = arith.cmpf ogt, %340, %341 : vector<16x16xf32>
    %cst_119 = arith.constant 2.000000e-01 : f32
    %343 = vector.broadcast %cst_119 : f32 to vector<16x16xf32>
    %344 = arith.mulf %343, %340 : vector<16x16xf32>
    %345 = arith.select %342, %340, %344 : vector<16x16xi1>, vector<16x16xf32>
    %346 = arith.addf %345, %6 : vector<16x16xf32>
    %cst_120 = arith.constant dense<0xFF800000> : vector<16xf32>
    %347 = vector.multi_reduction <maximumf>, %346, %cst_120 [1] : vector<16x16xf32> to vector<16xf32>
    %348 = vector.shape_cast %347 : vector<16xf32> to vector<16x1xf32>
    %349 = vector.broadcast %348 : vector<16x1xf32> to vector<16x16xf32>
    %350 = arith.subf %346, %349 : vector<16x16xf32>
    %351 = math.exp %350 : vector<16x16xf32>
    %cst_121 = arith.constant dense<0.000000e+00> : vector<16xf32>
    %352 = vector.multi_reduction <add>, %351, %cst_121 [1] : vector<16x16xf32> to vector<16xf32>
    %353 = vector.shape_cast %352 : vector<16xf32> to vector<16x1xf32>
    %354 = tpu.reciprocal %353 {approx = true} : vector<16x1xf32> -> vector<16x1xf32>
    %355 = vector.broadcast %354 : vector<16x1xf32> to vector<16x16xf32>
    %356 = arith.mulf %351, %355 : vector<16x16xf32>
    %357 = vector.extract_strided_slice %302 {offsets = [0, 8], sizes = [16, 8], strides = [1, 1]} : vector<16x64xf32> to vector<16x8xf32>
    %cst_122 = arith.constant dense<0.000000e+00> : vector<16x8xf32>
    %358 = tpu.matmul %356, %357, %cst_122 {dimension_numbers = #tpu.dot_dimension_numbers<[1], [0], [0], [1], [0, 0, 1, 1], [], []>} : vector<16x16xf32>, vector<16x8xf32>, vector<16x8xf32> -> vector<16x8xf32>
    %cst_123 = arith.constant 0.000000e+00 : f32
    %359 = vector.broadcast %cst_123 : f32 to vector<16x8xf32>
    %360 = arith.cmpf ogt, %358, %359 : vector<16x8xf32>
    %cst_124 = arith.constant 0.000000e+00 : f32
    %361 = vector.broadcast %cst_124 : f32 to vector<16x8xf32>
    %362 = arith.minimumf %358, %361 : vector<16x8xf32>
    %363 = math.exp %362 : vector<16x8xf32>
    %cst_125 = arith.constant 1.000000e+00 : f32
    %364 = vector.broadcast %cst_125 : f32 to vector<16x8xf32>
    %365 = arith.subf %363, %364 : vector<16x8xf32>
    %366 = arith.select %360, %358, %365 : vector<16x8xi1>, vector<16x8xf32>
    %367 = vector.extract_strided_slice %303 {offsets = [0, 2], sizes = [16, 1], strides = [1, 1]} : vector<16x8xf32> to vector<16x1xf32>
    %368 = vector.extract_strided_slice %304 {offsets = [2, 0], sizes = [1, 16], strides = [1, 1]} : vector<8x16xf32> to vector<1x16xf32>
    %369 = vector.broadcast %367 : vector<16x1xf32> to vector<16x16xf32>
    %370 = vector.broadcast %368 : vector<1x16xf32> to vector<16x16xf32>
    %371 = arith.addf %369, %370 : vector<16x16xf32>
    %cst_126 = arith.constant 0.000000e+00 : f32
    %372 = vector.broadcast %cst_126 : f32 to vector<16x16xf32>
    %373 = arith.cmpf ogt, %371, %372 : vector<16x16xf32>
    %cst_127 = arith.constant 2.000000e-01 : f32
    %374 = vector.broadcast %cst_127 : f32 to vector<16x16xf32>
    %375 = arith.mulf %374, %371 : vector<16x16xf32>
    %376 = arith.select %373, %371, %375 : vector<16x16xi1>, vector<16x16xf32>
    %377 = arith.addf %376, %6 : vector<16x16xf32>
    %cst_128 = arith.constant dense<0xFF800000> : vector<16xf32>
    %378 = vector.multi_reduction <maximumf>, %377, %cst_128 [1] : vector<16x16xf32> to vector<16xf32>
    %379 = vector.shape_cast %378 : vector<16xf32> to vector<16x1xf32>
    %380 = vector.broadcast %379 : vector<16x1xf32> to vector<16x16xf32>
    %381 = arith.subf %377, %380 : vector<16x16xf32>
    %382 = math.exp %381 : vector<16x16xf32>
    %cst_129 = arith.constant dense<0.000000e+00> : vector<16xf32>
    %383 = vector.multi_reduction <add>, %382, %cst_129 [1] : vector<16x16xf32> to vector<16xf32>
    %384 = vector.shape_cast %383 : vector<16xf32> to vector<16x1xf32>
    %385 = tpu.reciprocal %384 {approx = true} : vector<16x1xf32> -> vector<16x1xf32>
    %386 = vector.broadcast %385 : vector<16x1xf32> to vector<16x16xf32>
    %387 = arith.mulf %382, %386 : vector<16x16xf32>
    %388 = vector.extract_strided_slice %302 {offsets = [0, 16], sizes = [16, 8], strides = [1, 1]} : vector<16x64xf32> to vector<16x8xf32>
    %cst_130 = arith.constant dense<0.000000e+00> : vector<16x8xf32>
    %389 = tpu.matmul %387, %388, %cst_130 {dimension_numbers = #tpu.dot_dimension_numbers<[1], [0], [0], [1], [0, 0, 1, 1], [], []>} : vector<16x16xf32>, vector<16x8xf32>, vector<16x8xf32> -> vector<16x8xf32>
    %cst_131 = arith.constant 0.000000e+00 : f32
    %390 = vector.broadcast %cst_131 : f32 to vector<16x8xf32>
    %391 = arith.cmpf ogt, %389, %390 : vector<16x8xf32>
    %cst_132 = arith.constant 0.000000e+00 : f32
    %392 = vector.broadcast %cst_132 : f32 to vector<16x8xf32>
    %393 = arith.minimumf %389, %392 : vector<16x8xf32>
    %394 = math.exp %393 : vector<16x8xf32>
    %cst_133 = arith.constant 1.000000e+00 : f32
    %395 = vector.broadcast %cst_133 : f32 to vector<16x8xf32>
    %396 = arith.subf %394, %395 : vector<16x8xf32>
    %397 = arith.select %391, %389, %396 : vector<16x8xi1>, vector<16x8xf32>
    %398 = vector.extract_strided_slice %303 {offsets = [0, 3], sizes = [16, 1], strides = [1, 1]} : vector<16x8xf32> to vector<16x1xf32>
    %399 = vector.extract_strided_slice %304 {offsets = [3, 0], sizes = [1, 16], strides = [1, 1]} : vector<8x16xf32> to vector<1x16xf32>
    %400 = vector.broadcast %398 : vector<16x1xf32> to vector<16x16xf32>
    %401 = vector.broadcast %399 : vector<1x16xf32> to vector<16x16xf32>
    %402 = arith.addf %400, %401 : vector<16x16xf32>
    %cst_134 = arith.constant 0.000000e+00 : f32
    %403 = vector.broadcast %cst_134 : f32 to vector<16x16xf32>
    %404 = arith.cmpf ogt, %402, %403 : vector<16x16xf32>
    %cst_135 = arith.constant 2.000000e-01 : f32
    %405 = vector.broadcast %cst_135 : f32 to vector<16x16xf32>
    %406 = arith.mulf %405, %402 : vector<16x16xf32>
    %407 = arith.select %404, %402, %406 : vector<16x16xi1>, vector<16x16xf32>
    %408 = arith.addf %407, %6 : vector<16x16xf32>
    %cst_136 = arith.constant dense<0xFF800000> : vector<16xf32>
    %409 = vector.multi_reduction <maximumf>, %408, %cst_136 [1] : vector<16x16xf32> to vector<16xf32>
    %410 = vector.shape_cast %409 : vector<16xf32> to vector<16x1xf32>
    %411 = vector.broadcast %410 : vector<16x1xf32> to vector<16x16xf32>
    %412 = arith.subf %408, %411 : vector<16x16xf32>
    %413 = math.exp %412 : vector<16x16xf32>
    %cst_137 = arith.constant dense<0.000000e+00> : vector<16xf32>
    %414 = vector.multi_reduction <add>, %413, %cst_137 [1] : vector<16x16xf32> to vector<16xf32>
    %415 = vector.shape_cast %414 : vector<16xf32> to vector<16x1xf32>
    %416 = tpu.reciprocal %415 {approx = true} : vector<16x1xf32> -> vector<16x1xf32>
    %417 = vector.broadcast %416 : vector<16x1xf32> to vector<16x16xf32>
    %418 = arith.mulf %413, %417 : vector<16x16xf32>
    %419 = vector.extract_strided_slice %302 {offsets = [0, 24], sizes = [16, 8], strides = [1, 1]} : vector<16x64xf32> to vector<16x8xf32>
    %cst_138 = arith.constant dense<0.000000e+00> : vector<16x8xf32>
    %420 = tpu.matmul %418, %419, %cst_138 {dimension_numbers = #tpu.dot_dimension_numbers<[1], [0], [0], [1], [0, 0, 1, 1], [], []>} : vector<16x16xf32>, vector<16x8xf32>, vector<16x8xf32> -> vector<16x8xf32>
    %cst_139 = arith.constant 0.000000e+00 : f32
    %421 = vector.broadcast %cst_139 : f32 to vector<16x8xf32>
    %422 = arith.cmpf ogt, %420, %421 : vector<16x8xf32>
    %cst_140 = arith.constant 0.000000e+00 : f32
    %423 = vector.broadcast %cst_140 : f32 to vector<16x8xf32>
    %424 = arith.minimumf %420, %423 : vector<16x8xf32>
    %425 = math.exp %424 : vector<16x8xf32>
    %cst_141 = arith.constant 1.000000e+00 : f32
    %426 = vector.broadcast %cst_141 : f32 to vector<16x8xf32>
    %427 = arith.subf %425, %426 : vector<16x8xf32>
    %428 = arith.select %422, %420, %427 : vector<16x8xi1>, vector<16x8xf32>
    %429 = vector.extract_strided_slice %303 {offsets = [0, 4], sizes = [16, 1], strides = [1, 1]} : vector<16x8xf32> to vector<16x1xf32>
    %430 = vector.extract_strided_slice %304 {offsets = [4, 0], sizes = [1, 16], strides = [1, 1]} : vector<8x16xf32> to vector<1x16xf32>
    %431 = vector.broadcast %429 : vector<16x1xf32> to vector<16x16xf32>
    %432 = vector.broadcast %430 : vector<1x16xf32> to vector<16x16xf32>
    %433 = arith.addf %431, %432 : vector<16x16xf32>
    %cst_142 = arith.constant 0.000000e+00 : f32
    %434 = vector.broadcast %cst_142 : f32 to vector<16x16xf32>
    %435 = arith.cmpf ogt, %433, %434 : vector<16x16xf32>
    %cst_143 = arith.constant 2.000000e-01 : f32
    %436 = vector.broadcast %cst_143 : f32 to vector<16x16xf32>
    %437 = arith.mulf %436, %433 : vector<16x16xf32>
    %438 = arith.select %435, %433, %437 : vector<16x16xi1>, vector<16x16xf32>
    %439 = arith.addf %438, %6 : vector<16x16xf32>
    %cst_144 = arith.constant dense<0xFF800000> : vector<16xf32>
    %440 = vector.multi_reduction <maximumf>, %439, %cst_144 [1] : vector<16x16xf32> to vector<16xf32>
    %441 = vector.shape_cast %440 : vector<16xf32> to vector<16x1xf32>
    %442 = vector.broadcast %441 : vector<16x1xf32> to vector<16x16xf32>
    %443 = arith.subf %439, %442 : vector<16x16xf32>
    %444 = math.exp %443 : vector<16x16xf32>
    %cst_145 = arith.constant dense<0.000000e+00> : vector<16xf32>
    %445 = vector.multi_reduction <add>, %444, %cst_145 [1] : vector<16x16xf32> to vector<16xf32>
    %446 = vector.shape_cast %445 : vector<16xf32> to vector<16x1xf32>
    %447 = tpu.reciprocal %446 {approx = true} : vector<16x1xf32> -> vector<16x1xf32>
    %448 = vector.broadcast %447 : vector<16x1xf32> to vector<16x16xf32>
    %449 = arith.mulf %444, %448 : vector<16x16xf32>
    %450 = vector.extract_strided_slice %302 {offsets = [0, 32], sizes = [16, 8], strides = [1, 1]} : vector<16x64xf32> to vector<16x8xf32>
    %cst_146 = arith.constant dense<0.000000e+00> : vector<16x8xf32>
    %451 = tpu.matmul %449, %450, %cst_146 {dimension_numbers = #tpu.dot_dimension_numbers<[1], [0], [0], [1], [0, 0, 1, 1], [], []>} : vector<16x16xf32>, vector<16x8xf32>, vector<16x8xf32> -> vector<16x8xf32>
    %cst_147 = arith.constant 0.000000e+00 : f32
    %452 = vector.broadcast %cst_147 : f32 to vector<16x8xf32>
    %453 = arith.cmpf ogt, %451, %452 : vector<16x8xf32>
    %cst_148 = arith.constant 0.000000e+00 : f32
    %454 = vector.broadcast %cst_148 : f32 to vector<16x8xf32>
    %455 = arith.minimumf %451, %454 : vector<16x8xf32>
    %456 = math.exp %455 : vector<16x8xf32>
    %cst_149 = arith.constant 1.000000e+00 : f32
    %457 = vector.broadcast %cst_149 : f32 to vector<16x8xf32>
    %458 = arith.subf %456, %457 : vector<16x8xf32>
    %459 = arith.select %453, %451, %458 : vector<16x8xi1>, vector<16x8xf32>
    %460 = vector.extract_strided_slice %303 {offsets = [0, 5], sizes = [16, 1], strides = [1, 1]} : vector<16x8xf32> to vector<16x1xf32>
    %461 = vector.extract_strided_slice %304 {offsets = [5, 0], sizes = [1, 16], strides = [1, 1]} : vector<8x16xf32> to vector<1x16xf32>
    %462 = vector.broadcast %460 : vector<16x1xf32> to vector<16x16xf32>
    %463 = vector.broadcast %461 : vector<1x16xf32> to vector<16x16xf32>
    %464 = arith.addf %462, %463 : vector<16x16xf32>
    %cst_150 = arith.constant 0.000000e+00 : f32
    %465 = vector.broadcast %cst_150 : f32 to vector<16x16xf32>
    %466 = arith.cmpf ogt, %464, %465 : vector<16x16xf32>
    %cst_151 = arith.constant 2.000000e-01 : f32
    %467 = vector.broadcast %cst_151 : f32 to vector<16x16xf32>
    %468 = arith.mulf %467, %464 : vector<16x16xf32>
    %469 = arith.select %466, %464, %468 : vector<16x16xi1>, vector<16x16xf32>
    %470 = arith.addf %469, %6 : vector<16x16xf32>
    %cst_152 = arith.constant dense<0xFF800000> : vector<16xf32>
    %471 = vector.multi_reduction <maximumf>, %470, %cst_152 [1] : vector<16x16xf32> to vector<16xf32>
    %472 = vector.shape_cast %471 : vector<16xf32> to vector<16x1xf32>
    %473 = vector.broadcast %472 : vector<16x1xf32> to vector<16x16xf32>
    %474 = arith.subf %470, %473 : vector<16x16xf32>
    %475 = math.exp %474 : vector<16x16xf32>
    %cst_153 = arith.constant dense<0.000000e+00> : vector<16xf32>
    %476 = vector.multi_reduction <add>, %475, %cst_153 [1] : vector<16x16xf32> to vector<16xf32>
    %477 = vector.shape_cast %476 : vector<16xf32> to vector<16x1xf32>
    %478 = tpu.reciprocal %477 {approx = true} : vector<16x1xf32> -> vector<16x1xf32>
    %479 = vector.broadcast %478 : vector<16x1xf32> to vector<16x16xf32>
    %480 = arith.mulf %475, %479 : vector<16x16xf32>
    %481 = vector.extract_strided_slice %302 {offsets = [0, 40], sizes = [16, 8], strides = [1, 1]} : vector<16x64xf32> to vector<16x8xf32>
    %cst_154 = arith.constant dense<0.000000e+00> : vector<16x8xf32>
    %482 = tpu.matmul %480, %481, %cst_154 {dimension_numbers = #tpu.dot_dimension_numbers<[1], [0], [0], [1], [0, 0, 1, 1], [], []>} : vector<16x16xf32>, vector<16x8xf32>, vector<16x8xf32> -> vector<16x8xf32>
    %cst_155 = arith.constant 0.000000e+00 : f32
    %483 = vector.broadcast %cst_155 : f32 to vector<16x8xf32>
    %484 = arith.cmpf ogt, %482, %483 : vector<16x8xf32>
    %cst_156 = arith.constant 0.000000e+00 : f32
    %485 = vector.broadcast %cst_156 : f32 to vector<16x8xf32>
    %486 = arith.minimumf %482, %485 : vector<16x8xf32>
    %487 = math.exp %486 : vector<16x8xf32>
    %cst_157 = arith.constant 1.000000e+00 : f32
    %488 = vector.broadcast %cst_157 : f32 to vector<16x8xf32>
    %489 = arith.subf %487, %488 : vector<16x8xf32>
    %490 = arith.select %484, %482, %489 : vector<16x8xi1>, vector<16x8xf32>
    %491 = vector.extract_strided_slice %303 {offsets = [0, 6], sizes = [16, 1], strides = [1, 1]} : vector<16x8xf32> to vector<16x1xf32>
    %492 = vector.extract_strided_slice %304 {offsets = [6, 0], sizes = [1, 16], strides = [1, 1]} : vector<8x16xf32> to vector<1x16xf32>
    %493 = vector.broadcast %491 : vector<16x1xf32> to vector<16x16xf32>
    %494 = vector.broadcast %492 : vector<1x16xf32> to vector<16x16xf32>
    %495 = arith.addf %493, %494 : vector<16x16xf32>
    %cst_158 = arith.constant 0.000000e+00 : f32
    %496 = vector.broadcast %cst_158 : f32 to vector<16x16xf32>
    %497 = arith.cmpf ogt, %495, %496 : vector<16x16xf32>
    %cst_159 = arith.constant 2.000000e-01 : f32
    %498 = vector.broadcast %cst_159 : f32 to vector<16x16xf32>
    %499 = arith.mulf %498, %495 : vector<16x16xf32>
    %500 = arith.select %497, %495, %499 : vector<16x16xi1>, vector<16x16xf32>
    %501 = arith.addf %500, %6 : vector<16x16xf32>
    %cst_160 = arith.constant dense<0xFF800000> : vector<16xf32>
    %502 = vector.multi_reduction <maximumf>, %501, %cst_160 [1] : vector<16x16xf32> to vector<16xf32>
    %503 = vector.shape_cast %502 : vector<16xf32> to vector<16x1xf32>
    %504 = vector.broadcast %503 : vector<16x1xf32> to vector<16x16xf32>
    %505 = arith.subf %501, %504 : vector<16x16xf32>
    %506 = math.exp %505 : vector<16x16xf32>
    %cst_161 = arith.constant dense<0.000000e+00> : vector<16xf32>
    %507 = vector.multi_reduction <add>, %506, %cst_161 [1] : vector<16x16xf32> to vector<16xf32>
    %508 = vector.shape_cast %507 : vector<16xf32> to vector<16x1xf32>
    %509 = tpu.reciprocal %508 {approx = true} : vector<16x1xf32> -> vector<16x1xf32>
    %510 = vector.broadcast %509 : vector<16x1xf32> to vector<16x16xf32>
    %511 = arith.mulf %506, %510 : vector<16x16xf32>
    %512 = vector.extract_strided_slice %302 {offsets = [0, 48], sizes = [16, 8], strides = [1, 1]} : vector<16x64xf32> to vector<16x8xf32>
    %cst_162 = arith.constant dense<0.000000e+00> : vector<16x8xf32>
    %513 = tpu.matmul %511, %512, %cst_162 {dimension_numbers = #tpu.dot_dimension_numbers<[1], [0], [0], [1], [0, 0, 1, 1], [], []>} : vector<16x16xf32>, vector<16x8xf32>, vector<16x8xf32> -> vector<16x8xf32>
    %cst_163 = arith.constant 0.000000e+00 : f32
    %514 = vector.broadcast %cst_163 : f32 to vector<16x8xf32>
    %515 = arith.cmpf ogt, %513, %514 : vector<16x8xf32>
    %cst_164 = arith.constant 0.000000e+00 : f32
    %516 = vector.broadcast %cst_164 : f32 to vector<16x8xf32>
    %517 = arith.minimumf %513, %516 : vector<16x8xf32>
    %518 = math.exp %517 : vector<16x8xf32>
    %cst_165 = arith.constant 1.000000e+00 : f32
    %519 = vector.broadcast %cst_165 : f32 to vector<16x8xf32>
    %520 = arith.subf %518, %519 : vector<16x8xf32>
    %521 = arith.select %515, %513, %520 : vector<16x8xi1>, vector<16x8xf32>
    %522 = vector.extract_strided_slice %303 {offsets = [0, 7], sizes = [16, 1], strides = [1, 1]} : vector<16x8xf32> to vector<16x1xf32>
    %523 = vector.extract_strided_slice %304 {offsets = [7, 0], sizes = [1, 16], strides = [1, 1]} : vector<8x16xf32> to vector<1x16xf32>
    %524 = vector.broadcast %522 : vector<16x1xf32> to vector<16x16xf32>
    %525 = vector.broadcast %523 : vector<1x16xf32> to vector<16x16xf32>
    %526 = arith.addf %524, %525 : vector<16x16xf32>
    %cst_166 = arith.constant 0.000000e+00 : f32
    %527 = vector.broadcast %cst_166 : f32 to vector<16x16xf32>
    %528 = arith.cmpf ogt, %526, %527 : vector<16x16xf32>
    %cst_167 = arith.constant 2.000000e-01 : f32
    %529 = vector.broadcast %cst_167 : f32 to vector<16x16xf32>
    %530 = arith.mulf %529, %526 : vector<16x16xf32>
    %531 = arith.select %528, %526, %530 : vector<16x16xi1>, vector<16x16xf32>
    %532 = arith.addf %531, %6 : vector<16x16xf32>
    %cst_168 = arith.constant dense<0xFF800000> : vector<16xf32>
    %533 = vector.multi_reduction <maximumf>, %532, %cst_168 [1] : vector<16x16xf32> to vector<16xf32>
    %534 = vector.shape_cast %533 : vector<16xf32> to vector<16x1xf32>
    %535 = vector.broadcast %534 : vector<16x1xf32> to vector<16x16xf32>
    %536 = arith.subf %532, %535 : vector<16x16xf32>
    %537 = math.exp %536 : vector<16x16xf32>
    %cst_169 = arith.constant dense<0.000000e+00> : vector<16xf32>
    %538 = vector.multi_reduction <add>, %537, %cst_169 [1] : vector<16x16xf32> to vector<16xf32>
    %539 = vector.shape_cast %538 : vector<16xf32> to vector<16x1xf32>
    %540 = tpu.reciprocal %539 {approx = true} : vector<16x1xf32> -> vector<16x1xf32>
    %541 = vector.broadcast %540 : vector<16x1xf32> to vector<16x16xf32>
    %542 = arith.mulf %537, %541 : vector<16x16xf32>
    %543 = vector.extract_strided_slice %302 {offsets = [0, 56], sizes = [16, 8], strides = [1, 1]} : vector<16x64xf32> to vector<16x8xf32>
    %cst_170 = arith.constant dense<0.000000e+00> : vector<16x8xf32>
    %544 = tpu.matmul %542, %543, %cst_170 {dimension_numbers = #tpu.dot_dimension_numbers<[1], [0], [0], [1], [0, 0, 1, 1], [], []>} : vector<16x16xf32>, vector<16x8xf32>, vector<16x8xf32> -> vector<16x8xf32>
    %cst_171 = arith.constant 0.000000e+00 : f32
    %545 = vector.broadcast %cst_171 : f32 to vector<16x8xf32>
    %546 = arith.cmpf ogt, %544, %545 : vector<16x8xf32>
    %cst_172 = arith.constant 0.000000e+00 : f32
    %547 = vector.broadcast %cst_172 : f32 to vector<16x8xf32>
    %548 = arith.minimumf %544, %547 : vector<16x8xf32>
    %549 = math.exp %548 : vector<16x8xf32>
    %cst_173 = arith.constant 1.000000e+00 : f32
    %550 = vector.broadcast %cst_173 : f32 to vector<16x8xf32>
    %551 = arith.subf %549, %550 : vector<16x8xf32>
    %552 = arith.select %546, %544, %551 : vector<16x8xi1>, vector<16x8xf32>
    %553 = tpu.concatenate %335, %366, %397, %428, %459, %490, %521, %552 in 1 : vector<16x8xf32>, vector<16x8xf32>, vector<16x8xf32>, vector<16x8xf32>, vector<16x8xf32>, vector<16x8xf32>, vector<16x8xf32>, vector<16x8xf32> -> vector<16x64xf32>
    %cst_174 = arith.constant dense<0.000000e+00> : vector<16x32xf32>
    %554 = tpu.matmul %553, %299, %cst_174 {dimension_numbers = #tpu.dot_dimension_numbers<[1], [0], [0], [1], [0, 0, 1, 1], [], []>} : vector<16x64xf32>, vector<64x32xf32>, vector<16x32xf32> -> vector<16x32xf32>
    %cst_175 = arith.constant dense<0.000000e+00> : vector<16x1xf32>
    %555 = tpu.matmul %553, %300, %cst_175 {dimension_numbers = #tpu.dot_dimension_numbers<[1], [0], [0], [1], [0, 0, 1, 1], [], []>} : vector<16x64xf32>, vector<64x1xf32>, vector<16x1xf32> -> vector<16x1xf32>
    %cst_176 = arith.constant dense<0.000000e+00> : vector<1x16xf32>
    %556 = tpu.matmul %301, %553, %cst_176 {dimension_numbers = #tpu.dot_dimension_numbers<[1], [1], [0], [0], [0, 0, 1, 0], [], []>} : vector<1x64xf32>, vector<16x64xf32>, vector<1x16xf32> -> vector<1x16xf32>
    %557 = vector.broadcast %555 : vector<16x1xf32> to vector<16x16xf32>
    %558 = vector.broadcast %556 : vector<1x16xf32> to vector<16x16xf32>
    %559 = arith.addf %557, %558 : vector<16x16xf32>
    %cst_177 = arith.constant 0.000000e+00 : f32
    %560 = vector.broadcast %cst_177 : f32 to vector<16x16xf32>
    %561 = arith.cmpf ogt, %559, %560 : vector<16x16xf32>
    %cst_178 = arith.constant 2.000000e-01 : f32
    %562 = vector.broadcast %cst_178 : f32 to vector<16x16xf32>
    %563 = arith.mulf %562, %559 : vector<16x16xf32>
    %564 = arith.select %561, %559, %563 : vector<16x16xi1>, vector<16x16xf32>
    %565 = arith.addf %564, %6 : vector<16x16xf32>
    %cst_179 = arith.constant dense<0xFF800000> : vector<16xf32>
    %566 = vector.multi_reduction <maximumf>, %565, %cst_179 [1] : vector<16x16xf32> to vector<16xf32>
    %567 = vector.shape_cast %566 : vector<16xf32> to vector<16x1xf32>
    %568 = vector.broadcast %567 : vector<16x1xf32> to vector<16x16xf32>
    %569 = arith.subf %565, %568 : vector<16x16xf32>
    %570 = math.exp %569 : vector<16x16xf32>
    %cst_180 = arith.constant dense<0.000000e+00> : vector<16xf32>
    %571 = vector.multi_reduction <add>, %570, %cst_180 [1] : vector<16x16xf32> to vector<16xf32>
    %572 = vector.shape_cast %571 : vector<16xf32> to vector<16x1xf32>
    %573 = tpu.reciprocal %572 {approx = true} : vector<16x1xf32> -> vector<16x1xf32>
    %574 = vector.broadcast %573 : vector<16x1xf32> to vector<16x16xf32>
    %575 = arith.mulf %570, %574 : vector<16x16xf32>
    %cst_181 = arith.constant dense<0.000000e+00> : vector<16x32xf32>
    %576 = tpu.matmul %575, %554, %cst_181 {dimension_numbers = #tpu.dot_dimension_numbers<[1], [0], [0], [1], [0, 0, 1, 1], [], []>} : vector<16x16xf32>, vector<16x32xf32>, vector<16x32xf32> -> vector<16x32xf32>
    %cst_182 = arith.constant 0.000000e+00 : f32
    %577 = vector.broadcast %cst_182 : f32 to vector<16x32xf32>
    %578 = arith.cmpf ogt, %576, %577 : vector<16x32xf32>
    %cst_183 = arith.constant 0.000000e+00 : f32
    %579 = vector.broadcast %cst_183 : f32 to vector<16x32xf32>
    %580 = arith.minimumf %576, %579 : vector<16x32xf32>
    %581 = math.exp %580 : vector<16x32xf32>
    %cst_184 = arith.constant 1.000000e+00 : f32
    %582 = vector.broadcast %cst_184 : f32 to vector<16x32xf32>
    %583 = arith.subf %581, %582 : vector<16x32xf32>
    %584 = arith.select %578, %576, %583 : vector<16x32xi1>, vector<16x32xf32>
    %c0_185 = arith.constant 0 : index
    %c0_186 = arith.constant 0 : index
    %585 = vector.load %arg14[%c0_185, %c0_186] : memref<32x32xf32, #tpu.memory_space<vmem>>, vector<32x32xf32>
    %cst_187 = arith.constant dense<0.000000e+00> : vector<16x32xf32>
    %586 = tpu.matmul %584, %585, %cst_187 {dimension_numbers = #tpu.dot_dimension_numbers<[1], [0], [0], [1], [0, 0, 1, 1], [], []>} : vector<16x32xf32>, vector<32x32xf32>, vector<16x32xf32> -> vector<16x32xf32>
    %c0_188 = arith.constant 0 : index
    %c0_189 = arith.constant 0 : index
    %587 = vector.load %arg15[%c0_188, %c0_189] : memref<1x32xf32, #tpu.memory_space<vmem>>, vector<1x32xf32>
    %588 = vector.broadcast %587 : vector<1x32xf32> to vector<16x32xf32>
    %589 = arith.addf %586, %588 : vector<16x32xf32>
    %cst_190 = arith.constant 0.000000e+00 : f32
    %590 = vector.broadcast %cst_190 : f32 to vector<16x32xf32>
    %591 = arith.maximumf %589, %590 : vector<16x32xf32>
    %c0_191 = arith.constant 0 : index
    %c0_192 = arith.constant 0 : index
    %592 = vector.load %arg16[%c0_191, %c0_192] : memref<32x64xf32, #tpu.memory_space<vmem>>, vector<32x64xf32>
    %cst_193 = arith.constant dense<0.000000e+00> : vector<16x64xf32>
    %593 = tpu.matmul %591, %592, %cst_193 {dimension_numbers = #tpu.dot_dimension_numbers<[1], [0], [0], [1], [0, 0, 1, 1], [], []>} : vector<16x32xf32>, vector<32x64xf32>, vector<16x64xf32> -> vector<16x64xf32>
    %c0_194 = arith.constant 0 : index
    %c0_195 = arith.constant 0 : index
    %594 = vector.load %arg17[%c0_194, %c0_195] : memref<1x64xf32, #tpu.memory_space<vmem>>, vector<1x64xf32>
    %595 = vector.broadcast %594 : vector<1x64xf32> to vector<16x64xf32>
    %596 = arith.addf %593, %595 : vector<16x64xf32>
    %cst_196 = arith.constant 0.000000e+00 : f32
    %597 = vector.broadcast %cst_196 : f32 to vector<16x64xf32>
    %598 = arith.maximumf %596, %597 : vector<16x64xf32>
    %c0_197 = arith.constant 0 : index
    %c0_198 = arith.constant 0 : index
    %599 = vector.load %arg18[%c0_197, %c0_198] : memref<64x64xf32, #tpu.memory_space<vmem>>, vector<64x64xf32>
    %cst_199 = arith.constant dense<0.000000e+00> : vector<16x64xf32>
    %600 = tpu.matmul %598, %599, %cst_199 {dimension_numbers = #tpu.dot_dimension_numbers<[1], [0], [0], [1], [0, 0, 1, 1], [], []>} : vector<16x64xf32>, vector<64x64xf32>, vector<16x64xf32> -> vector<16x64xf32>
    %c0_200 = arith.constant 0 : index
    %c0_201 = arith.constant 0 : index
    %601 = vector.load %arg19[%c0_200, %c0_201] : memref<1x64xf32, #tpu.memory_space<vmem>>, vector<1x64xf32>
    %602 = vector.broadcast %601 : vector<1x64xf32> to vector<16x64xf32>
    %603 = arith.addf %600, %602 : vector<16x64xf32>
    %cst_202 = arith.constant 0.000000e+00 : f32
    %604 = vector.broadcast %cst_202 : f32 to vector<16x64xf32>
    %605 = arith.maximumf %603, %604 : vector<16x64xf32>
    %606 = vector.extract_strided_slice %605 {offsets = [0, 0], sizes = [16, 32], strides = [1, 1]} : vector<16x64xf32> to vector<16x32xf32>
    %607 = vector.extract_strided_slice %605 {offsets = [0, 32], sizes = [16, 32], strides = [1, 1]} : vector<16x64xf32> to vector<16x32xf32>
    %608 = arith.mulf %606, %607 : vector<16x32xf32>
    %c0_203 = arith.constant 0 : index
    %c0_204 = arith.constant 0 : index
    %609 = vector.load %arg20[%c0_203, %c0_204] : memref<16x32xf32, #tpu.memory_space<vmem>>, vector<16x32xf32>
    tpu.vector_store %arg20[%c0_203, %c0_204], %608 {strides = array<i32>} : memref<16x32xf32, #tpu.memory_space<vmem>>, vector<16x32xf32>,
    return
  }
}

</mosaic_0001>

<bundles_post_ra>
// kernel: gcn_forward_fn.1
= control target key start
LH: loop header
LB: loop body
LE: loop exit
PB: predicated region body
PF: predicated region fallthrough
CT: control target
= control target key end

     0   :  { %s6495_s0 = inlined_call_operand.vmem [shape: f32[16,32], index: 0, kind: input, shape index: {}]   ;;  %s6496_s1 = inlined_call_operand.vmem [shape: f32[16,16], index: 1, kind: input, shape index: {}]   ;;  %s6497_s2 = inlined_call_operand.vmem [shape: f32[32,64], index: 2, kind: input, shape index: {}]   ;;  %s6498_s3 = inlined_call_operand.vmem [shape: f32[32,8], index: 3, kind: input, shape index: {}]   ;;  %s6499_s4 = inlined_call_operand.vmem [shape: f32[8,32], index: 4, kind: input, shape index: {}]   ;;  %s6500_s5 = inlined_call_operand.vmem [shape: f32[64,32], index: 5, kind: input, shape index: {}]   ;;  %s6501_s6 = inlined_call_operand.vmem [shape: f32[64,1], index: 6, kind: input, shape index: {}]   ;;  %s6502_s7 = inlined_call_operand.vmem [shape: f32[1,64], index: 7, kind: input, shape index: {}]   ;;  %s6503_s8 = inlined_call_operand.vmem [shape: f32[32,64], index: 8, kind: input, shape index: {}]   ;;  %s6504_s9 = inlined_call_operand.vmem [shape: f32[32,8], index: 9, kind: input, shape index: {}]   ;;  %s6505_s10 = inlined_call_operand.vmem [shape: f32[8,32], index: 10, kind: input, shape index: {}]   ;;  %s6506_s11 = inlined_call_operand.vmem [shape: f32[64,32], index: 11, kind: input, shape index: {}]   ;;  %s6507_s12 = inlined_call_operand.vmem [shape: f32[64,1], index: 12, kind: input, shape index: {}]   ;;  %s6508_s13 = inlined_call_operand.vmem [shape: f32[1,64], index: 13, kind: input, shape index: {}]   ;;  %s6509_s14 = inlined_call_operand.vmem [shape: f32[32,32], index: 14, kind: input, shape index: {}]   ;;  %s6510_s15 = inlined_call_operand.vmem [shape: f32[1,32], index: 15, kind: input, shape index: {}]   ;;  %s6511_s16 = inlined_call_operand.vmem [shape: f32[32,64], index: 16, kind: input, shape index: {}]   ;;  %s6512_s17 = inlined_call_operand.vmem [shape: f32[1,64], index: 17, kind: input, shape index: {}]   ;;  %s6513_s18 = inlined_call_operand.vmem [shape: f32[64,64], index: 18, kind: input, shape index: {}]   ;;  %s6514_s19 = inlined_call_operand.vmem [shape: f32[1,64], index: 19, kind: input, shape index: {}]   ;;  %s6515_s20 = inlined_call_operand.hbm [shape: f32[16,32], index: 20, kind: output, shape index: {}]  }
   0x1   :  { %6532 = sst [smem:[#allocation5_spill]] %s6495_s0 }
   0x2   :  { %6533 = sst [smem:[#allocation6_spill]] %s6496_s1 }
   0x3   :  { %6534 = sst [smem:[#allocation7_spill]] %s6497_s2 }
   0x4   :  { %6535 = sst [smem:[#allocation8_spill]] %s6498_s3 }
   0x5   :  { %6536 = sst [smem:[#allocation9_spill]] %s6499_s4 }
   0x6   :  { %s6537_s23 = sld [smem:[#allocation7_spill]]  ;;  %vm100_vm0 = vcmask 261120   ;;  %s6538_s29 = sld [smem:[#allocation5_spill]]  ;;  %v5249_v7 = vmov 0.0|0.0   ;;  %vm5250_vm1 = vmmov 0   ;;  %v5251_v12 = vmov 0.0  }
   0x7   :  { %4676 = vmatprep.subr.bf16.mxu0 %v5249_v7  ;;  %s6539_s22 = sld [smem:[#allocation8_spill]]  ;;  %4371 = vmatprep.mubr.msk.f32.mxu0 %vm5250_vm1, %v5251_v12  ;;  %vm5412_vm2 = vmpackc.low %vm100_vm0, %vm100_vm0 }
   0xc   :  { %v74_v0 = vld [vmem:[%s6537_s23] sm:$0xff]  ;;  %v75_v1 = vld [vmem:[%s6537_s23 + $0x8] sm:$0xff]  ;;  %v76_v2 = vld [vmem:[%s6537_s23 + $0x10] sm:$0xff] }
   0xd   :  { %v4660_v3 = vpack.c.bf16 %v75_v1, %v74_v0  ;;  %v77_v4 = vld [vmem:[%s6537_s23 + $0x18] sm:$0xff]  ;;  %v66_v5 = vld [vmem:[%s6538_s29] sm:$0xff]  ;;  %v67_v6 = vld [vmem:[%s6538_s29 + $0x8] sm:$0xff] }
   0xe   :  { %v4664_v8 = vpack.c.bf16 %v77_v4, %v76_v2  ;;  %4353 = vmatprep.mubr.msk.f32.mxu1 %vm100_vm0, %v66_v5  ;;  %v78_v9 = vld [vmem:[%s6539_s22] sm:$0xff]  ;;  %v79_v10 = vld [vmem:[%s6539_s22 + $0x8] sm:$0xff]  ;;  %v4677_v11 = vpack.c.bf16 %v67_v6, %v66_v5 }
   0xf   :  { %4661 = vmatprep.subr.bf16.mxu1 %v4660_v3 }
  0x10   :  { %4663 = vmatpush3.bf16.msra.mxu1 %v4660_v3  ;;  %4679 = vmatpush3.bf16.xpose.msk.msra.mxu0 %vm5412_vm2, %v4677_v11 }
  0x11   :  { %25 = vsyncpa [#allocation3], 0  ;;  %4665 = vmatprep.subr.bf16.mxu1 %v4664_v8  ;;  %v4668_v14 = vpack.c.bf16 %v79_v10, %v78_v9  ;;  %v80_v15 = vld [vmem:[%s6539_s22 + $0x10] sm:$0xff]  ;;  %v81_v16 = vld [vmem:[%s6539_s22 + $0x18] sm:$0xff]  ;;  %s6542_s4 = sld [smem:[#allocation9_spill]]  ;;  %v5252_v19 = vmov 1   ;;  %v340_v35 = vlaneseq }
  0x12   :  { %v4672_v18 = vpack.c.bf16 %v81_v16, %v80_v15  ;;  %4905 = vset.pattern.permute.xlu1 %v5252_v19  ;;  %v5253_v20 = vmov 0   ;;  %v5254_v29 = vmov 2   ;;  %v5255_v30 = vmov 3   ;;  %s6543_s0 = sld [smem:[#allocation6_spill]]  ;;  %s5261_s22 = smov 120  }
  0x13   :  { %4904 = vset.pattern.permute.xlu0 %v5253_v20  ;;  %v5256_v31 = vmov 4   ;;  %v5257_v32 = vmov 6   ;;  %v5258_v33 = vmov 5   ;;  %v5259_v34 = vmov 7   ;;  %s5262_s24 = smov 104   ;;  %s5263_s23 = smov 112  }
  0x14   :  { %4667 = vmatpush3.bf16.msra.mxu1 %v4664_v8  ;;  %v5453_v36 = vshrl.u32 %v340_v35, 7  ;;  %v5260_v48 = vmov -9e+15   ;;  %vm354_vm6 = vcmask 130048   ;;  %s5264_s2 = smov 88   ;;  %s5265_s25 = smov 96  }
  0x15   :  { %4669 = vmatprep.subr.bf16.mxu1 %v4668_v14  ;;  %s5266_s3 = smov 72   ;;  %s5267_s26 = smov 80  }
  0x16   :  { %v480_v37 = vsub.s32 1, %v5453_v36  ;;  %v5457_v38 = vsub.s32 0, %v5453_v36  ;;  %v625_v44 = vsub.s32 2, %v5453_v36  ;;  %v768_v45 = vsub.s32 3, %v5453_v36  ;;  %s6522_s30 = smov 16   ;;  %s6520_s21 = smov 8  }
  0x17   :  { %v82_v17 = vld [vmem:[%s6542_s4] sm:$0xff]  ;;  %4354 = vmatmul.mubr.msk.f32.vlgmr.msra.gmra.mrb[0].mxu1 %vm100_vm0, %v67_v6  ;;  %v911_v58 = vsub.s32 4, %v5453_v36  ;;  %v1054_v8 = vsub.s32 5, %v5453_v36  ;;  %s6530_s28 = smov 24   ;;  %s6526_s4 = smov 40  }
  0x18   :  { %4372 = vmatmul.mubr.msk.f32.vlgmr.msra.gmra.mrb[0].mxu0 %vm100_vm0, %v82_v17  ;;  %4671 = vmatpush3.bf16.msra.mxu1 %v4668_v14  ;;  %v69_v39 = vld [vmem:[%s6543_s0 + $0x8] sm:$0xff]  ;;  %s6524_s29 = smov 56   ;;  %s6550_s27 = smov 40  }
  0x19   :  { %4364 = vmatprep.mubr.msk.f32.mxu1 %vm100_vm0, %v66_v5  ;;  %4673 = vmatprep.subr.bf16.mxu1 %v4672_v18  ;;  %vm71_vm3 = vcmp.gt.f32.partialorder %v69_v39, 0.0 }
  0x1a   :  { %v5473_v49 = vsel %vm71_vm3, 0.0, %v5260_v48 }
  0x1c   :  { %4675 = vmatpush3.bf16.msra.mxu1 %v4672_v18 }
  0x1f   :  { %4365 = vmatmul.mubr.msk.f32.vlgmr.msra.gmra.mrb[2].mxu1 %vm100_vm0, %v67_v6 }
  0xea   :  { %v4355_v21 = vpop.f32.mrb[0].mxu1 }
  0xeb   :  { %v5433_v22 = vpop.f32.mrb[0].mxu0  ;;  %v173_v23 = vpop.f32.mrb[1].mxu1 }
  0xec   :  { %v4373_v24 = vpop.f32.mrb[1].mxu0  ;;  %v4680_v25 = vpack.c.bf16 %v4355_v21, %v173_v23  ;;  %v5435_v26 = vpack.i.bf16 %v4355_v21, %v173_v23  ;;  %v5465_v40 = vrot.slane %v5433_v22, %v480_v37  ;;  %v343_v41 = vrot.slane %v5433_v22, %v5457_v38 }
  0xed   :  { %v5478_v52 = vrot.slane %v5433_v22, %v625_v44  ;;  %v5483_v53 = vrot.slane %v5433_v22, %v768_v45  ;;  %v5501_v3 = vrot.slane %v5433_v22, %v911_v58  ;;  %v5516_v17 = vrot.slane %v5433_v22, %v1054_v8 }
  0xee   :  { %4681 = vmatprep.subr.bf16.mxu1 %v4680_v25  ;;  %v1197_v24 = vsub.s32 6, %v5453_v36 }
  0xef   :  { %4683 = vmatpush3.bf16.msra.mxu1 %v4680_v25 }
  0xf2   :  { %v4366_v27 = vpop.f32.mrb[2].mxu1 }
  0xf3   :  { %475 = vperm.xlu1 %4905, %v4366_v27   ;;  %337 = vperm.xlu0 %4904, %v4366_v27   ;;  %v248_v28 = vpop.f32.mrb[3].mxu1 }
  0xf7   :  { %4906 = vset.pattern.permute.xlu1 %v5254_v29  ;;  %4907 = vset.pattern.permute.xlu0 %v5255_v30 }
  0xf8   :  { %620 = vperm.xlu1 %4906, %v4366_v27   ;;  %763 = vperm.xlu0 %4907, %v4366_v27  }
  0xfc   :  { %4908 = vset.pattern.permute.xlu1 %v5256_v31  ;;  %4910 = vset.pattern.permute.xlu0 %v5257_v32 }
  0xfd   :  { %906 = vperm.xlu1 %4908, %v4366_v27   ;;  %1192 = vperm.xlu0 %4910, %v4366_v27  }
 0x101   :  { %4909 = vset.pattern.permute.xlu1 %v5258_v33  ;;  %4912 = vset.pattern.permute.xlu0 %v5253_v20 }
 0x102   :  { %1049 = vperm.xlu1 %4909, %v4366_v27   ;;  %332 = vperm.xlu0 %4912, %v248_v28  }
 0x106   :  { %4911 = vset.pattern.permute.xlu1 %v5259_v34  ;;  %4914 = vset.pattern.permute.xlu0 %v5254_v29 }
 0x107   :  { %1335 = vperm.xlu1 %4911, %v4366_v27   ;;  %616 = vperm.xlu0 %4914, %v248_v28  }
 0x10b   :  { %4913 = vset.pattern.permute.xlu1 %v5252_v19  ;;  %4917 = vset.pattern.permute.xlu0 %v5258_v33 }
 0x10c   :  { %471 = vperm.xlu1 %4913, %v248_v28   ;;  %1045 = vperm.xlu0 %4917, %v248_v28  }
 0x110   :  { %4915 = vset.pattern.permute.xlu1 %v5255_v30  ;;  %4956 = vset.pattern.permute.xlu0 %v5253_v20 }
 0x111   :  { %759 = vperm.xlu1 %4915, %v248_v28  }
 0x115   :  { %4916 = vset.pattern.permute.xlu1 %v5256_v31 }
 0x116   :  { %902 = vperm.xlu1 %4916, %v248_v28  }
 0x11a   :  { %4918 = vset.pattern.permute.xlu1 %v5257_v32 }
 0x11b   :  { %1188 = vperm.xlu1 %4918, %v248_v28  }
 0x11f   :  { %4919 = vset.pattern.permute.xlu1 %v5259_v34 }
 0x120   :  { %1331 = vperm.xlu1 %4919, %v248_v28   ;;  %v68_v28 = vld [vmem:[%s6543_s0] sm:$0xff] }
 0x121   :  { %vm70_vm11 = vcmp.gt.f32.partialorder %v68_v28, 0.0 }
 0x124   :  { %4955 = vset.pattern.permute.xlu1 %v5253_v20 }
 0x172   :  { %v476_v42 = vpop.permute.xlu1 %475  ;;  %v338_v43 = vpop.permute.xlu0 %337 }
 0x173   :  { %v483_v46 = vadd.f32 %v5465_v40, %v476_v42  ;;  %v345_v47 = vadd.f32 %v343_v41, %v338_v43 }
 0x175   :  { %v487_v50 = vmul.f32 0.2, %v483_v46  ;;  %v349_v51 = vmul.f32 0.2, %v345_v47  ;;  %vm347_vm4 = vcmp.gt.f32.partialorder %v345_v47, 0.0  ;;  %vm485_vm5 = vcmp.gt.f32.partialorder %v483_v46, 0.0 }
 0x177   :  { %v621_v54 = vpop.permute.xlu1 %620  ;;  %v764_v55 = vpop.permute.xlu0 %763  ;;  %v351_v56 = vsel %vm347_vm4, %v345_v47, %v349_v51  ;;  %v489_v57 = vsel %vm485_vm5, %v483_v46, %v487_v50  ;;  %v1340_v46 = vsub.s32 7, %v5453_v36 }
 0x178   :  { %v628_v59 = vadd.f32 %v5478_v52, %v621_v54  ;;  %v771_v60 = vadd.f32 %v5483_v53, %v764_v55  ;;  %v5489_v61 = vadd.f32 %v351_v56, %v5473_v49  ;;  %v5492_v62 = vadd.f32 %v489_v57, %v5473_v49 }
 0x179   :  { %v5541_v56 = vsel %vm70_vm11, 0.0, %v5260_v48 }
 0x17a   :  { %v632_v63 = vmul.f32 0.2, %v628_v59  ;;  %v775_v0 = vmul.f32 0.2, %v771_v60  ;;  %v358_v1 = vsel %vm354_vm6, %v5489_v61, -inf  ;;  %v495_v2 = vsel %vm354_vm6, %v5492_v62, -inf }
 0x17b   :  { %359 = vmax.xlane.f32.xlu1 %v358_v1  ;;  %496 = vmax.xlane.f32.xlu0 %v495_v2  ;;  %vm630_vm7 = vcmp.gt.f32.partialorder %v628_v59, 0.0  ;;  %vm773_vm8 = vcmp.gt.f32.partialorder %v771_v60, 0.0 }
 0x17c   :  { %v907_v4 = vpop.permute.xlu1 %906  ;;  %v1193_v5 = vpop.permute.xlu0 %1192  ;;  %v634_v6 = vsel %vm630_vm7, %v628_v59, %v632_v63  ;;  %v777_v9 = vsel %vm773_vm8, %v771_v60, %v775_v0  ;;  %v5546_v59 = vrot.slane %v5433_v22, %v1340_v46 }
 0x17d   :  { %v914_v10 = vadd.f32 %v5501_v3, %v907_v4  ;;  %v5506_v11 = vadd.f32 %v634_v6, %v5473_v49  ;;  %v5511_v16 = vadd.f32 %v777_v9, %v5473_v49 }
 0x17f   :  { %v918_v14 = vmul.f32 0.2, %v914_v10  ;;  %v640_v15 = vsel %vm354_vm6, %v5506_v11, -inf  ;;  %vm916_vm9 = vcmp.gt.f32.partialorder %v914_v10, 0.0  ;;  %v783_v35 = vsel %vm354_vm6, %v5511_v16, -inf }
 0x180   :  { %641 = vmax.xlane.f32.xlu0 %v640_v15 }
 0x181   :  { %v1050_v18 = vpop.permute.xlu1 %1049  ;;  %v333_v21 = vpop.permute.xlu0 %332  ;;  %v920_v23 = vsel %vm916_vm9, %v914_v10, %v918_v14 }
 0x182   :  { %v1057_v25 = vadd.f32 %v5516_v17, %v1050_v18  ;;  %v344_v27 = vadd.f32 %v343_v41, %v333_v21  ;;  %v5526_v39 = vadd.f32 %v920_v23, %v5473_v49  ;;  %v5531_v41 = vrot.slane %v5433_v22, %v1197_v24 }
 0x184   :  { %v1061_v42 = vmul.f32 0.2, %v1057_v25  ;;  %v348_v43 = vmul.f32 0.2, %v344_v27  ;;  %784 = vmax.xlane.f32.xlu0 %v783_v35  ;;  %vm1059_vm10 = vcmp.gt.f32.partialorder %v1057_v25, 0.0  ;;  %vm346_vm12 = vcmp.gt.f32.partialorder %v344_v27, 0.0 }
 0x185   :  { %v926_v51 = vsel %vm354_vm6, %v5526_v39, -inf  ;;  %v1200_v55 = vadd.f32 %v5531_v41, %v1193_v5 }
 0x186   :  { %v1336_v47 = vpop.permute.xlu1 %1335  ;;  %v1063_v50 = vsel %vm1059_vm10, %v1057_v25, %v1061_v42  ;;  %v350_v57 = vsel %vm346_vm12, %v344_v27, %v348_v43  ;;  %v617_v25 = vpop.permute.xlu0 %616 }
 0x187   :  { %v5537_v54 = vadd.f32 %v1063_v50, %v5473_v49  ;;  %v5551_v0 = vadd.f32 %v350_v57, %v5541_v56  ;;  %v1204_v1 = vmul.f32 0.2, %v1200_v55  ;;  %v1343_v2 = vadd.f32 %v5546_v59, %v1336_v47 }
 0x188   :  { %927 = vmax.xlane.f32.xlu0 %v926_v51  ;;  %vm1202_vm13 = vcmp.gt.f32.partialorder %v1200_v55, 0.0  ;;  %v627_v28 = vadd.f32 %v5478_v52, %v617_v25 }
 0x189   :  { %v1069_v63 = vsel %vm354_vm6, %v5537_v54, -inf  ;;  %v355_v48 = vsel %vm354_vm6, %v5551_v0, -inf  ;;  %v1347_v5 = vmul.f32 0.2, %v1343_v2  ;;  %v1206_v9 = vsel %vm1202_vm13, %v1200_v55, %v1204_v1 }
 0x18a   :  { %vm1345_vm15 = vcmp.gt.f32.partialorder %v1343_v2, 0.0  ;;  %v5567_v14 = vadd.f32 %v1206_v9, %v5473_v49  ;;  %v631_v35 = vmul.f32 0.2, %v627_v28  ;;  %vm629_vm3 = vcmp.gt.f32.partialorder %v627_v28, 0.0 }
 0x18b   :  { %v472_v60 = vpop.permute.xlu1 %471  ;;  %v1349_v15 = vsel %vm1345_vm15, %v1343_v2, %v1347_v5  ;;  %v1046_v55 = vpop.permute.xlu0 %1045 }
 0x18c   :  { %v482_v4 = vadd.f32 %v5465_v40, %v472_v60  ;;  %4921 = vrot.lane.b32.xlu1 %v5435_v26, %s5261_s22  ;;  %1070 = vmax.xlane.f32.xlu0 %v1069_v63  ;;  %v1212_v18 = vsel %vm354_vm6, %v5567_v14, -inf  ;;  %v5572_v21 = vadd.f32 %v1349_v15, %v5473_v49  ;;  %v633_v51 = vsel %vm629_vm3, %v627_v28, %v631_v35 }
 0x18d   :  { %v5580_v60 = vadd.f32 %v633_v51, %v5541_v56  ;;  %v1056_v63 = vadd.f32 %v5516_v17, %v1046_v55 }
 0x18e   :  { %v486_v22 = vmul.f32 0.2, %v482_v4  ;;  %vm484_vm14 = vcmp.gt.f32.partialorder %v482_v4, 0.0  ;;  %v1355_v23 = vsel %vm354_vm6, %v5572_v21, -inf }
 0x18f   :  { %v637_v52 = vsel %vm354_vm6, %v5580_v60, -inf  ;;  %vm1058_vm7 = vcmp.gt.f32.partialorder %v1056_v63, 0.0 }
 0x190   :  { %4931 = vrot.lane.b32.xlu1 %v5435_v26, %s5262_s24  ;;  %356 = vmax.xlane.f32.xlu0 %v355_v48  ;;  %v488_v6 = vsel %vm484_vm14, %v482_v4, %v486_v22  ;;  %v760_v27 = vpop.permute.xlu1 %759 }
 0x191   :  { %v5562_v40 = vadd.f32 %v488_v6, %v5541_v56  ;;  %v770_v42 = vadd.f32 %v5483_v53, %v760_v27 }
 0x193   :  { %v492_v10 = vsel %vm354_vm6, %v5562_v40, -inf  ;;  %v774_v47 = vmul.f32 0.2, %v770_v42  ;;  %vm772_vm4 = vcmp.gt.f32.partialorder %v770_v42, 0.0 }
 0x194   :  { %493 = vmax.xlane.f32.xlu0 %v492_v10 }
 0x195   :  { %v903_v43 = vpop.permute.xlu1 %902  ;;  %v776_v2 = vsel %vm772_vm4, %v770_v42, %v774_v47 }
 0x196   :  { %v913_v50 = vadd.f32 %v5501_v3, %v903_v43  ;;  %v5588_v53 = vadd.f32 %v776_v2, %v5541_v56  ;;  %v1060_v3 = vmul.f32 0.2, %v1056_v63 }
 0x198   :  { %1213 = vmax.xlane.f32.xlu0 %v1212_v18  ;;  %v917_v1 = vmul.f32 0.2, %v913_v50  ;;  %vm915_vm5 = vcmp.gt.f32.partialorder %v913_v50, 0.0  ;;  %v780_v17 = vsel %vm354_vm6, %v5588_v53, -inf  ;;  %v1062_v10 = vsel %vm1058_vm7, %v1056_v63, %v1060_v3 }
 0x199   :  { %v5602_v15 = vadd.f32 %v1062_v10, %v5541_v56 }
 0x19a   :  { %v1189_v57 = vpop.permute.xlu1 %1188  ;;  %v919_v22 = vsel %vm915_vm5, %v913_v50, %v917_v1 }
 0x19b   :  { %v1199_v4 = vadd.f32 %v5531_v41, %v1189_v57  ;;  %v5596_v5 = vadd.f32 %v919_v22, %v5541_v56  ;;  %v1066_v25 = vsel %vm354_vm6, %v5602_v15, -inf }
 0x19c   :  { %1356 = vmax.xlane.f32.xlu0 %v1355_v23 }
 0x19d   :  { %v1203_v6 = vmul.f32 0.2, %v1199_v4  ;;  %vm1201_vm8 = vcmp.gt.f32.partialorder %v1199_v4, 0.0  ;;  %v923_v41 = vsel %vm354_vm6, %v5596_v5, -inf }
 0x19f   :  { %v1332_v48 = vpop.permute.xlu1 %1331  ;;  %v1205_v23 = vsel %vm1201_vm8, %v1199_v4, %v1203_v6 }
 0x1a0   :  { %v1342_v9 = vadd.f32 %v5546_v59, %v1332_v48  ;;  %v5607_v27 = vadd.f32 %v1205_v23, %v5541_v56 }
 0x1a2   :  { %v1346_v18 = vmul.f32 0.2, %v1342_v9  ;;  %vm1344_vm9 = vcmp.gt.f32.partialorder %v1342_v9, 0.0  ;;  %v1209_v28 = vsel %vm354_vm6, %v5607_v27, -inf }
 0x1a4   :  { %v1348_v59 = vsel %vm1344_vm9, %v1342_v9, %v1346_v18 }
 0x1a5   :  { %v5612_v35 = vadd.f32 %v1348_v59, %v5541_v56 }
 0x1a7   :  { %v1352_v42 = vsel %vm354_vm6, %v5612_v35, -inf }
 0x1b2   :  { %4926 = vrot.lane.b32.xlu0 %v5435_v26, %s5263_s23 }
 0x1b4   :  { %638 = vmax.xlane.f32.xlu1 %v637_v52 }
 0x1b6   :  { %4941 = vrot.lane.b32.xlu0 %v5435_v26, %s5264_s2 }
 0x1b8   :  { %781 = vmax.xlane.f32.xlu1 %v780_v17 }
 0x1bc   :  { %924 = vmax.xlane.f32.xlu1 %v923_v41 }
 0x1c0   :  { %1067 = vmax.xlane.f32.xlu1 %v1066_v25 }
 0x1c4   :  { %1210 = vmax.xlane.f32.xlu1 %v1209_v28 }
 0x1c8   :  { %1353 = vmax.xlane.f32.xlu1 %v1352_v42 }
 0x1d9   :  { %4936 = vrot.lane.b32.xlu1 %v5435_v26, %s5265_s25 }
 0x208   :  { %v360_v43 = vpop.xlane.xlu1 %359  ;;  %v497_v47 = vpop.xlane.xlu0 %496 }
 0x209   :  { %v362_v50 = vsub.f32 %v5489_v61, %v360_v43  ;;  %v499_v51 = vsub.f32 %v5492_v62, %v497_v47 }
 0x20b   :  { %v365_v55 = vmul.f32 1.442695, %v362_v50  ;;  %v502_v57 = vmul.f32 1.442695, %v499_v51 }
 0x20c   :  { %v4922_v63 = vpop.permute.xlu1 %4921 }
 0x20d   :  { %5009 = vpow2.f32 %v365_v55  ;;  %v4924_v1 = vunpack.i.h.bf16 %v4922_v63  ;;  %v4923_v2 = vunpack.i.l.bf16 %v4922_v63  ;;  %v642_v52 = vpop.xlane.xlu0 %641 }
 0x20e   :  { %v644_v3 = vsub.f32 %v5506_v11, %v642_v52  ;;  %5011 = vpow2.f32 %v502_v57 }
 0x20f   :  { %v5621_v4 = vpack.c.bf16 %v4924_v1, %v4923_v2 }
 0x210   :  { %v647_v22 = vmul.f32 1.442695, %v644_v3 }
 0x211   :  { %4685 = vmatprep.subr.bf16.mxu1 %v5621_v4  ;;  %v785_v48 = vpop.xlane.xlu0 %784 }
 0x212   :  { %v787_v61 = vsub.f32 %v5511_v16, %v785_v48  ;;  %5013 = vpow2.f32 %v647_v22 }
 0x214   :  { %v790_v62 = vmul.f32 1.442695, %v787_v61 }
 0x215   :  { %v928_v17 = vpop.xlane.xlu0 %927 }
 0x216   :  { %v930_v6 = vsub.f32 %v5526_v39, %v928_v17  ;;  %5015 = vpow2.f32 %v790_v62 }
 0x217   :  { %v5626_v9 = vpop.eup %5009 }
 0x218   :  { %v933_v10 = vmul.f32 1.442695, %v930_v6  ;;  %v370_v11 = vsel %vm354_vm6, %v5626_v9, 0.0  ;;  %v5630_v41 = vpop.eup %5011 }
 0x219   :  { %371 = vadd.xlane.f32.xlu0 %v370_v11  ;;  %v1071_v18 = vpop.xlane.xlu0 %1070  ;;  %v507_v25 = vsel %vm354_vm6, %v5630_v41, 0.0 }
 0x21a   :  { %v1073_v23 = vsub.f32 %v5537_v54, %v1071_v18  ;;  %5017 = vpow2.f32 %v933_v10 }
 0x21c   :  { %v1076_v16 = vmul.f32 1.442695, %v1073_v23  ;;  %v5635_v59 = vpop.eup %5013 }
 0x21d   :  { %508 = vadd.xlane.f32.xlu0 %v507_v25  ;;  %v357_v39 = vpop.xlane.xlu0 %356  ;;  %v652_v43 = vsel %vm354_vm6, %v5635_v59, 0.0 }
 0x21e   :  { %v361_v28 = vsub.f32 %v5551_v0, %v357_v39  ;;  %5019 = vpow2.f32 %v1076_v16  ;;  %v5671_v39 = vpop.permute.xlu1 %4931 }
 0x220   :  { %v363_v42 = vmul.f32 1.442695, %v361_v28  ;;  %v5640_v47 = vpop.eup %5015 }
 0x221   :  { %653 = vadd.xlane.f32.xlu0 %v652_v43  ;;  %v494_v54 = vpop.xlane.xlu0 %493  ;;  %v795_v55 = vsel %vm354_vm6, %v5640_v47, 0.0 }
 0x222   :  { %5021 = vpow2.f32 %v363_v42  ;;  %v498_v50 = vsub.f32 %v5562_v40, %v494_v54 }
 0x224   :  { %v500_v51 = vmul.f32 1.442695, %v498_v50  ;;  %v5645_v57 = vpop.eup %5017 }
 0x225   :  { %796 = vadd.xlane.f32.xlu0 %v795_v55  ;;  %v1214_v0 = vpop.xlane.xlu0 %1213  ;;  %v938_v2 = vsel %vm354_vm6, %v5645_v57, 0.0 }
 0x226   :  { %5023 = vpow2.f32 %v500_v51  ;;  %v1216_v63 = vsub.f32 %v5567_v14, %v1214_v0 }
 0x228   :  { %v1219_v1 = vmul.f32 1.442695, %v1216_v63  ;;  %v5650_v52 = vpop.eup %5019 }
 0x229   :  { %939 = vadd.xlane.f32.xlu0 %v938_v2  ;;  %v1357_v3 = vpop.xlane.xlu0 %1356  ;;  %v1081_v61 = vsel %vm354_vm6, %v5650_v52, 0.0 }
 0x22a   :  { %5025 = vpow2.f32 %v1219_v1  ;;  %v1359_v40 = vsub.f32 %v5572_v21, %v1357_v3 }
 0x22c   :  { %v5653_v22 = vpop.eup %5021  ;;  %v1362_v48 = vmul.f32 1.442695, %v1359_v40 }
 0x22d   :  { %1082 = vadd.xlane.f32.xlu0 %v1081_v61  ;;  %v4927_v62 = vpop.permute.xlu0 %4926  ;;  %v367_v14 = vsel %vm354_vm6, %v5653_v22, 0.0 }
 0x22e   :  { %5027 = vpow2.f32 %v1362_v48  ;;  %v4929_v17 = vunpack.i.h.bf16 %v4927_v62  ;;  %v4928_v6 = vunpack.i.l.bf16 %v4927_v62  ;;  %368 = vadd.xlane.f32.xlu1 %v367_v14 }
 0x230   :  { %v5659_v10 = vpop.eup %5023  ;;  %v4688_v11 = vpack.c.bf16 %v4929_v17, %v4928_v6 }
 0x231   :  { %v504_v21 = vsel %vm354_vm6, %v5659_v10, 0.0 }
 0x232   :  { %505 = vadd.xlane.f32.xlu1 %v504_v21  ;;  %4689 = vmatprep.subr.bf16.mxu0 %v4688_v11 }
 0x233   :  { %4691 = vmatpush3.bf16.msra.mxu0 %v4688_v11 }
 0x234   :  { %v5663_v18 = vpop.eup %5025 }
 0x235   :  { %v1224_v23 = vsel %vm354_vm6, %v5663_v18, 0.0 }
 0x236   :  { %1225 = vadd.xlane.f32.xlu0 %v1224_v23 }
 0x238   :  { %v5667_v16 = vpop.eup %5027 }
 0x239   :  { %v1367_v25 = vsel %vm354_vm6, %v5667_v16, 0.0 }
 0x23a   :  { %1368 = vadd.xlane.f32.xlu0 %v1367_v25 }
 0x241   :  { %v639_v28 = vpop.xlane.xlu1 %638 }
 0x242   :  { %v643_v42 = vsub.f32 %v5580_v60, %v639_v28 }
 0x244   :  { %v645_v43 = vmul.f32 1.442695, %v643_v42 }
 0x245   :  { %v782_v54 = vpop.xlane.xlu1 %781 }
 0x246   :  { %5029 = vpow2.f32 %v645_v43  ;;  %v786_v50 = vsub.f32 %v5588_v53, %v782_v54 }
 0x248   :  { %v788_v51 = vmul.f32 1.442695, %v786_v50 }
 0x249   :  { %v925_v55 = vpop.xlane.xlu1 %924 }
 0x24a   :  { %5031 = vpow2.f32 %v788_v51  ;;  %v929_v0 = vsub.f32 %v5596_v5, %v925_v55  ;;  %v4942_v51 = vpop.permute.xlu0 %4941 }
 0x24c   :  { %v931_v63 = vmul.f32 1.442695, %v929_v0 }
 0x24d   :  { %v1068_v1 = vpop.xlane.xlu1 %1067 }
 0x24e   :  { %5033 = vpow2.f32 %v931_v63  ;;  %v1072_v2 = vsub.f32 %v5602_v15, %v1068_v1 }
 0x250   :  { %v5677_v3 = vpop.eup %5029  ;;  %v1074_v40 = vmul.f32 1.442695, %v1072_v2  ;;  %4951 = vrot.lane.b32.xlu0 %v5435_v26, %s5266_s3 }
 0x251   :  { %v1211_v60 = vpop.xlane.xlu1 %1210  ;;  %v649_v53 = vsel %vm354_vm6, %v5677_v3, 0.0 }
 0x252   :  { %5035 = vpow2.f32 %v1074_v40  ;;  %v1215_v48 = vsub.f32 %v5607_v27, %v1211_v60  ;;  %650 = vadd.xlane.f32.xlu1 %v649_v53  ;;  %v4934_v60 = vunpack.i.h.bf16 %v5671_v39  ;;  %v4933_v53 = vunpack.i.l.bf16 %v5671_v39 }
 0x254   :  { %v5684_v5 = vpop.eup %5031  ;;  %v1217_v61 = vmul.f32 1.442695, %v1215_v48 }
 0x255   :  { %v1354_v62 = vpop.xlane.xlu1 %1353  ;;  %v792_v15 = vsel %vm354_vm6, %v5684_v5, 0.0 }
 0x256   :  { %5037 = vpow2.f32 %v1217_v61  ;;  %v1358_v14 = vsub.f32 %v5612_v35, %v1354_v62  ;;  %793 = vadd.xlane.f32.xlu1 %v792_v15 }
 0x258   :  { %v5689_v17 = vpop.eup %5033  ;;  %v1360_v6 = vmul.f32 1.442695, %v1358_v14  ;;  %v4944_v14 = vunpack.i.h.bf16 %v4942_v51 }
 0x259   :  { %v4937_v11 = vpop.permute.xlu1 %4936  ;;  %v935_v21 = vsel %vm354_vm6, %v5689_v17, 0.0 }
 0x25a   :  { %5039 = vpow2.f32 %v1360_v6  ;;  %v4939_v27 = vunpack.i.h.bf16 %v4937_v11  ;;  %v4938_v23 = vunpack.i.l.bf16 %v4937_v11  ;;  %936 = vadd.xlane.f32.xlu1 %v935_v21  ;;  %v4943_v6 = vunpack.i.l.bf16 %v4942_v51 }
 0x25b   :  { %v4692_v11 = vpack.c.bf16 %v4934_v60, %v4933_v53 }
 0x25c   :  { %v5693_v25 = vpop.eup %5035  ;;  %v5695_v28 = vpack.c.bf16 %v4939_v27, %v4938_v23 }
 0x25d   :  { %v1078_v42 = vsel %vm354_vm6, %v5693_v25, 0.0 }
 0x25e   :  { %1079 = vadd.xlane.f32.xlu1 %v1078_v42  ;;  %4697 = vmatprep.subr.bf16.mxu0 %v5695_v28 }
 0x260   :  { %v5700_v35 = vpop.eup %5037 }
 0x261   :  { %v1221_v43 = vsel %vm354_vm6, %v5700_v35, 0.0 }
 0x262   :  { %1222 = vadd.xlane.f32.xlu1 %v1221_v43 }
 0x264   :  { %v5704_v54 = vpop.eup %5039 }
 0x265   :  { %v1364_v50 = vsel %vm354_vm6, %v5704_v54, 0.0 }
 0x266   :  { %1365 = vadd.xlane.f32.xlu1 %v1364_v50 }
 0x277   :  { %4946 = vrot.lane.b32.xlu1 %v5435_v26, %s5267_s26 }
 0x2a6   :  { %v372_v55 = vpop.xlane.xlu0 %371 }
 0x2a7   :  { %5041 = vrcp.f32 %v372_v55 }
 0x2aa   :  { %v509_v63 = vpop.xlane.xlu0 %508 }
 0x2ae   :  { %v654_v62 = vpop.xlane.xlu0 %653 }
 0x2b1   :  { %v5042_v2 = vpop.eup %5041 }
 0x2b2   :  { %v376_v61 = vmul.f32 %v5042_v2, %v5626_v9  ;;  %v4700_v9 = vpack.c.bf16 %v4944_v14, %v4943_v6 }
 0x2bb   :  { %v369_v0 = vpop.xlane.xlu1 %368 }
 0x2bc   :  { %5043 = vrcp.f32 %v369_v0 }
 0x2bd   :  { %5045 = vrcp.f32 %v509_v63 }
 0x2bf   :  { %v506_v1 = vpop.xlane.xlu1 %505 }
 0x2c0   :  { %5047 = vrcp.f32 %v506_v1 }
 0x2c1   :  { %5049 = vrcp.f32 %v654_v62 }
 0x2c6   :  { %v5044_v40 = vpop.eup %5043 }
 0x2c7   :  { %v375_v48 = vmul.f32 %v5044_v40, %v5653_v22  ;;  %v5046_v26 = vpop.eup %5045  ;;  %v797_v22 = vpop.xlane.xlu0 %796 }
 0x2c8   :  { %v513_v39 = vmul.f32 %v5046_v26, %v5630_v41 }
 0x2c9   :  { %4378 = vmatprep.mubr.msk.f32.mxu1 %vm354_vm6, %v375_v48 }
 0x2ca   :  { %v5048_v15 = vpop.eup %5047  ;;  %4379 = vmatmul.mubr.msk.f32.vlgmr.msra.gmra.mrb[4].mxu1 %vm354_vm6, %v376_v61 }
 0x2cb   :  { %4687 = vmatpush3.bf16.msra.mxu1 %v5621_v4  ;;  %v512_v21 = vmul.f32 %v5048_v15, %v5659_v10  ;;  %v940_v27 = vpop.xlane.xlu0 %939  ;;  %v5050_v50 = vpop.eup %5049 }
 0x2cc   :  { %4693 = vmatprep.subr.bf16.mxu1 %v4692_v11  ;;  %v658_v1 = vmul.f32 %v5050_v50, %v5635_v59 }
 0x2cd   :  { %4385 = vmatprep.mubr.msk.f32.mxu1 %vm354_vm6, %v512_v21 }
 0x2ce   :  { %4386 = vmatmul.mubr.msk.f32.vlgmr.msra.gmra.mrb[6].mxu1 %vm354_vm6, %v513_v39 }
 0x2cf   :  { %4695 = vmatpush3.bf16.msra.mxu1 %v4692_v11  ;;  %v1083_v23 = vpop.xlane.xlu0 %1082 }
 0x2d0   :  { %4701 = vmatprep.subr.bf16.mxu1 %v4700_v9 }
 0x2d3   :  { %v1226_v42 = vpop.xlane.xlu0 %1225 }
 0x2d7   :  { %v1369_v10 = vpop.xlane.xlu0 %1368 }
 0x2db   :  { %v4952_v55 = vpop.permute.xlu0 %4951 }
 0x2dc   :  { %v4954_v60 = vunpack.i.h.bf16 %v4952_v55  ;;  %v4953_v53 = vunpack.i.l.bf16 %v4952_v55 }
 0x2de   :  { %v4708_v62 = vpack.c.bf16 %v4954_v60, %v4953_v53 }
 0x2df   :  { %v651_v43 = vpop.xlane.xlu1 %650 }
 0x2e0   :  { %5051 = vrcp.f32 %v651_v43 }
 0x2e1   :  { %5053 = vrcp.f32 %v797_v22 }
 0x2e3   :  { %v794_v4 = vpop.xlane.xlu1 %793 }
 0x2e4   :  { %5055 = vrcp.f32 %v794_v4 }
 0x2e5   :  { %5057 = vrcp.f32 %v940_v27 }
 0x2e7   :  { %v937_v41 = vpop.xlane.xlu1 %936 }
 0x2e8   :  { %5059 = vrcp.f32 %v937_v41 }
 0x2e9   :  { %5061 = vrcp.f32 %v1083_v23 }
 0x2ea   :  { %v5052_v51 = vpop.eup %5051 }
 0x2eb   :  { %v1080_v0 = vpop.xlane.xlu1 %1079  ;;  %v657_v63 = vmul.f32 %v5052_v51, %v5677_v3  ;;  %v5054_v2 = vpop.eup %5053 }
 0x2ec   :  { %5063 = vrcp.f32 %v1080_v0  ;;  %v801_v26 = vmul.f32 %v5054_v2, %v5640_v47 }
 0x2ed   :  { %4392 = vmatprep.mubr.msk.f32.mxu0 %vm354_vm6, %v657_v63 }
 0x2ee   :  { %v5056_v40 = vpop.eup %5055  ;;  %4393 = vmatmul.mubr.msk.f32.vlgmr.msra.gmra.mrb[2].mxu0 %vm354_vm6, %v658_v1 }
 0x2ef   :  { %4699 = vmatpush3.bf16.msra.mxu0 %v5695_v28  ;;  %v1223_v48 = vpop.xlane.xlu1 %1222  ;;  %v800_v61 = vmul.f32 %v5056_v40, %v5684_v5  ;;  %v5058_v3 = vpop.eup %5057 }
 0x2f0   :  { %5065 = vrcp.f32 %v1223_v48  ;;  %v944_v5 = vmul.f32 %v5058_v3, %v5645_v57 }
 0x2f1   :  { %5067 = vrcp.f32 %v1226_v42  ;;  %4399 = vmatprep.mubr.msk.f32.mxu1 %vm354_vm6, %v800_v61 }
 0x2f2   :  { %v5060_v59 = vpop.eup %5059  ;;  %4400 = vmatmul.mubr.msk.f32.vlgmr.msra.gmra.mrb[8].mxu1 %vm354_vm6, %v801_v26  ;;  %5069 = vrcp.f32 %v1369_v10 }
 0x2f3   :  { %4703 = vmatpush3.bf16.msra.mxu1 %v4700_v9  ;;  %v1366_v15 = vpop.xlane.xlu1 %1365  ;;  %v943_v14 = vmul.f32 %v5060_v59, %v5689_v17  ;;  %v5062_v28 = vpop.eup %5061 }
 0x2f4   :  { %5071 = vrcp.f32 %v1366_v15  ;;  %4709 = vmatprep.subr.bf16.mxu1 %v4708_v62  ;;  %v1087_v9 = vmul.f32 %v5062_v28, %v5650_v52 }
 0x2f5   :  { %4406 = vmatprep.mubr.msk.f32.mxu0 %vm354_vm6, %v943_v14 }
 0x2f6   :  { %v5064_v47 = vpop.eup %5063  ;;  %4407 = vmatmul.mubr.msk.f32.vlgmr.msra.gmra.mrb[4].mxu0 %vm354_vm6, %v944_v5 }
 0x2f7   :  { %v4947_v6 = vpop.permute.xlu1 %4946  ;;  %v1086_v11 = vmul.f32 %v5064_v47, %v5693_v25  ;;  %v83_v47 = vld [vmem:[%s6500_s5] sm:$0xff] }
 0x2f8   :  { %v4949_v21 = vunpack.i.h.bf16 %v4947_v6  ;;  %v4948_v39 = vunpack.i.l.bf16 %v4947_v6  ;;  %v84_v6 = vld [vmem:[%s6500_s5 + $0x8] sm:$0xff] }
 0x2f9   :  { %4413 = vmatprep.mubr.msk.f32.mxu1 %vm354_vm6, %v1086_v11 }
 0x2fa   :  { %v5066_v17 = vpop.eup %5065  ;;  %4414 = vmatmul.mubr.msk.f32.vlgmr.msra.gmra.mrb[10].mxu1 %vm354_vm6, %v1087_v9  ;;  %v4704_v22 = vpack.c.bf16 %v4949_v21, %v4948_v39  ;;  %v4712_v9 = vpack.c.bf16 %v84_v6, %v83_v47  ;;  %v94_v47 = vld [vmem:[%s6501_s6 + $0x18] sm:$0xff] }
 0x2fb   :  { %v5068_v57 = vpop.eup %5067  ;;  %4711 = vmatpush3.bf16.msra.mxu1 %v4708_v62  ;;  %v1229_v27 = vmul.f32 %v5066_v17, %v5700_v35 }
 0x2fc   :  { %4705 = vmatprep.subr.bf16.mxu0 %v4704_v22  ;;  %v5070_v23 = vpop.eup %5069  ;;  %v1230_v42 = vmul.f32 %v5068_v57, %v5663_v18 }
 0x2fd   :  { %4707 = vmatpush3.bf16.msra.mxu0 %v4704_v22  ;;  %4420 = vmatprep.mubr.msk.f32.mxu0 %vm354_vm6, %v1229_v27  ;;  %v1373_v43 = vmul.f32 %v5070_v23, %v5667_v16 }
 0x2fe   :  { %v5072_v25 = vpop.eup %5071  ;;  %4713 = vmatprep.subr.bf16.mxu0 %v4712_v9 }
 0x2ff   :  { %v1372_v52 = vmul.f32 %v5072_v25, %v5704_v54 }
 0x300   :  { %4421 = vmatmul.mubr.msk.f32.vlgmr.msra.gmra.mrb[6].mxu0 %vm354_vm6, %v1230_v42  ;;  %v85_v42 = vld [vmem:[%s6500_s5 + $0x10] sm:$0xff] }
 0x301   :  { %4427 = vmatprep.mubr.msk.f32.mxu1 %vm354_vm6, %v1372_v52  ;;  %4715 = vmatpush3.bf16.msra.mxu0 %v4712_v9  ;;  %v86_v52 = vld [vmem:[%s6500_s5 + $0x18] sm:$0xff] }
 0x302   :  { %4428 = vmatmul.mubr.msk.f32.vlgmr.msra.gmra.mrb[12].mxu1 %vm354_vm6, %v1373_v43 }
 0x39d   :  { %v5746_v4 = vpop.f32.mrb[4].mxu1 }
 0x39e   :  { %v5748_v35 = vpop.f32.mrb[5].mxu1 }
 0x3a1   :  { %v5750_v10 = vpop.f32.mrb[6].mxu1 }
 0x3a2   :  { %v5752_v41 = vpop.f32.mrb[7].mxu1  ;;  %v606_v18 = vmin.f32 %v5750_v10, 0.0  ;;  %vm604_vm12 = vcmp.gt.f32.partialorder %v5750_v10, 0.0 }
 0x3a3   :  { %v605_v54 = vmin.f32 %v5752_v41, 0.0  ;;  %vm603_vm13 = vcmp.gt.f32.partialorder %v5752_v41, 0.0 }
 0x3a4   :  { %v609_v50 = vmul.f32 1.442695, %v606_v18 }
 0x3a5   :  { %v607_v16 = vmul.f32 1.442695, %v605_v54  ;;  %v4716_v54 = vpack.c.bf16 %v86_v52, %v85_v42 }
 0x3a6   :  { %5073 = vpow2.f32 %v609_v50  ;;  %v91_v50 = vld [vmem:[%s6501_s6] sm:$0xff] }
 0x3a7   :  { %5075 = vpow2.f32 %v607_v16  ;;  %v92_v16 = vld [vmem:[%s6501_s6 + $0x8] sm:$0xff]  ;;  %4717 = vmatprep.subr.bf16.mxu0 %v4716_v54 }
 0x3a8   :  { %4719 = vmatpush3.bf16.msra.mxu0 %v4716_v54 }
 0x3b0   :  { %v5074_v11 = vpop.eup %5073 }
 0x3b1   :  { %v5076_v17 = vpop.eup %5075  ;;  %v4080_v25 = vadd.f32 -1.0, %v5074_v11 }
 0x3c1   :  { %v4394_v51 = vpop.f32.mrb[2].mxu0 }
 0x3c2   :  { %v749_v55 = vmin.f32 %v4394_v51, 0.0  ;;  %v737_v0 = vpop.f32.mrb[3].mxu0  ;;  %vm747_vm10 = vcmp.gt.f32.partialorder %v4394_v51, 0.0 }
 0x3c3   :  { %v748_v63 = vmin.f32 %v737_v0, 0.0  ;;  %vm746_vm11 = vcmp.gt.f32.partialorder %v737_v0, 0.0 }
 0x3c4   :  { %v752_v1 = vmul.f32 1.442695, %v749_v55 }
 0x3c5   :  { %v750_v2 = vmul.f32 1.442695, %v748_v63  ;;  %v5756_v40 = vpop.f32.mrb[8].mxu1 }
 0x3c6   :  { %5077 = vpow2.f32 %v752_v1  ;;  %v892_v60 = vmin.f32 %v5756_v40, 0.0  ;;  %v5759_v53 = vpop.f32.mrb[9].mxu1  ;;  %vm890_vm3 = vcmp.gt.f32.partialorder %v5756_v40, 0.0 }
 0x3c7   :  { %5079 = vpow2.f32 %v750_v2  ;;  %v891_v48 = vmin.f32 %v5759_v53, 0.0  ;;  %v4728_v2 = vpack.c.bf16 %v92_v16, %v91_v50  ;;  %vm889_vm4 = vcmp.gt.f32.partialorder %v5759_v53, 0.0 }
 0x3c8   :  { %v895_v61 = vmul.f32 1.442695, %v892_v60 }
 0x3c9   :  { %v893_v26 = vmul.f32 1.442695, %v891_v48  ;;  %v5762_v3 = vpop.f32.mrb[4].mxu0  ;;  %4729 = vmatprep.subr.bf16.mxu1 %v4728_v2 }
 0x3ca   :  { %v1035_v59 = vmin.f32 %v5762_v3, 0.0  ;;  %v5765_v62 = vpop.f32.mrb[5].mxu0  ;;  %5081 = vpow2.f32 %v895_v61  ;;  %4731 = vmatpush3.bf16.msra.mxu1 %v4728_v2  ;;  %vm1033_vm14 = vcmp.gt.f32.partialorder %v5762_v3, 0.0 }
 0x3cb   :  { %v1034_v15 = vmin.f32 %v5765_v62, 0.0  ;;  %5083 = vpow2.f32 %v893_v26  ;;  %v4079_v26 = vadd.f32 -1.0, %v5076_v17  ;;  %vm1032_vm15 = vcmp.gt.f32.partialorder %v5765_v62, 0.0 }
 0x3cc   :  { %v1038_v14 = vmul.f32 1.442695, %v1035_v59  ;;  %v87_v59 = vld [vmem:[%s6500_s5 + $0x20] sm:$0xff] }
 0x3cd   :  { %v1036_v5 = vmul.f32 1.442695, %v1034_v15  ;;  %v5768_v28 = vpop.f32.mrb[10].mxu1  ;;  %v88_v15 = vld [vmem:[%s6500_s5 + $0x28] sm:$0xff]  ;;  %v613_v52 = vsel %vm603_vm13, %v5752_v41, %v4079_v26  ;;  %v95_v41 = vld [vmem:[%s6501_s6 + $0x20] sm:$0xff]  ;;  %vm459_vm13 = vcmp.gt.f32.partialorder %v5746_v4, 0.0 }
 0x3ce   :  { %5085 = vpow2.f32 %v1038_v14  ;;  %v1178_v21 = vmin.f32 %v5768_v28, 0.0  ;;  %v5777_v39 = vpop.f32.mrb[11].mxu1  ;;  %vm1176_vm8 = vcmp.gt.f32.partialorder %v5768_v28, 0.0 }
 0x3cf   :  { %5087 = vpow2.f32 %v1036_v5  ;;  %v1177_v22 = vmin.f32 %v5777_v39, 0.0  ;;  %v93_v5 = vld [vmem:[%s6501_s6 + $0x10] sm:$0xff]  ;;  %vm1175_vm9 = vcmp.gt.f32.partialorder %v5777_v39, 0.0 }
 0x3d0   :  { %v5078_v57 = vpop.eup %5077  ;;  %v1181_v43 = vmul.f32 1.442695, %v1178_v21 }
 0x3d1   :  { %v5080_v27 = vpop.eup %5079  ;;  %v4084_v23 = vadd.f32 -1.0, %v5078_v57  ;;  %v1179_v55 = vmul.f32 1.442695, %v1177_v22 }
 0x3d2   :  { %v4083_v18 = vadd.f32 -1.0, %v5080_v27  ;;  %5089 = vpow2.f32 %v1181_v43  ;;  %v614_v27 = vsel %vm604_vm12, %v5750_v10, %v4080_v25  ;;  %v4732_v43 = vpack.c.bf16 %v94_v47, %v93_v5  ;;  %v89_v10 = vld [vmem:[%s6500_s5 + $0x30] sm:$0xff]  ;;  %v90_v25 = vld [vmem:[%s6500_s5 + $0x38] sm:$0xff]  ;;  %s5270_s5 = smov 32  }
 0x3d3   :  { %v5792_v63 = vpop.f32.mrb[6].mxu0  ;;  %v757_v1 = vsel %vm747_vm10, %v4394_v51, %v4084_v23  ;;  %5091 = vpow2.f32 %v1179_v55  ;;  %v4724_v55 = vpack.c.bf16 %v90_v25, %v89_v10  ;;  %vm1529_vm12 = vcmask 64512  }
 0x3d4   :  { %v1321_v60 = vmin.f32 %v5792_v63, 0.0  ;;  %1485 = vrot.lane.b32.xlu0 %v757_v1, %s6522_s30  ;;  %v5796_v48 = vpop.f32.mrb[7].mxu0  ;;  %v756_v61 = vsel %vm746_vm11, %v737_v0, %v4083_v18  ;;  %v4720_v0 = vpack.c.bf16 %v88_v15, %v87_v59  ;;  %v5082_v6 = vpop.eup %5081  ;;  %4733 = vmatprep.subr.bf16.mxu1 %v4732_v43  ;;  %v96_v1 = vld [vmem:[%s6501_s6 + $0x28] sm:$0xff]  ;;  %v98_v15 = vld [vmem:[%s6501_s6 + $0x38] sm:$0xff]  ;;  %vm1319_vm5 = vcmp.gt.f32.partialorder %v5792_v63, 0.0 }
 0x3d5   :  { %v1320_v51 = vmin.f32 %v5796_v48, 0.0  ;;  %v5806_v14 = vpop.f32.mrb[12].mxu1  ;;  %1483 = vrot.lane.b32.xlu1 %v756_v61, %s6522_s30  ;;  %v5084_v17 = vpop.eup %5083  ;;  %4735 = vmatpush3.bf16.msra.mxu1 %v4732_v43  ;;  %v4736_v61 = vpack.c.bf16 %v96_v1, %v95_v41  ;;  %vm1318_vm7 = vcmp.gt.f32.partialorder %v5796_v48, 0.0 }
 0x3d6   :  { %v1324_v11 = vmul.f32 1.442695, %v1321_v60  ;;  %v1464_v21 = vmin.f32 %v5806_v14, 0.0  ;;  %v5817_v9 = vpop.f32.mrb[13].mxu1  ;;  %4721 = vmatprep.subr.bf16.mxu0 %v4720_v0  ;;  %v4088_v60 = vadd.f32 -1.0, %v5082_v6  ;;  %v4087_v59 = vadd.f32 -1.0, %v5084_v17 }
 0x3d7   :  { %v1322_v22 = vmul.f32 1.442695, %v1320_v51  ;;  %v1463_v57 = vmin.f32 %v5817_v9, 0.0  ;;  %4723 = vmatpush3.bf16.msra.mxu0 %v4720_v0  ;;  %4737 = vmatprep.subr.bf16.mxu1 %v4736_v61  ;;  %vm1462_vm10 = vcmp.gt.f32.partialorder %v5806_v14, 0.0  ;;  %vm1461_vm11 = vcmp.gt.f32.partialorder %v5817_v9, 0.0 }
 0x3d8   :  { %v5086_v23 = vpop.eup %5085  ;;  %5093 = vpow2.f32 %v1324_v11  ;;  %v1467_v42 = vmul.f32 1.442695, %v1464_v21  ;;  %1477 = vrot.lane.b32.xlu0 %v614_v27, %s6520_s21  ;;  %4725 = vmatprep.subr.bf16.mxu0 %v4724_v55  ;;  %v899_v5 = vsel %vm889_vm4, %v5759_v53, %v4087_v59  ;;  %vm1542_vm4 = vcmask 392192  }
 0x3d9   :  { %v5088_v18 = vpop.eup %5087  ;;  %5095 = vpow2.f32 %v1322_v22  ;;  %v1465_v54 = vmul.f32 1.442695, %v1463_v57  ;;  %1475 = vrot.lane.b32.xlu1 %v613_v52, %s6520_s21  ;;  %v4092_v50 = vadd.f32 -1.0, %v5086_v23  ;;  %4739 = vmatpush3.bf16.msra.mxu1 %v4736_v61  ;;  %s6546_s21 = smov 16  }
 0x3da   :  { %v4091_v16 = vadd.f32 -1.0, %v5088_v18  ;;  %5097 = vpow2.f32 %v1467_v42  ;;  %v461_v18 = vmin.f32 %v5746_v4, 0.0 }
 0x3db   :  { %v1043_v2 = vsel %vm1033_vm14, %v5762_v3, %v4092_v50  ;;  %5099 = vpow2.f32 %v1465_v54  ;;  %4727 = vmatpush3.bf16.msra.mxu0 %v4724_v55  ;;  %v97_v3 = vld [vmem:[%s6501_s6 + $0x30] sm:$0xff]  ;;  %s6528_s6 = smov 48   ;;  %vm458_vm14 = vcmp.gt.f32.partialorder %v5748_v35, 0.0 }
 0x3dc   :  { %1501 = vrot.lane.b32.xlu0 %v1043_v2, %s5270_s5  ;;  %v1042_v26 = vsel %vm1032_vm15, %v5765_v62, %v4091_v16  ;;  %4744 = vmatprep.subr.bf16.mxu0 %v5249_v7  ;;  %v900_v62 = vsel %vm890_vm3, %v5756_v40, %v4088_v60  ;;  %v4740_v51 = vpack.c.bf16 %v98_v15, %v97_v3  ;;  %v5090_v0 = vpop.eup %5089  ;;  %v464_v54 = vmul.f32 1.442695, %v461_v18 }
 0x3dd   :  { %1499 = vrot.lane.b32.xlu1 %v1042_v26, %s5270_s5  ;;  %v5092_v47 = vpop.eup %5091  ;;  %v4096_v22 = vadd.f32 -1.0, %v5090_v0  ;;  %vm1534_vm15 = vcmask 195584   ;;  %vm1539_vm3 = vcmask 326656  }
 0x3de   :  { %4741 = vmatprep.subr.bf16.mxu1 %v4740_v51  ;;  %v4095_v27 = vadd.f32 -1.0, %v5092_v47  ;;  %5101 = vpow2.f32 %v464_v54 }
 0x3df   :  { %4743 = vmatpush3.bf16.msra.mxu1 %v4740_v51  ;;  %v1186_v42 = vsel %vm1176_vm8, %v5768_v28, %v4096_v22 }
 0x3e0   :  { %1493 = vrot.lane.b32.xlu0 %v900_v62, %s6530_s28 }
 0x3e1   :  { %1491 = vrot.lane.b32.xlu1 %v899_v5, %s6530_s28 }
 0x3e2   :  { %v5094_v6 = vpop.eup %5093 }
 0x3e3   :  { %v5096_v11 = vpop.eup %5095  ;;  %v4100_v21 = vadd.f32 -1.0, %v5094_v6 }
 0x3e4   :  { %v4099_v17 = vadd.f32 -1.0, %v5096_v11  ;;  %v5098_v57 = vpop.eup %5097 }
 0x3e5   :  { %v1329_v40 = vsel %vm1319_vm5, %v5792_v63, %v4100_v21  ;;  %v5100_v23 = vpop.eup %5099  ;;  %v4104_v52 = vadd.f32 -1.0, %v5098_v57  ;;  %v1185_v63 = vsel %vm1175_vm9, %v5777_v39, %v4095_v27  ;;  %v460_v39 = vmin.f32 %v5748_v35, 0.0 }
 0x3e6   :  { %1517 = vrot.lane.b32.xlu0 %v1329_v40, %s6528_s6  ;;  %v1328_v53 = vsel %vm1318_vm7, %v5796_v48, %v4099_v17  ;;  %v4103_v43 = vadd.f32 -1.0, %v5100_v23  ;;  %vm1545_vm5 = vcmask 457728   ;;  %vm1548_vm7 = vcmask 523264  }
 0x3e7   :  { %1515 = vrot.lane.b32.xlu1 %v1328_v53, %s6528_s6  ;;  %v1472_v48 = vsel %vm1462_vm10, %v5806_v14, %v4104_v52  ;;  %v462_v50 = vmul.f32 1.442695, %v460_v39  ;;  %vm5899_vm8 = vmpackc.low %vm1548_vm7, %vm1548_vm7 }
 0x3e8   :  { %v1471_v28 = vsel %vm1461_vm11, %v5817_v9, %v4103_v43  ;;  %v5102_v14 = vpop.eup %5101 }
 0x3e9   :  { %5103 = vpow2.f32 %v462_v50  ;;  %v4076_v60 = vadd.f32 -1.0, %v5102_v14 }
 0x3ea   :  { %1509 = vrot.lane.b32.xlu0 %v1186_v42, %s6526_s4 }
 0x3eb   :  { %1507 = vrot.lane.b32.xlu1 %v1185_v63, %s6526_s4  ;;  %v469_v61 = vsel %vm459_vm13, %v5746_v4, %v4076_v60  ;;  %s6551_s4 = smov 56  }
 0x3ee   :  { %1525 = vrot.lane.b32.xlu0 %v1472_v48, %s6524_s29  ;;  %v99_v48 = vld [vmem:[%s6502_s7] sm:$0x1] }
 0x3ef   :  { %1523 = vrot.lane.b32.xlu1 %v1471_v28, %s6524_s29 }
 0x3f3   :  { %v5104_v55 = vpop.eup %5103 }
 0x3f4   :  { %v4075_v9 = vadd.f32 -1.0, %v5104_v55 }
 0x3f6   :  { %v468_v59 = vsel %vm458_vm14, %v5748_v35, %v4075_v9 }
 0x446   :  { %v1486_v10 = vpop.permute.xlu0 %1485 }
 0x447   :  { %v1484_v25 = vpop.permute.xlu1 %1483 }
 0x44a   :  { %v1478_v41 = vpop.permute.xlu0 %1477 }
 0x44b   :  { %v1476_v16 = vpop.permute.xlu1 %1475  ;;  %v1531_v3 = vsel %vm1529_vm12, %v469_v61, %v1478_v41 }
 0x44c   :  { %v1530_v62 = vsel %vm1529_vm12, %v468_v59, %v1476_v16  ;;  %v1533_v51 = vsel %vm354_vm6, %v1531_v3, %v1486_v10 }
 0x44d   :  { %v1532_v47 = vsel %vm354_vm6, %v1530_v62, %v1484_v25 }
 0x44e   :  { %v1502_v1 = vpop.permute.xlu0 %1501 }
 0x44f   :  { %v1500_v2 = vpop.permute.xlu1 %1499 }
 0x452   :  { %v1494_v26 = vpop.permute.xlu0 %1493 }
 0x453   :  { %v1492_v15 = vpop.permute.xlu1 %1491  ;;  %v1536_v5 = vsel %vm1534_vm15, %v1533_v51, %v1494_v26 }
 0x454   :  { %v1535_v4 = vsel %vm1534_vm15, %v1532_v47, %v1492_v15  ;;  %v1538_v11 = vsel %vm100_vm0, %v1536_v5, %v1502_v1 }
 0x455   :  { %v1537_v17 = vsel %vm100_vm0, %v1535_v4, %v1500_v2 }
 0x458   :  { %v1518_v0 = vpop.permute.xlu0 %1517 }
 0x459   :  { %v1516_v6 = vpop.permute.xlu1 %1515 }
 0x45c   :  { %v1510_v35 = vpop.permute.xlu0 %1509 }
 0x45d   :  { %v1541_v21 = vsel %vm1539_vm3, %v1538_v11, %v1510_v35  ;;  %v1508_v40 = vpop.permute.xlu1 %1507 }
 0x45e   :  { %v1540_v22 = vsel %vm1539_vm3, %v1537_v17, %v1508_v40  ;;  %v1544_v57 = vsel %vm1542_vm4, %v1541_v21, %v1518_v0 }
 0x45f   :  { %v1543_v23 = vsel %vm1542_vm4, %v1540_v22, %v1516_v6 }
 0x460   :  { %v1526_v53 = vpop.permute.xlu0 %1525 }
 0x461   :  { %v1547_v27 = vsel %vm1545_vm5, %v1544_v57, %v1526_v53  ;;  %v1524_v42 = vpop.permute.xlu1 %1523 }
 0x462   :  { %v1546_v52 = vsel %vm1545_vm5, %v1543_v23, %v1524_v42  ;;  %v1917_v23 = vld [vmem:[%s6503_s8] sm:$0xff]  ;;  %v1918_v42 = vld [vmem:[%s6503_s8 + $0x8] sm:$0xff] }
 0x463   :  { %v4745_v43 = vpack.c.bf16 %v1547_v27, %v1546_v52  ;;  %4446 = vmatprep.mubr.msk.f32.mxu0 %vm1548_vm7, %v1546_v52  ;;  %4465 = vmatprep.mubr.msk.f32.mxu1 %vm1548_vm7, %v1546_v52  ;;  %v4752_v52 = vpack.c.bf16 %v1918_v42, %v1917_v23 }
 0x464   :  { %4447 = vmatmul.mubr.msk.f32.vlgmr.msra.gmra.mrb[8].mxu0 %vm1548_vm7, %v1547_v27  ;;  %4466 = vmatmul.mubr.msk.f32.vlgmr.msra.gmra.mrb[14].mxu1 %vm1548_vm7, %v1547_v27 }
 0x465   :  { %4747 = vmatpush3.bf16.xpose.msk.msra.mxu0 %vm5899_vm8, %v4745_v43  ;;  %4472 = vmatprep.mubr.msk.f32.mxu0 %vm5250_vm1, %v5251_v12  ;;  %v1919_v43 = vld [vmem:[%s6503_s8 + $0x10] sm:$0xff] }
 0x46c   :  { %4473 = vmatmul.mubr.msk.f32.vlgmr.msra.gmra.mrb[10].mxu0 %vm1548_vm7, %v99_v48  ;;  %v1920_v48 = vld [vmem:[%s6503_s8 + $0x18] sm:$0xff] }
 0x537   :  { %v4448_v28 = vpop.f32.mrb[8].mxu0  ;;  %v4467_v18 = vpop.f32.mrb[14].mxu1 }
 0x538   :  { %1785 = vperm.xlu0 %4956, %v4467_v18   ;;  %v1621_v39 = vpop.f32.mrb[9].mxu0  ;;  %v1696_v54 = vpop.f32.mrb[15].mxu1  ;;  %v1921_v18 = vld [vmem:[%s6504_s9] sm:$0xff] }
 0x539   :  { %v4748_v50 = vpack.c.bf16 %v4448_v28, %v1621_v39  ;;  %1780 = vperm.xlu1 %4955, %v1696_v54   ;;  %v4756_v28 = vpack.c.bf16 %v1920_v48, %v1919_v43  ;;  %v1922_v39 = vld [vmem:[%s6504_s9 + $0x8] sm:$0xff] }
 0x53a   :  { %v4760_v54 = vpack.c.bf16 %v1922_v39, %v1921_v18 }
 0x53b   :  { %4749 = vmatprep.subr.bf16.mxu1 %v4748_v50 }
 0x53c   :  { %4751 = vmatpush3.bf16.msra.mxu1 %v4748_v50  ;;  %4761 = vmatprep.subr.bf16.mxu0 %v4760_v54  ;;  %v1923_v50 = vld [vmem:[%s6504_s9 + $0x10] sm:$0xff] }
 0x53d   :  { %4957 = vset.pattern.permute.xlu1 %v5252_v19  ;;  %4753 = vmatprep.subr.bf16.mxu1 %v4752_v52 }
 0x53e   :  { %4763 = vmatpush3.bf16.msra.mxu0 %v4760_v54 }
 0x53f   :  { %v1774_v10 = vpop.f32.mrb[10].mxu0 }
 0x540   :  { %v4474_v25 = vpop.f32.mrb[11].mxu0  ;;  %v1791_v41 = vrot.slane %v1774_v10, %v5457_v38  ;;  %v1924_v10 = vld [vmem:[%s6504_s9 + $0x18] sm:$0xff] }
 0x541   :  { %v4764_v25 = vpack.c.bf16 %v1924_v10, %v1923_v50 }
 0x543   :  { %4765 = vmatprep.subr.bf16.mxu0 %v4764_v25 }
 0x544   :  { %4767 = vmatpush3.bf16.msra.mxu0 %v4764_v25 }
 0x5b7   :  { %v1786_v16 = vpop.permute.xlu0 %1785 }
 0x5b8   :  { %v1793_v14 = vadd.f32 %v1791_v41, %v1786_v16  ;;  %v1781_v55 = vpop.permute.xlu1 %1780 }
 0x5b9   :  { %v1792_v1 = vadd.f32 %v1791_v41, %v1781_v55 }
 0x5ba   :  { %vm1795_vm9 = vcmp.gt.f32.partialorder %v1793_v14, 0.0  ;;  %v1797_v2 = vmul.f32 0.2, %v1793_v14 }
 0x5bb   :  { %vm1794_vm10 = vcmp.gt.f32.partialorder %v1792_v1, 0.0  ;;  %v1796_v60 = vmul.f32 0.2, %v1792_v1 }
 0x5bc   :  { %v1799_v9 = vsel %vm1795_vm9, %v1793_v14, %v1797_v2 }
 0x5bd   :  { %v1801_v61 = vadd.f32 %v1799_v9, %v5473_v49  ;;  %v1798_v26 = vsel %vm1794_vm10, %v1792_v1, %v1796_v60 }
 0x5be   :  { %v1800_v59 = vadd.f32 %v1798_v26, %v5541_v56 }
 0x5bf   :  { %v1805_v3 = vsel %vm354_vm6, %v1801_v61, -inf }
 0x5c0   :  { %1806 = vmax.xlane.f32.xlu0 %v1805_v3  ;;  %v1802_v15 = vsel %vm354_vm6, %v1800_v59, -inf }
 0x5c1   :  { %1803 = vmax.xlane.f32.xlu1 %v1802_v15 }
 0x64d   :  { %v1807_v62 = vpop.xlane.xlu0 %1806 }
 0x64e   :  { %v1809_v51 = vsub.f32 %v1801_v61, %v1807_v62  ;;  %v1804_v0 = vpop.xlane.xlu1 %1803  ;;  %v1925_v62 = vld [vmem:[%s6505_s10] sm:$0xff] }
 0x64f   :  { %v1808_v5 = vsub.f32 %v1800_v59, %v1804_v0 }
 0x650   :  { %v1812_v47 = vmul.f32 1.442695, %v1809_v51 }
 0x651   :  { %v1810_v6 = vmul.f32 1.442695, %v1808_v5 }
 0x652   :  { %5105 = vpow2.f32 %v1812_v47 }
 0x653   :  { %5107 = vpow2.f32 %v1810_v6 }
 0x65c   :  { %v5106_v4 = vpop.eup %5105 }
 0x65d   :  { %v5108_v11 = vpop.eup %5107  ;;  %v1817_v35 = vsel %vm354_vm6, %v5106_v4, 0.0 }
 0x65e   :  { %1818 = vadd.xlane.f32.xlu0 %v1817_v35  ;;  %v1814_v21 = vsel %vm354_vm6, %v5108_v11, 0.0 }
 0x65f   :  { %1815 = vadd.xlane.f32.xlu1 %v1814_v21 }
 0x6eb   :  { %v1819_v17 = vpop.xlane.xlu0 %1818 }
 0x6ec   :  { %5109 = vrcp.f32 %v1819_v17  ;;  %v1816_v40 = vpop.xlane.xlu1 %1815 }
 0x6ed   :  { %5111 = vrcp.f32 %v1816_v40 }
 0x6f6   :  { %v5110_v22 = vpop.eup %5109 }
 0x6f7   :  { %v5112_v57 = vpop.eup %5111  ;;  %v1823_v27 = vmul.f32 %v5110_v22, %v5106_v4 }
 0x6f8   :  { %v1822_v53 = vmul.f32 %v5112_v57, %v5108_v11 }
 0x6fa   :  { %4479 = vmatprep.mubr.msk.f32.mxu1 %vm354_vm6, %v1822_v53 }
 0x6fb   :  { %4480 = vmatmul.mubr.msk.f32.vlgmr.msra.gmra.mrb[16].mxu1 %vm354_vm6, %v1823_v27 }
 0x6fc   :  { %4755 = vmatpush3.bf16.msra.mxu1 %v4752_v52 }
 0x6fd   :  { %4757 = vmatprep.subr.bf16.mxu1 %v4756_v28 }
 0x700   :  { %4759 = vmatpush3.bf16.msra.mxu1 %v4756_v28 }
 0x701   :  { %4768 = vmatprep.subr.bf16.mxu1 %v5249_v7 }
 0x7ce   :  { %v4481_v41 = vpop.f32.mrb[16].mxu1 }
 0x7cf   :  { %v1908_v16 = vmin.f32 %v4481_v41, 0.0  ;;  %v1896_v14 = vpop.f32.mrb[17].mxu1  ;;  %vm1906_vm11 = vcmp.gt.f32.partialorder %v4481_v41, 0.0 }
 0x7d0   :  { %v1907_v55 = vmin.f32 %v1896_v14, 0.0  ;;  %vm1905_vm13 = vcmp.gt.f32.partialorder %v1896_v14, 0.0 }
 0x7d1   :  { %v1911_v1 = vmul.f32 1.442695, %v1908_v16 }
 0x7d2   :  { %v1909_v2 = vmul.f32 1.442695, %v1907_v55 }
 0x7d3   :  { %5113 = vpow2.f32 %v1911_v1 }
 0x7d4   :  { %5115 = vpow2.f32 %v1909_v2 }
 0x7dd   :  { %v5114_v60 = vpop.eup %5113 }
 0x7de   :  { %v5116_v9 = vpop.eup %5115  ;;  %v4115_v61 = vadd.f32 -1.0, %v5114_v60 }
 0x7df   :  { %v4114_v26 = vadd.f32 -1.0, %v5116_v9 }
 0x7e0   :  { %v1916_v59 = vsel %vm1906_vm11, %v4481_v41, %v4115_v61 }
 0x7e1   :  { %v1915_v3 = vsel %vm1905_vm13, %v1896_v14, %v4114_v26 }
 0x7e2   :  { %4490 = vmatprep.mubr.msk.f32.mxu1 %vm100_vm0, %v1915_v3  ;;  %v4769_v15 = vpack.c.bf16 %v1916_v59, %v1915_v3  ;;  %4501 = vmatprep.mubr.msk.f32.mxu0 %vm100_vm0, %v1915_v3 }
 0x7e3   :  { %4491 = vmatmul.mubr.msk.f32.vlgmr.msra.gmra.mrb[18].mxu1 %vm100_vm0, %v1916_v59  ;;  %4502 = vmatmul.mubr.msk.f32.vlgmr.msra.gmra.mrb[12].mxu0 %vm100_vm0, %v1916_v59 }
 0x7e4   :  { %4771 = vmatpush3.bf16.xpose.msk.msra.mxu1 %vm5412_vm2, %v4769_v15  ;;  %4508 = vmatprep.mubr.msk.f32.mxu1 %vm5250_vm1, %v5251_v12 }
 0x7eb   :  { %4509 = vmatmul.mubr.msk.f32.vlgmr.msra.gmra.mrb[20].mxu1 %vm100_vm0, %v1925_v62 }
 0x8b6   :  { %v4492_v51 = vpop.f32.mrb[18].mxu1  ;;  %v4503_v0 = vpop.f32.mrb[12].mxu0 }
 0x8b7   :  { %v2015_v5 = vpop.f32.mrb[19].mxu1  ;;  %2316 = vperm.xlu1 %4957, %v4503_v0   ;;  %2179 = vperm.xlu0 %4956, %v4503_v0   ;;  %v2090_v47 = vpop.f32.mrb[13].mxu0 }
 0x8b8   :  { %v4772_v6 = vpack.c.bf16 %v4492_v51, %v2015_v5  ;;  %v5962_v4 = vpack.i.bf16 %v4492_v51, %v2015_v5 }
 0x8ba   :  { %4773 = vmatprep.subr.bf16.mxu0 %v4772_v6 }
 0x8bb   :  { %4775 = vmatpush3.bf16.msra.mxu0 %v4772_v6  ;;  %4958 = vset.pattern.permute.xlu1 %v5254_v29 }
 0x8bc   :  { %4959 = vset.pattern.permute.xlu0 %v5255_v30  ;;  %2461 = vperm.xlu1 %4958, %v4503_v0  }
 0x8bd   :  { %2604 = vperm.xlu0 %4959, %v4503_v0  }
 0x8be   :  { %v5966_v13 = vpop.f32.mrb[20].mxu1 }
 0x8bf   :  { %v4510_v11 = vpop.f32.mrb[21].mxu1  ;;  %v6015_v43 = vrot.slane %v5966_v13, %v911_v58  ;;  %v6029_v58 = vrot.slane %v5966_v13, %v1054_v8  ;;  %v3039_v59 = vrot.slane %v5966_v13, %v1197_v24  ;;  %v3182_v5 = vrot.slane %v5966_v13, %v1340_v46 }
 0x8c0   :  { %4960 = vset.pattern.permute.xlu1 %v5256_v31 }
 0x8c1   :  { %4962 = vset.pattern.permute.xlu0 %v5257_v32  ;;  %2747 = vperm.xlu1 %4960, %v4503_v0  }
 0x8c2   :  { %3033 = vperm.xlu0 %4962, %v4503_v0  }
 0x8c5   :  { %4961 = vset.pattern.permute.xlu1 %v5258_v33 }
 0x8c6   :  { %4966 = vset.pattern.permute.xlu0 %v5254_v29  ;;  %2890 = vperm.xlu1 %4961, %v4503_v0   ;;  %v5985_v29 = vrot.slane %v5966_v13, %v480_v37  ;;  %v5998_v37 = vrot.slane %v5966_v13, %v768_v45 }
 0x8c7   :  { %2457 = vperm.xlu0 %4966, %v2090_v47  }
 0x8ca   :  { %4963 = vset.pattern.permute.xlu1 %v5259_v34 }
 0x8cb   :  { %4969 = vset.pattern.permute.xlu0 %v5258_v33  ;;  %3176 = vperm.xlu1 %4963, %v4503_v0  }
 0x8cc   :  { %2886 = vperm.xlu0 %4969, %v2090_v47  }
 0x8cf   :  { %4964 = vset.pattern.permute.xlu1 %v5253_v20 }
 0x8d0   :  { %2174 = vperm.xlu1 %4964, %v2090_v47   ;;  %5008 = vset.pattern.permute.xlu0 %v5253_v20 }
 0x8d4   :  { %4965 = vset.pattern.permute.xlu1 %v5252_v19  ;;  %v2185_v19 = vrot.slane %v5966_v13, %v5457_v38 }
 0x8d5   :  { %2312 = vperm.xlu1 %4965, %v2090_v47  }
 0x8d9   :  { %4967 = vset.pattern.permute.xlu1 %v5255_v30 }
 0x8da   :  { %2600 = vperm.xlu1 %4967, %v2090_v47  }
 0x8de   :  { %4968 = vset.pattern.permute.xlu1 %v5256_v31 }
 0x8df   :  { %2743 = vperm.xlu1 %4968, %v2090_v47  }
 0x8e3   :  { %4970 = vset.pattern.permute.xlu1 %v5257_v32 }
 0x8e4   :  { %3029 = vperm.xlu1 %4970, %v2090_v47  }
 0x8e8   :  { %4971 = vset.pattern.permute.xlu1 %v5259_v34 }
 0x8e9   :  { %3172 = vperm.xlu1 %4971, %v2090_v47  }
 0x8ed   :  { %5007 = vset.pattern.permute.xlu1 %v5253_v20  ;;  %v5993_v20 = vrot.slane %v5966_v13, %v625_v44 }
 0x936   :  { %v2317_v30 = vpop.permute.xlu1 %2316  ;;  %v2180_v33 = vpop.permute.xlu0 %2179 }
 0x937   :  { %v2324_v31 = vadd.f32 %v5985_v29, %v2317_v30  ;;  %v2187_v35 = vadd.f32 %v2185_v19, %v2180_v33 }
 0x939   :  { %vm2326_vm2 = vcmp.gt.f32.partialorder %v2324_v31, 0.0  ;;  %v2328_v32 = vmul.f32 0.2, %v2324_v31  ;;  %vm2189_vm14 = vcmp.gt.f32.partialorder %v2187_v35, 0.0  ;;  %v2191_v34 = vmul.f32 0.2, %v2187_v35 }
 0x93b   :  { %v2462_v21 = vpop.permute.xlu1 %2461  ;;  %v2330_v17 = vsel %vm2326_vm2, %v2324_v31, %v2328_v32  ;;  %v2193_v40 = vsel %vm2189_vm14, %v2187_v35, %v2191_v34 }
 0x93c   :  { %v2469_v22 = vadd.f32 %v5993_v20, %v2462_v21  ;;  %v2605_v57 = vpop.permute.xlu0 %2604  ;;  %v6002_v53 = vadd.f32 %v2330_v17, %v5473_v49  ;;  %v6005_v27 = vadd.f32 %v2193_v40, %v5473_v49 }
 0x93d   :  { %v2612_v44 = vadd.f32 %v5998_v37, %v2605_v57 }
 0x93e   :  { %vm2471_vm9 = vcmp.gt.f32.partialorder %v2469_v22, 0.0  ;;  %v2473_v23 = vmul.f32 0.2, %v2469_v22  ;;  %v2336_v42 = vsel %vm354_vm6, %v6002_v53, -inf  ;;  %v2199_v45 = vsel %vm354_vm6, %v6005_v27, -inf }
 0x93f   :  { %vm2614_vm10 = vcmp.gt.f32.partialorder %v2612_v44, 0.0  ;;  %v2616_v52 = vmul.f32 0.2, %v2612_v44  ;;  %2337 = vmax.xlane.f32.xlu0 %v2336_v42  ;;  %2200 = vmax.xlane.f32.xlu1 %v2199_v45 }
 0x940   :  { %v2748_v48 = vpop.permute.xlu1 %2747  ;;  %v2475_v28 = vsel %vm2471_vm9, %v2469_v22, %v2473_v23 }
 0x941   :  { %v2755_v18 = vadd.f32 %v6015_v43, %v2748_v48  ;;  %v6019_v39 = vadd.f32 %v2475_v28, %v5473_v49  ;;  %v2618_v54 = vsel %vm2614_vm10, %v2612_v44, %v2616_v52  ;;  %v3034_v26 = vpop.permute.xlu0 %3033 }
 0x942   :  { %v6024_v25 = vadd.f32 %v2618_v54, %v5473_v49  ;;  %v3041_v51 = vadd.f32 %v3039_v59, %v3034_v26 }
 0x943   :  { %vm2757_vm11 = vcmp.gt.f32.partialorder %v2755_v18, 0.0  ;;  %v2759_v50 = vmul.f32 0.2, %v2755_v18  ;;  %v2481_v10 = vsel %vm354_vm6, %v6019_v39, -inf }
 0x944   :  { %2482 = vmax.xlane.f32.xlu0 %v2481_v10  ;;  %v2624_v55 = vsel %vm354_vm6, %v6024_v25, -inf  ;;  %v3045_v6 = vmul.f32 0.2, %v3041_v51  ;;  %vm3043_vm14 = vcmp.gt.f32.partialorder %v3041_v51, 0.0 }
 0x945   :  { %v2891_v41 = vpop.permute.xlu1 %2890  ;;  %v2761_v16 = vsel %vm2757_vm11, %v2755_v18, %v2759_v50 }
 0x946   :  { %v2898_v14 = vadd.f32 %v6029_v58, %v2891_v41  ;;  %v6035_v1 = vadd.f32 %v2761_v16, %v5473_v49  ;;  %v3047_v31 = vsel %vm3043_vm14, %v3041_v51, %v3045_v6  ;;  %v2458_v22 = vpop.permute.xlu0 %2457 }
 0x947   :  { %v6066_v32 = vadd.f32 %v3047_v31, %v5473_v49  ;;  %v2468_v44 = vadd.f32 %v5993_v20, %v2458_v22 }
 0x948   :  { %vm2900_vm13 = vcmp.gt.f32.partialorder %v2898_v14, 0.0  ;;  %v2902_v2 = vmul.f32 0.2, %v2898_v14  ;;  %2625 = vmax.xlane.f32.xlu0 %v2624_v55  ;;  %v2767_v61 = vsel %vm354_vm6, %v6035_v1, -inf }
 0x949   :  { %v3053_v21 = vsel %vm354_vm6, %v6066_v32, -inf  ;;  %v2472_v23 = vmul.f32 0.2, %v2468_v44  ;;  %vm2470_vm11 = vcmp.gt.f32.partialorder %v2468_v44, 0.0 }
 0x94a   :  { %v3177_v60 = vpop.permute.xlu1 %3176  ;;  %v2904_v9 = vsel %vm2900_vm13, %v2898_v14, %v2902_v2 }
 0x94b   :  { %v6040_v8 = vadd.f32 %v2904_v9, %v5473_v49  ;;  %v3184_v11 = vadd.f32 %v3182_v5, %v3177_v60  ;;  %v2474_v28 = vsel %vm2470_vm11, %v2468_v44, %v2472_v23  ;;  %v2887_v18 = vpop.permute.xlu0 %2886 }
 0x94c   :  { %2768 = vmax.xlane.f32.xlu0 %v2767_v61  ;;  %v6079_v50 = vadd.f32 %v2474_v28, %v5541_v56  ;;  %v2897_v10 = vadd.f32 %v6029_v58, %v2887_v18 }
 0x94d   :  { %v2910_v15 = vsel %vm354_vm6, %v6040_v8, -inf  ;;  %v3188_v46 = vmul.f32 0.2, %v3184_v11  ;;  %vm3186_vm10 = vcmp.gt.f32.partialorder %v3184_v11, 0.0 }
 0x94e   :  { %v2478_v20 = vsel %vm354_vm6, %v6079_v50, -inf  ;;  %v2901_v14 = vmul.f32 0.2, %v2897_v10  ;;  %vm2899_vm14 = vcmp.gt.f32.partialorder %v2897_v10, 0.0 }
 0x94f   :  { %v2175_v3 = vpop.permute.xlu1 %2174  ;;  %v3190_v34 = vsel %vm3186_vm10, %v3184_v11, %v3188_v46 }
 0x950   :  { %v2186_v62 = vadd.f32 %v2185_v19, %v2175_v3  ;;  %2911 = vmax.xlane.f32.xlu0 %v2910_v15  ;;  %4973 = vrot.lane.b32.xlu1 %v5962_v4, %s5261_s22  ;;  %v6071_v17 = vadd.f32 %v3190_v34, %v5473_v49  ;;  %v2903_v26 = vsel %vm2899_vm14, %v2897_v10, %v2901_v14 }
 0x951   :  { %v6099_v3 = vadd.f32 %v2903_v26, %v5541_v56 }
 0x952   :  { %vm2188_vm2 = vcmp.gt.f32.partialorder %v2186_v62, 0.0  ;;  %v2190_v0 = vmul.f32 0.2, %v2186_v62  ;;  %v3196_v40 = vsel %vm354_vm6, %v6071_v17, -inf }
 0x953   :  { %v2907_v51 = vsel %vm354_vm6, %v6099_v3, -inf }
 0x954   :  { %4983 = vrot.lane.b32.xlu1 %v5962_v4, %s5262_s24  ;;  %v2313_v24 = vpop.permute.xlu1 %2312  ;;  %v2192_v47 = vsel %vm2188_vm2, %v2186_v62, %v2190_v0  ;;  %s6547_s24 = smov 8  }
 0x955   :  { %v2323_v19 = vadd.f32 %v5985_v29, %v2313_v24  ;;  %v6056_v30 = vadd.f32 %v2192_v47, %v5541_v56 }
 0x957   :  { %vm2325_vm9 = vcmp.gt.f32.partialorder %v2323_v19, 0.0  ;;  %v2327_v33 = vmul.f32 0.2, %v2323_v19  ;;  %v2196_v36 = vsel %vm354_vm6, %v6056_v30, -inf }
 0x958   :  { %2197 = vmax.xlane.f32.xlu0 %v2196_v36 }
 0x959   :  { %v2329_v13 = vsel %vm2325_vm9, %v2323_v19, %v2327_v33  ;;  %v2601_v57 = vpop.permute.xlu1 %2600 }
 0x95a   :  { %v6061_v35 = vadd.f32 %v2329_v13, %v5541_v56  ;;  %v2611_v42 = vadd.f32 %v5998_v37, %v2601_v57 }
 0x95c   :  { %v2333_v29 = vsel %vm354_vm6, %v6061_v35, -inf  ;;  %v2615_v52 = vmul.f32 0.2, %v2611_v42  ;;  %vm2613_vm13 = vcmp.gt.f32.partialorder %v2611_v42, 0.0 }
 0x95d   :  { %2334 = vmax.xlane.f32.xlu0 %v2333_v29 }
 0x95e   :  { %v2744_v45 = vpop.permute.xlu1 %2743  ;;  %v2617_v16 = vsel %vm2613_vm13, %v2611_v42, %v2615_v52 }
 0x95f   :  { %v2754_v48 = vadd.f32 %v6015_v43, %v2744_v45  ;;  %v6085_v37 = vadd.f32 %v2617_v16, %v5541_v56 }
 0x961   :  { %3054 = vmax.xlane.f32.xlu0 %v3053_v21  ;;  %v2758_v41 = vmul.f32 0.2, %v2754_v48  ;;  %vm2756_vm2 = vcmp.gt.f32.partialorder %v2754_v48, 0.0  ;;  %v2621_v58 = vsel %vm354_vm6, %v6085_v37, -inf }
 0x963   :  { %v3030_v54 = vpop.permute.xlu1 %3029  ;;  %v2760_v55 = vsel %vm2756_vm2, %v2754_v48, %v2758_v41 }
 0x964   :  { %v3040_v43 = vadd.f32 %v3039_v59, %v3030_v54  ;;  %v6092_v60 = vadd.f32 %v2760_v55, %v5541_v56 }
 0x965   :  { %3197 = vmax.xlane.f32.xlu0 %v3196_v40 }
 0x966   :  { %v3044_v9 = vmul.f32 0.2, %v3040_v43  ;;  %vm3042_vm9 = vcmp.gt.f32.partialorder %v3040_v43, 0.0  ;;  %v2764_v59 = vsel %vm354_vm6, %v6092_v60, -inf }
 0x968   :  { %v3173_v2 = vpop.permute.xlu1 %3172  ;;  %v3046_v62 = vsel %vm3042_vm9, %v3040_v43, %v3044_v9 }
 0x969   :  { %v3183_v61 = vadd.f32 %v3182_v5, %v3173_v2  ;;  %v6104_v0 = vadd.f32 %v3046_v62, %v5541_v56 }
 0x96b   :  { %v3187_v15 = vmul.f32 0.2, %v3183_v61  ;;  %vm3185_vm10 = vcmp.gt.f32.partialorder %v3183_v61, 0.0  ;;  %v3050_v24 = vsel %vm354_vm6, %v6104_v0, -inf }
 0x96d   :  { %v3189_v5 = vsel %vm3185_vm10, %v3183_v61, %v3187_v15 }
 0x96e   :  { %v6109_v47 = vadd.f32 %v3189_v5, %v5541_v56 }
 0x970   :  { %v3193_v6 = vsel %vm354_vm6, %v6109_v47, -inf }
 0x978   :  { %2479 = vmax.xlane.f32.xlu1 %v2478_v20 }
 0x97b   :  { %4978 = vrot.lane.b32.xlu0 %v5962_v4, %s5263_s23 }
 0x97c   :  { %2622 = vmax.xlane.f32.xlu1 %v2621_v58 }
 0x97f   :  { %4993 = vrot.lane.b32.xlu0 %v5962_v4, %s5264_s2 }
 0x980   :  { %2765 = vmax.xlane.f32.xlu1 %v2764_v59 }
 0x984   :  { %2908 = vmax.xlane.f32.xlu1 %v2907_v51 }
 0x988   :  { %3051 = vmax.xlane.f32.xlu1 %v3050_v24 }
 0x98c   :  { %3194 = vmax.xlane.f32.xlu1 %v3193_v6 }
 0x99d   :  { %4988 = vrot.lane.b32.xlu1 %v5962_v4, %s5265_s25 }
 0x9cc   :  { %v2338_v11 = vpop.xlane.xlu0 %2337  ;;  %v2201_v19 = vpop.xlane.xlu1 %2200 }
 0x9cd   :  { %v2340_v33 = vsub.f32 %v6002_v53, %v2338_v11  ;;  %v2203_v36 = vsub.f32 %v6005_v27, %v2201_v19 }
 0x9cf   :  { %v2206_v46 = vmul.f32 1.442695, %v2203_v36  ;;  %v2343_v13 = vmul.f32 1.442695, %v2340_v33 }
 0x9d0   :  { %v4974_v31 = vpop.permute.xlu1 %4973 }
 0x9d1   :  { %v4976_v29 = vunpack.i.h.bf16 %v4974_v31  ;;  %v4975_v34 = vunpack.i.l.bf16 %v4974_v31  ;;  %v2483_v21 = vpop.xlane.xlu0 %2482  ;;  %5117 = vpow2.f32 %v2206_v46 }
 0x9d2   :  { %v2485_v40 = vsub.f32 %v6019_v39, %v2483_v21  ;;  %5119 = vpow2.f32 %v2343_v13 }
 0x9d3   :  { %v6118_v22 = vpack.c.bf16 %v4976_v29, %v4975_v34 }
 0x9d4   :  { %v2488_v57 = vmul.f32 1.442695, %v2485_v40  ;;  %v6166_v31 = vpop.permute.xlu1 %4983 }
 0x9d5   :  { %v2626_v44 = vpop.xlane.xlu0 %2625  ;;  %4777 = vmatprep.subr.bf16.mxu0 %v6118_v22 }
 0x9d6   :  { %v2628_v53 = vsub.f32 %v6024_v25, %v2626_v44  ;;  %5121 = vpow2.f32 %v2488_v57 }
 0x9d8   :  { %v2631_v27 = vmul.f32 1.442695, %v2628_v53 }
 0x9d9   :  { %v2769_v23 = vpop.xlane.xlu0 %2768 }
 0x9da   :  { %v2771_v42 = vsub.f32 %v6035_v1, %v2769_v23  ;;  %5123 = vpow2.f32 %v2631_v27 }
 0x9db   :  { %v6123_v45 = vpop.eup %5117 }
 0x9dc   :  { %v2774_v52 = vmul.f32 1.442695, %v2771_v42  ;;  %v2211_v39 = vsel %vm354_vm6, %v6123_v45, 0.0  ;;  %v6127_v28 = vpop.eup %5119 }
 0x9dd   :  { %v2912_v48 = vpop.xlane.xlu0 %2911  ;;  %2212 = vadd.xlane.f32.xlu0 %v2211_v39  ;;  %v2348_v54 = vsel %vm354_vm6, %v6127_v28, 0.0 }
 0x9de   :  { %v2914_v18 = vsub.f32 %v6040_v8, %v2912_v48  ;;  %5125 = vpow2.f32 %v2774_v52 }
 0x9e0   :  { %v2917_v25 = vmul.f32 1.442695, %v2914_v18  ;;  %v6132_v10 = vpop.eup %5121 }
 0x9e1   :  { %2349 = vadd.xlane.f32.xlu0 %v2348_v54  ;;  %v2493_v41 = vsel %vm354_vm6, %v6132_v10, 0.0 }
 0x9e2   :  { %5127 = vpow2.f32 %v2917_v25 }
 0x9e4   :  { %v6136_v16 = vpop.eup %5123 }
 0x9e5   :  { %v2198_v1 = vpop.xlane.xlu0 %2197  ;;  %2494 = vadd.xlane.f32.xlu0 %v2493_v41  ;;  %v2636_v14 = vsel %vm354_vm6, %v6136_v16, 0.0 }
 0x9e6   :  { %v2202_v20 = vsub.f32 %v6056_v30, %v2198_v1 }
 0x9e8   :  { %v2204_v8 = vmul.f32 1.442695, %v2202_v20  ;;  %v6141_v43 = vpop.eup %5125 }
 0x9e9   :  { %2637 = vadd.xlane.f32.xlu0 %v2636_v14  ;;  %v2779_v9 = vsel %vm354_vm6, %v6141_v43, 0.0 }
 0x9ea   :  { %5129 = vpow2.f32 %v2204_v8  ;;  %v2335_v55 = vpop.xlane.xlu0 %2334 }
 0x9eb   :  { %v2339_v2 = vsub.f32 %v6061_v35, %v2335_v55 }
 0x9ec   :  { %v6146_v61 = vpop.eup %5127 }
 0x9ed   :  { %v2341_v58 = vmul.f32 1.442695, %v2339_v2  ;;  %2780 = vadd.xlane.f32.xlu0 %v2779_v9  ;;  %v2922_v15 = vsel %vm354_vm6, %v6146_v61, 0.0 }
 0x9ee   :  { %v3055_v30 = vpop.xlane.xlu0 %3054 }
 0x9ef   :  { %5131 = vpow2.f32 %v2341_v58  ;;  %v3057_v26 = vsub.f32 %v6066_v32, %v3055_v30 }
 0x9f1   :  { %v3060_v59 = vmul.f32 1.442695, %v3057_v26  ;;  %2923 = vadd.xlane.f32.xlu0 %v2922_v15 }
 0x9f2   :  { %v3198_v62 = vpop.xlane.xlu0 %3197 }
 0x9f3   :  { %5133 = vpow2.f32 %v3060_v59  ;;  %v3200_v35 = vsub.f32 %v6071_v17, %v3198_v62 }
 0x9f4   :  { %v6152_v51 = vpop.eup %5129 }
 0x9f5   :  { %v3203_v5 = vmul.f32 1.442695, %v3200_v35  ;;  %v2208_v24 = vsel %vm354_vm6, %v6152_v51, 0.0 }
 0x9f6   :  { %v4979_v6 = vpop.permute.xlu0 %4978  ;;  %2209 = vadd.xlane.f32.xlu1 %v2208_v24 }
 0x9f7   :  { %5135 = vpow2.f32 %v3203_v5  ;;  %v4981_v11 = vunpack.i.h.bf16 %v4979_v6  ;;  %v4980_v32 = vunpack.i.l.bf16 %v4979_v6 }
 0x9f9   :  { %v6156_v19 = vpop.eup %5131  ;;  %v4780_v33 = vpack.c.bf16 %v4981_v11, %v4980_v32 }
 0x9fa   :  { %v2345_v36 = vsel %vm354_vm6, %v6156_v19, 0.0  ;;  %v4994_v62 = vpop.permute.xlu0 %4993 }
 0x9fb   :  { %4781 = vmatprep.subr.bf16.mxu1 %v4780_v33  ;;  %2346 = vadd.xlane.f32.xlu1 %v2345_v36  ;;  %v4986_v36 = vunpack.i.h.bf16 %v6166_v31 }
 0x9fc   :  { %4783 = vmatpush3.bf16.msra.mxu1 %v4780_v33 }
 0x9fd   :  { %v6160_v17 = vpop.eup %5133 }
 0x9fe   :  { %v3065_v46 = vsel %vm354_vm6, %v6160_v17, 0.0 }
 0x9ff   :  { %3066 = vadd.xlane.f32.xlu0 %v3065_v46  ;;  %v4985_v46 = vunpack.i.l.bf16 %v6166_v31 }
 0xa01   :  { %v6164_v13 = vpop.eup %5135 }
 0xa02   :  { %v3208_v29 = vsel %vm354_vm6, %v6164_v13, 0.0 }
 0xa03   :  { %3209 = vadd.xlane.f32.xlu0 %v3208_v29 }
 0xa05   :  { %v2480_v34 = vpop.xlane.xlu1 %2479 }
 0xa06   :  { %v2484_v21 = vsub.f32 %v6079_v50, %v2480_v34 }
 0xa08   :  { %v2486_v40 = vmul.f32 1.442695, %v2484_v21  ;;  %v4784_v21 = vpack.c.bf16 %v4986_v36, %v4985_v46 }
 0xa09   :  { %v2623_v57 = vpop.xlane.xlu1 %2622 }
 0xa0a   :  { %5137 = vpow2.f32 %v2486_v40  ;;  %v2627_v44 = vsub.f32 %v6085_v37, %v2623_v57  ;;  %v4996_v57 = vunpack.i.h.bf16 %v4994_v62 }
 0xa0c   :  { %v2629_v53 = vmul.f32 1.442695, %v2627_v44  ;;  %v4995_v44 = vunpack.i.l.bf16 %v4994_v62 }
 0xa0d   :  { %v2766_v27 = vpop.xlane.xlu1 %2765 }
 0xa0e   :  { %5139 = vpow2.f32 %v2629_v53  ;;  %v2770_v23 = vsub.f32 %v6092_v60, %v2766_v27 }
 0xa10   :  { %v2772_v42 = vmul.f32 1.442695, %v2770_v23 }
 0xa11   :  { %v2909_v52 = vpop.xlane.xlu1 %2908 }
 0xa12   :  { %5141 = vpow2.f32 %v2772_v42  ;;  %v2913_v48 = vsub.f32 %v6099_v3, %v2909_v52 }
 0xa14   :  { %v6174_v39 = vpop.eup %5137  ;;  %v2915_v18 = vmul.f32 1.442695, %v2913_v48 }
 0xa15   :  { %v3052_v25 = vpop.xlane.xlu1 %3051  ;;  %v2490_v50 = vsel %vm354_vm6, %v6174_v39, 0.0 }
 0xa16   :  { %5143 = vpow2.f32 %v2915_v18  ;;  %v3056_v37 = vsub.f32 %v6104_v0, %v3052_v25  ;;  %2491 = vadd.xlane.f32.xlu1 %v2490_v50 }
 0xa18   :  { %v6179_v54 = vpop.eup %5139  ;;  %v3058_v1 = vmul.f32 1.442695, %v3056_v37 }
 0xa19   :  { %5003 = vrot.lane.b32.xlu0 %v5962_v4, %s5266_s3  ;;  %v3195_v60 = vpop.xlane.xlu1 %3194  ;;  %v2633_v3 = vsel %vm354_vm6, %v6179_v54, 0.0 }
 0xa1a   :  { %5145 = vpow2.f32 %v3058_v1  ;;  %v3199_v41 = vsub.f32 %v6109_v47, %v3195_v60  ;;  %2634 = vadd.xlane.f32.xlu1 %v2633_v3 }
 0xa1c   :  { %v6186_v20 = vpop.eup %5141  ;;  %v3201_v8 = vmul.f32 1.442695, %v3199_v41 }
 0xa1d   :  { %v4989_v14 = vpop.permute.xlu1 %4988  ;;  %v2776_v0 = vsel %vm354_vm6, %v6186_v20, 0.0 }
 0xa1e   :  { %5147 = vpow2.f32 %v3201_v8  ;;  %v4991_v55 = vunpack.i.h.bf16 %v4989_v14  ;;  %v4990_v2 = vunpack.i.l.bf16 %v4989_v14  ;;  %2777 = vadd.xlane.f32.xlu1 %v2776_v0 }
 0xa20   :  { %v6190_v58 = vpop.eup %5143  ;;  %v6192_v9 = vpack.c.bf16 %v4991_v55, %v4990_v2 }
 0xa21   :  { %v2919_v30 = vsel %vm354_vm6, %v6190_v58, 0.0 }
 0xa22   :  { %2920 = vadd.xlane.f32.xlu1 %v2919_v30  ;;  %4789 = vmatprep.subr.bf16.mxu1 %v6192_v9 }
 0xa24   :  { %v6197_v47 = vpop.eup %5145 }
 0xa25   :  { %v3062_v26 = vsel %vm354_vm6, %v6197_v47, 0.0 }
 0xa26   :  { %3063 = vadd.xlane.f32.xlu1 %v3062_v26 }
 0xa28   :  { %v6201_v59 = vpop.eup %5147 }
 0xa29   :  { %v3205_v15 = vsel %vm354_vm6, %v6201_v59, 0.0 }
 0xa2a   :  { %3206 = vadd.xlane.f32.xlu1 %v3205_v15 }
 0xa3b   :  { %4998 = vrot.lane.b32.xlu1 %v5962_v4, %s5267_s26 }
 0xa6a   :  { %v2213_v35 = vpop.xlane.xlu0 %2212 }
 0xa6b   :  { %5149 = vrcp.f32 %v2213_v35 }
 0xa6e   :  { %v2350_v24 = vpop.xlane.xlu0 %2349 }
 0xa72   :  { %v2495_v32 = vpop.xlane.xlu0 %2494 }
 0xa75   :  { %v5150_v11 = vpop.eup %5149 }
 0xa76   :  { %v2217_v4 = vmul.f32 %v5150_v11, %v6123_v45  ;;  %v2638_v53 = vpop.xlane.xlu0 %2637  ;;  %v4792_v45 = vpack.c.bf16 %v4996_v57, %v4995_v44 }
 0xa83   :  { %v2210_v5 = vpop.xlane.xlu1 %2209 }
 0xa84   :  { %5151 = vrcp.f32 %v2210_v5 }
 0xa85   :  { %5153 = vrcp.f32 %v2350_v24 }
 0xa88   :  { %v2347_v6 = vpop.xlane.xlu1 %2346 }
 0xa89   :  { %5155 = vrcp.f32 %v2347_v6 }
 0xa8a   :  { %5157 = vrcp.f32 %v2495_v32 }
 0xa8e   :  { %v5152_v33 = vpop.eup %5151 }
 0xa8f   :  { %v2216_v29 = vmul.f32 %v5152_v33, %v6152_v51  ;;  %v5154_v34 = vpop.eup %5153  ;;  %v2781_v51 = vpop.xlane.xlu0 %2780 }
 0xa90   :  { %v2354_v31 = vmul.f32 %v5154_v34, %v6127_v28 }
 0xa91   :  { %4515 = vmatprep.mubr.msk.f32.mxu0 %vm354_vm6, %v2216_v29 }
 0xa92   :  { %4516 = vmatmul.mubr.msk.f32.vlgmr.msra.gmra.mrb[14].mxu0 %vm354_vm6, %v2217_v4 }
 0xa93   :  { %v5156_v40 = vpop.eup %5155  ;;  %4779 = vmatpush3.bf16.msra.mxu0 %v6118_v22  ;;  %v2924_v23 = vpop.xlane.xlu0 %2923 }
 0xa94   :  { %4785 = vmatprep.subr.bf16.mxu0 %v4784_v21  ;;  %v2353_v27 = vmul.f32 %v5156_v40, %v6156_v19  ;;  %v5158_v28 = vpop.eup %5157 }
 0xa95   :  { %v2499_v1 = vmul.f32 %v5158_v28, %v6132_v10 }
 0xa96   :  { %4522 = vmatprep.mubr.msk.f32.mxu0 %vm354_vm6, %v2353_v27 }
 0xa97   :  { %4523 = vmatmul.mubr.msk.f32.vlgmr.msra.gmra.mrb[16].mxu0 %vm354_vm6, %v2354_v31  ;;  %v3067_v42 = vpop.xlane.xlu0 %3066 }
 0xa98   :  { %4787 = vmatpush3.bf16.msra.mxu0 %v4784_v21 }
 0xa99   :  { %4793 = vmatprep.subr.bf16.mxu0 %v4792_v45 }
 0xa9b   :  { %v3210_v48 = vpop.xlane.xlu0 %3209 }
 0xa9f   :  { %v5004_v25 = vpop.permute.xlu0 %5003 }
 0xaa0   :  { %v5006_v41 = vunpack.i.h.bf16 %v5004_v25  ;;  %v5005_v8 = vunpack.i.l.bf16 %v5004_v25 }
 0xaa2   :  { %v4800_v2 = vpack.c.bf16 %v5006_v41, %v5005_v8 }
 0xaa3   :  { %v2492_v52 = vpop.xlane.xlu1 %2491 }
 0xaa4   :  { %5159 = vrcp.f32 %v2492_v52 }
 0xaa5   :  { %5161 = vrcp.f32 %v2638_v53 }
 0xaa7   :  { %v2635_v22 = vpop.xlane.xlu1 %2634 }
 0xaa8   :  { %5163 = vrcp.f32 %v2635_v22 }
 0xaa9   :  { %5165 = vrcp.f32 %v2781_v51 }
 0xaab   :  { %v2778_v19 = vpop.xlane.xlu1 %2777 }
 0xaac   :  { %5167 = vrcp.f32 %v2778_v19 }
 0xaad   :  { %5169 = vrcp.f32 %v2924_v23 }
 0xaae   :  { %v5160_v18 = vpop.eup %5159 }
 0xaaf   :  { %v2921_v50 = vpop.xlane.xlu1 %2920  ;;  %v2498_v37 = vmul.f32 %v5160_v18, %v6174_v39  ;;  %v5162_v60 = vpop.eup %5161 }
 0xab0   :  { %5171 = vrcp.f32 %v2921_v50  ;;  %v2642_v55 = vmul.f32 %v5162_v60, %v6136_v16 }
 0xab1   :  { %4529 = vmatprep.mubr.msk.f32.mxu1 %vm354_vm6, %v2498_v37  ;;  %v1926_v37 = vld [vmem:[%s6506_s11] sm:$0xff] }
 0xab2   :  { %v5164_v3 = vpop.eup %5163  ;;  %4530 = vmatmul.mubr.msk.f32.vlgmr.msra.gmra.mrb[22].mxu1 %vm354_vm6, %v2499_v1  ;;  %v1927_v1 = vld [vmem:[%s6506_s11 + $0x8] sm:$0xff] }
 0xab3   :  { %4791 = vmatpush3.bf16.msra.mxu1 %v6192_v9  ;;  %v3064_v14 = vpop.xlane.xlu1 %3063  ;;  %v2641_v0 = vmul.f32 %v5164_v3, %v6179_v54  ;;  %v5166_v39 = vpop.eup %5165  ;;  %v4804_v8 = vpack.c.bf16 %v1927_v1, %v1926_v37  ;;  %v1933_v37 = vld [vmem:[%s6506_s11 + $0x38] sm:$0xff] }
 0xab4   :  { %5173 = vrcp.f32 %v3064_v14  ;;  %v2785_v9 = vmul.f32 %v5166_v39, %v6141_v43 }
 0xab5   :  { %5175 = vrcp.f32 %v3067_v42  ;;  %4536 = vmatprep.mubr.msk.f32.mxu0 %vm354_vm6, %v2641_v0 }
 0xab6   :  { %v5168_v10 = vpop.eup %5167  ;;  %4537 = vmatmul.mubr.msk.f32.vlgmr.msra.gmra.mrb[18].mxu0 %vm354_vm6, %v2642_v55  ;;  %5177 = vrcp.f32 %v3210_v48 }
 0xab7   :  { %4795 = vmatpush3.bf16.msra.mxu0 %v4792_v45  ;;  %v3207_v30 = vpop.xlane.xlu1 %3206  ;;  %v2784_v26 = vmul.f32 %v5168_v10, %v6186_v20  ;;  %v5170_v54 = vpop.eup %5169 }
 0xab8   :  { %5179 = vrcp.f32 %v3207_v30  ;;  %4801 = vmatprep.subr.bf16.mxu0 %v4800_v2  ;;  %v2928_v35 = vmul.f32 %v5170_v54, %v6146_v61  ;;  %v1928_v30 = vld [vmem:[%s6506_s11 + $0x10] sm:$0xff] }
 0xab9   :  { %4543 = vmatprep.mubr.msk.f32.mxu1 %vm354_vm6, %v2784_v26  ;;  %v1929_v26 = vld [vmem:[%s6506_s11 + $0x18] sm:$0xff] }
 0xaba   :  { %v5172_v16 = vpop.eup %5171  ;;  %4544 = vmatmul.mubr.msk.f32.vlgmr.msra.gmra.mrb[24].mxu1 %vm354_vm6, %v2785_v9 }
 0xabb   :  { %v4999_v15 = vpop.permute.xlu1 %4998  ;;  %v2927_v62 = vmul.f32 %v5172_v16, %v6190_v58  ;;  %v4808_v16 = vpack.c.bf16 %v1929_v26, %v1928_v30 }
 0xabc   :  { %v5001_v5 = vunpack.i.h.bf16 %v4999_v15  ;;  %v5000_v24 = vunpack.i.l.bf16 %v4999_v15  ;;  %v1934_v15 = vld [vmem:[%s6507_s12] sm:$0xff] }
 0xabd   :  { %4550 = vmatprep.mubr.msk.f32.mxu0 %vm354_vm6, %v2927_v62  ;;  %v1935_v62 = vld [vmem:[%s6507_s12 + $0x8] sm:$0xff] }
 0xabe   :  { %v5174_v20 = vpop.eup %5173  ;;  %v4796_v6 = vpack.c.bf16 %v5001_v5, %v5000_v24  ;;  %4551 = vmatmul.mubr.msk.f32.vlgmr.msra.gmra.mrb[20].mxu0 %vm354_vm6, %v2928_v35 }
 0xabf   :  { %v5176_v43 = vpop.eup %5175  ;;  %4803 = vmatpush3.bf16.msra.mxu0 %v4800_v2  ;;  %v3070_v11 = vmul.f32 %v5174_v20, %v6197_v47  ;;  %v4820_v20 = vpack.c.bf16 %v1935_v62, %v1934_v15 }
 0xac0   :  { %4797 = vmatprep.subr.bf16.mxu1 %v4796_v6  ;;  %v5178_v32 = vpop.eup %5177  ;;  %v3071_v61 = vmul.f32 %v5176_v43, %v6160_v17 }
 0xac1   :  { %4799 = vmatpush3.bf16.msra.mxu1 %v4796_v6  ;;  %4557 = vmatprep.mubr.msk.f32.mxu1 %vm354_vm6, %v3070_v11  ;;  %v3214_v36 = vmul.f32 %v5178_v32, %v6164_v13 }
 0xac2   :  { %v5180_v58 = vpop.eup %5179  ;;  %4805 = vmatprep.subr.bf16.mxu1 %v4804_v8  ;;  %4821 = vmatprep.subr.bf16.mxu0 %v4820_v20 }
 0xac3   :  { %v3213_v33 = vmul.f32 %v5180_v58, %v6201_v59  ;;  %v1930_v58 = vld [vmem:[%s6506_s11 + $0x20] sm:$0xff] }
 0xac4   :  { %4558 = vmatmul.mubr.msk.f32.vlgmr.msra.gmra.mrb[26].mxu1 %vm354_vm6, %v3071_v61  ;;  %v1931_v61 = vld [vmem:[%s6506_s11 + $0x28] sm:$0xff] }
 0xac5   :  { %4564 = vmatprep.mubr.msk.f32.mxu0 %vm354_vm6, %v3213_v33  ;;  %4807 = vmatpush3.bf16.msra.mxu1 %v4804_v8 }
 0xac6   :  { %4565 = vmatmul.mubr.msk.f32.vlgmr.msra.gmra.mrb[22].mxu0 %vm354_vm6, %v3214_v36  ;;  %4809 = vmatprep.subr.bf16.mxu1 %v4808_v16 }
 0xac7   :  { %4823 = vmatpush3.bf16.msra.mxu0 %v4820_v20 }
 0xac9   :  { %4811 = vmatpush3.bf16.msra.mxu1 %v4808_v16 }
 0xb65   :  { %v6243_v46 = vpop.f32.mrb[14].mxu0 }
 0xb66   :  { %v6245_v47 = vpop.f32.mrb[15].mxu0 }
 0xb6a   :  { %v6247_v29 = vpop.f32.mrb[16].mxu0 }
 0xb6b   :  { %v6249_v4 = vpop.f32.mrb[17].mxu0  ;;  %v2447_v17 = vmin.f32 %v6247_v29, 0.0  ;;  %vm2445_vm2 = vcmp.gt.f32.partialorder %v6247_v29, 0.0 }
 0xb6c   :  { %v2446_v59 = vmin.f32 %v6249_v4, 0.0  ;;  %vm2444_vm14 = vcmp.gt.f32.partialorder %v6249_v4, 0.0 }
 0xb6d   :  { %v2450_v34 = vmul.f32 1.442695, %v2447_v17  ;;  %v4812_v17 = vpack.c.bf16 %v1931_v61, %v1930_v58  ;;  %v2301_v61 = vmin.f32 %v6245_v47, 0.0 }
 0xb6e   :  { %v2448_v13 = vmul.f32 1.442695, %v2446_v59  ;;  %v1936_v59 = vld [vmem:[%s6507_s12 + $0x10] sm:$0xff] }
 0xb6f   :  { %5181 = vpow2.f32 %v2450_v34  ;;  %v1937_v34 = vld [vmem:[%s6507_s12 + $0x18] sm:$0xff]  ;;  %4813 = vmatprep.subr.bf16.mxu1 %v4812_v17 }
 0xb70   :  { %5183 = vpow2.f32 %v2448_v13  ;;  %4815 = vmatpush3.bf16.msra.mxu1 %v4812_v17 }
 0xb79   :  { %v5182_v60 = vpop.eup %5181 }
 0xb7a   :  { %v5184_v14 = vpop.eup %5183  ;;  %v4130_v10 = vadd.f32 -1.0, %v5182_v60 }
 0xb7b   :  { %v4129_v6 = vadd.f32 -1.0, %v5184_v14 }
 0xb85   :  { %v4531_v21 = vpop.f32.mrb[22].mxu1 }
 0xb86   :  { %v2590_v40 = vmin.f32 %v4531_v21, 0.0  ;;  %v2578_v57 = vpop.f32.mrb[23].mxu1  ;;  %vm2588_vm11 = vcmp.gt.f32.partialorder %v4531_v21, 0.0 }
 0xb87   :  { %v2589_v44 = vmin.f32 %v2578_v57, 0.0  ;;  %vm2587_vm13 = vcmp.gt.f32.partialorder %v2578_v57, 0.0 }
 0xb88   :  { %v2593_v53 = vmul.f32 1.442695, %v2590_v40 }
 0xb89   :  { %v2591_v27 = vmul.f32 1.442695, %v2589_v44  ;;  %v6253_v31 = vpop.f32.mrb[18].mxu0 }
 0xb8a   :  { %5185 = vpow2.f32 %v2593_v53  ;;  %v2733_v45 = vmin.f32 %v6253_v31, 0.0  ;;  %v6256_v51 = vpop.f32.mrb[19].mxu0 }
 0xb8b   :  { %5187 = vpow2.f32 %v2591_v27  ;;  %v2732_v23 = vmin.f32 %v6256_v51, 0.0 }
 0xb8c   :  { %v2736_v42 = vmul.f32 1.442695, %v2733_v45  ;;  %v2455_v45 = vsel %vm2445_vm2, %v6247_v29, %v4130_v10  ;;  %v1932_v29 = vld [vmem:[%s6506_s11 + $0x30] sm:$0xff]  ;;  %v1941_v10 = vld [vmem:[%s6507_s12 + $0x38] sm:$0xff] }
 0xb8d   :  { %v2734_v52 = vmul.f32 1.442695, %v2732_v23  ;;  %v6259_v22 = vpop.f32.mrb[24].mxu1  ;;  %v4816_v60 = vpack.c.bf16 %v1933_v37, %v1932_v29 }
 0xb8e   :  { %v2876_v48 = vmin.f32 %v6259_v22, 0.0  ;;  %v6262_v19 = vpop.f32.mrb[25].mxu1  ;;  %5189 = vpow2.f32 %v2736_v42  ;;  %vm2874_vm9 = vcmp.gt.f32.partialorder %v6259_v22, 0.0 }
 0xb8f   :  { %v2875_v28 = vmin.f32 %v6262_v19, 0.0  ;;  %5191 = vpow2.f32 %v2734_v52  ;;  %v2454_v52 = vsel %vm2444_vm14, %v6249_v4, %v4129_v6  ;;  %v1938_v4 = vld [vmem:[%s6507_s12 + $0x20] sm:$0xff]  ;;  %vm2873_vm10 = vcmp.gt.f32.partialorder %v6262_v19, 0.0  ;;  %4817 = vmatprep.subr.bf16.mxu1 %v4816_v60 }
 0xb90   :  { %v2879_v18 = vmul.f32 1.442695, %v2876_v48  ;;  %v4824_v48 = vpack.c.bf16 %v1937_v34, %v1936_v59  ;;  %4819 = vmatpush3.bf16.msra.mxu1 %v4816_v60 }
 0xb91   :  { %v2877_v25 = vmul.f32 1.442695, %v2875_v28  ;;  %v6265_v50 = vpop.f32.mrb[20].mxu0  ;;  %4836 = vmatprep.subr.bf16.mxu1 %v5249_v7 }
 0xb92   :  { %5193 = vpow2.f32 %v2879_v18  ;;  %v3019_v3 = vmin.f32 %v6265_v50, 0.0  ;;  %v6274_v41 = vpop.f32.mrb[21].mxu0  ;;  %4825 = vmatprep.subr.bf16.mxu0 %v4824_v48 }
 0xb93   :  { %5195 = vpow2.f32 %v2877_v25  ;;  %v3018_v0 = vmin.f32 %v6274_v41, 0.0  ;;  %4827 = vmatpush3.bf16.msra.mxu0 %v4824_v48 }
 0xb94   :  { %v5186_v55 = vpop.eup %5185  ;;  %v3022_v54 = vmul.f32 1.442695, %v3019_v3  ;;  %v1939_v3 = vld [vmem:[%s6507_s12 + $0x28] sm:$0xff] }
 0xb95   :  { %v5188_v39 = vpop.eup %5187  ;;  %v4134_v2 = vadd.f32 -1.0, %v5186_v55  ;;  %v3020_v35 = vmul.f32 1.442695, %v3018_v0  ;;  %v4828_v0 = vpack.c.bf16 %v1939_v3, %v1938_v4 }
 0xb96   :  { %v4133_v9 = vadd.f32 -1.0, %v5188_v39  ;;  %5197 = vpow2.f32 %v3022_v54 }
 0xb97   :  { %v6289_v5 = vpop.f32.mrb[26].mxu1  ;;  %v2598_v24 = vsel %vm2588_vm11, %v4531_v21, %v4134_v2  ;;  %5199 = vpow2.f32 %v3020_v35  ;;  %vm2731_vm11 = vcmp.gt.f32.partialorder %v6253_v31, 0.0  ;;  %4829 = vmatprep.subr.bf16.mxu0 %v4828_v0 }
 0xb98   :  { %v3162_v43 = vmin.f32 %v6289_v5, 0.0  ;;  %3326 = vrot.lane.b32.xlu0 %v2598_v24, %s6546_s21  ;;  %v6293_v11 = vpop.f32.mrb[27].mxu1  ;;  %v2597_v32 = vsel %vm2587_vm13, %v2578_v57, %v4133_v9  ;;  %v5190_v13 = vpop.eup %5189  ;;  %vm2730_vm13 = vcmp.gt.f32.partialorder %v6256_v51, 0.0  ;;  %4831 = vmatpush3.bf16.msra.mxu0 %v4828_v0  ;;  %vm3160_vm2 = vcmp.gt.f32.partialorder %v6289_v5, 0.0 }
 0xb99   :  { %v3161_v33 = vmin.f32 %v6293_v11, 0.0  ;;  %3324 = vrot.lane.b32.xlu1 %v2597_v32, %s6546_s21  ;;  %v6304_v36 = vpop.f32.mrb[22].mxu0  ;;  %v5192_v44 = vpop.eup %5191  ;;  %v4138_v8 = vadd.f32 -1.0, %v5190_v13  ;;  %vm3159_vm14 = vcmp.gt.f32.partialorder %v6293_v11, 0.0 }
 0xb9a   :  { %v3165_v21 = vmul.f32 1.442695, %v3162_v43  ;;  %v3305_v40 = vmin.f32 %v6304_v36, 0.0  ;;  %v6314_v57 = vpop.f32.mrb[23].mxu0  ;;  %v4137_v55 = vadd.f32 -1.0, %v5192_v44 }
 0xb9b   :  { %v3163_v53 = vmul.f32 1.442695, %v3161_v33  ;;  %v3304_v27 = vmin.f32 %v6314_v57, 0.0 }
 0xb9c   :  { %v5194_v23 = vpop.eup %5193  ;;  %5201 = vpow2.f32 %v3165_v21  ;;  %v3308_v42 = vmul.f32 1.442695, %v3305_v40  ;;  %3318 = vrot.lane.b32.xlu0 %v2455_v45, %s6547_s24  ;;  %v2740_v26 = vsel %vm2730_vm13, %v6256_v51, %v4137_v55  ;;  %vm3302_vm13 = vcmp.gt.f32.partialorder %v6314_v57, 0.0 }
 0xb9d   :  { %v5196_v28 = vpop.eup %5195  ;;  %v4142_v18 = vadd.f32 -1.0, %v5194_v23  ;;  %5203 = vpow2.f32 %v3163_v53  ;;  %v3306_v25 = vmul.f32 1.442695, %v3304_v27  ;;  %3316 = vrot.lane.b32.xlu1 %v2454_v52, %s6547_s24 }
 0xb9e   :  { %v4141_v1 = vadd.f32 -1.0, %v5196_v28  ;;  %5205 = vpow2.f32 %v3308_v42 }
 0xb9f   :  { %v2884_v14 = vsel %vm2874_vm9, %v6259_v22, %v4142_v18  ;;  %5207 = vpow2.f32 %v3306_v25  ;;  %v1940_v22 = vld [vmem:[%s6507_s12 + $0x30] sm:$0xff]  ;;  %s6549_s12 = smov 48   ;;  %vm3017_vm9 = vcmp.gt.f32.partialorder %v6265_v50, 0.0 }
 0xba0   :  { %3342 = vrot.lane.b32.xlu0 %v2884_v14, %s5270_s5  ;;  %v2883_v39 = vsel %vm2873_vm10, %v6262_v19, %v4141_v1  ;;  %v2741_v19 = vsel %vm2731_vm11, %v6253_v31, %v4138_v8  ;;  %v4832_v2 = vpack.c.bf16 %v1941_v10, %v1940_v22  ;;  %v5198_v30 = vpop.eup %5197  ;;  %vm3016_vm10 = vcmp.gt.f32.partialorder %v6274_v41, 0.0 }
 0xba1   :  { %3340 = vrot.lane.b32.xlu1 %v2883_v39, %s5270_s5  ;;  %s6548_s5 = smov 24   ;;  %v5200_v9 = vpop.eup %5199  ;;  %v4146_v62 = vadd.f32 -1.0, %v5198_v30  ;;  %vm3303_vm11 = vcmp.gt.f32.partialorder %v6304_v36, 0.0 }
 0xba2   :  { %4833 = vmatprep.subr.bf16.mxu0 %v4832_v2  ;;  %v4145_v24 = vadd.f32 -1.0, %v5200_v9 }
 0xba3   :  { %4835 = vmatpush3.bf16.msra.mxu0 %v4832_v2  ;;  %v3027_v43 = vsel %vm3017_vm9, %v6265_v50, %v4146_v62  ;;  %v2302_v50 = vmin.f32 %v6243_v46, 0.0  ;;  %v1942_v2 = vld [vmem:[%s6508_s13] sm:$0x1] }
 0xba4   :  { %3334 = vrot.lane.b32.xlu0 %v2741_v19, %s6548_s5 }
 0xba5   :  { %3332 = vrot.lane.b32.xlu1 %v2740_v26, %s6548_s5  ;;  %v2305_v33 = vmul.f32 1.442695, %v2302_v50 }
 0xba6   :  { %v5202_v54 = vpop.eup %5201 }
 0xba7   :  { %v5204_v16 = vpop.eup %5203  ;;  %v4150_v15 = vadd.f32 -1.0, %v5202_v54  ;;  %5209 = vpow2.f32 %v2305_v33 }
 0xba8   :  { %v4149_v7 = vadd.f32 -1.0, %v5204_v16  ;;  %v5206_v35 = vpop.eup %5205 }
 0xba9   :  { %v3170_v31 = vsel %vm3160_vm2, %v6289_v5, %v4150_v15  ;;  %v5208_v20 = vpop.eup %5207  ;;  %v4154_v6 = vadd.f32 -1.0, %v5206_v35  ;;  %v3026_v5 = vsel %vm3016_vm10, %v6274_v41, %v4145_v24  ;;  %v2303_v41 = vmul.f32 1.442695, %v2301_v61 }
 0xbaa   :  { %3358 = vrot.lane.b32.xlu0 %v3170_v31, %s6549_s12  ;;  %v3169_v51 = vsel %vm3159_vm14, %v6293_v11, %v4149_v7  ;;  %v4153_v32 = vadd.f32 -1.0, %v5208_v20  ;;  %vm2300_vm2 = vcmp.gt.f32.partialorder %v6243_v46, 0.0  ;;  %vm2299_vm14 = vcmp.gt.f32.partialorder %v6245_v47, 0.0 }
 0xbab   :  { %3356 = vrot.lane.b32.xlu1 %v3169_v51, %s6549_s12  ;;  %v3313_v11 = vsel %vm3303_vm11, %v6304_v36, %v4154_v6  ;;  %5211 = vpow2.f32 %v2303_v41 }
 0xbac   :  { %v3312_v58 = vsel %vm3302_vm13, %v6314_v57, %v4153_v32 }
 0xbae   :  { %3350 = vrot.lane.b32.xlu0 %v3027_v43, %s6550_s27 }
 0xbaf   :  { %3348 = vrot.lane.b32.xlu1 %v3026_v5, %s6550_s27 }
 0xbb1   :  { %v5210_v21 = vpop.eup %5209 }
 0xbb2   :  { %3366 = vrot.lane.b32.xlu0 %v3313_v11, %s6551_s4  ;;  %v4126_v53 = vadd.f32 -1.0, %v5210_v21 }
 0xbb3   :  { %3364 = vrot.lane.b32.xlu1 %v3312_v58, %s6551_s4 }
 0xbb4   :  { %v2310_v27 = vsel %vm2300_vm2, %v6243_v46, %v4126_v53  ;;  %v3752_v53 = vld [vmem:[%s6509_s14] sm:$0xff] }
 0xbb5   :  { %v5212_v36 = vpop.eup %5211 }
 0xbb6   :  { %v4125_v57 = vadd.f32 -1.0, %v5212_v36 }
 0xbb8   :  { %v2309_v23 = vsel %vm2299_vm14, %v6245_v47, %v4125_v57  ;;  %v3753_v57 = vld [vmem:[%s6509_s14 + $0x8] sm:$0xff] }
 0xc0a   :  { %v3327_v17 = vpop.permute.xlu0 %3326 }
 0xc0b   :  { %v3325_v59 = vpop.permute.xlu1 %3324 }
 0xc0e   :  { %v3319_v34 = vpop.permute.xlu0 %3318 }
 0xc0f   :  { %v3317_v13 = vpop.permute.xlu1 %3316  ;;  %v3371_v42 = vsel %vm1529_vm12, %v2310_v27, %v3319_v34  ;;  %v4844_v27 = vpack.c.bf16 %v3753_v57, %v3752_v53 }
 0xc10   :  { %v3370_v48 = vsel %vm1529_vm12, %v2309_v23, %v3317_v13  ;;  %v3373_v28 = vsel %vm354_vm6, %v3371_v42, %v3327_v17  ;;  %v3755_v23 = vld [vmem:[%s6509_s14 + $0x18] sm:$0xff] }
 0xc11   :  { %v3372_v29 = vsel %vm354_vm6, %v3370_v48, %v3325_v59  ;;  %v3847_v48 = vld [vmem:[%s6511_s16 + $0x8] sm:$0xff] }
 0xc12   :  { %v3343_v40 = vpop.permute.xlu0 %3342 }
 0xc13   :  { %v3341_v44 = vpop.permute.xlu1 %3340 }
 0xc16   :  { %v3335_v45 = vpop.permute.xlu0 %3334 }
 0xc17   :  { %v3333_v52 = vpop.permute.xlu1 %3332  ;;  %v3375_v25 = vsel %vm1534_vm15, %v3373_v28, %v3335_v45  ;;  %v3754_v45 = vld [vmem:[%s6509_s14 + $0x10] sm:$0xff] }
 0xc18   :  { %v3374_v46 = vsel %vm1534_vm15, %v3372_v29, %v3333_v52  ;;  %v3377_v4 = vsel %vm100_vm0, %v3375_v25, %v3343_v40  ;;  %v4848_v42 = vpack.c.bf16 %v3755_v23, %v3754_v45  ;;  %v3846_v52 = vld [vmem:[%s6511_s16] sm:$0xff] }
 0xc19   :  { %v3376_v60 = vsel %vm100_vm0, %v3374_v46, %v3341_v44  ;;  %v4852_v28 = vpack.c.bf16 %v3847_v48, %v3846_v52 }
 0xc1c   :  { %v3359_v18 = vpop.permute.xlu0 %3358 }
 0xc1d   :  { %v3357_v37 = vpop.permute.xlu1 %3356 }
 0xc20   :  { %v3351_v1 = vpop.permute.xlu0 %3350 }
 0xc21   :  { %v3379_v47 = vsel %vm1539_vm3, %v3377_v4, %v3351_v1  ;;  %v3349_v3 = vpop.permute.xlu1 %3348 }
 0xc22   :  { %v3378_v8 = vsel %vm1539_vm3, %v3376_v60, %v3349_v3  ;;  %v3381_v14 = vsel %vm1542_vm4, %v3379_v47, %v3359_v18 }
 0xc23   :  { %v3380_v39 = vsel %vm1542_vm4, %v3378_v8, %v3357_v37 }
 0xc24   :  { %v3367_v0 = vpop.permute.xlu0 %3366 }
 0xc25   :  { %v3383_v55 = vsel %vm1545_vm5, %v3381_v14, %v3367_v0  ;;  %v3365_v22 = vpop.permute.xlu1 %3364  ;;  %v3848_v0 = vld [vmem:[%s6511_s16 + $0x10] sm:$0xff] }
 0xc26   :  { %v3382_v10 = vsel %vm1545_vm5, %v3380_v39, %v3365_v22  ;;  %v3940_v22 = vld [vmem:[%s6513_s18] sm:$0xff] }
 0xc27   :  { %v4837_v19 = vpack.c.bf16 %v3383_v55, %v3382_v10  ;;  %4583 = vmatprep.mubr.msk.f32.mxu1 %vm1548_vm7, %v3382_v10  ;;  %4602 = vmatprep.mubr.msk.f32.mxu0 %vm1548_vm7, %v3382_v10  ;;  %v3941_v10 = vld [vmem:[%s6513_s18 + $0x8] sm:$0xff] }
 0xc28   :  { %4584 = vmatmul.mubr.msk.f32.vlgmr.msra.gmra.mrb[28].mxu1 %vm1548_vm7, %v3383_v55  ;;  %4603 = vmatmul.mubr.msk.f32.vlgmr.msra.gmra.mrb[24].mxu0 %vm1548_vm7, %v3383_v55  ;;  %v3849_v55 = vld [vmem:[%s6511_s16 + $0x18] sm:$0xff] }
 0xc29   :  { %4839 = vmatpush3.bf16.xpose.msk.msra.mxu1 %vm5899_vm8, %v4837_v19  ;;  %4609 = vmatprep.mubr.msk.f32.mxu1 %vm5250_vm1, %v5251_v12  ;;  %v4856_v39 = vpack.c.bf16 %v3849_v55, %v3848_v0  ;;  %v3942_v19 = vld [vmem:[%s6513_s18 + $0x10] sm:$0xff] }
 0xc2a   :  { %4853 = vmatprep.subr.bf16.mxu1 %v4852_v28 }
 0xc30   :  { %4610 = vmatmul.mubr.msk.f32.vlgmr.msra.gmra.mrb[30].mxu1 %vm1548_vm7, %v1942_v2  ;;  %v4860_v2 = vpack.c.bf16 %v3941_v10, %v3940_v22 }
 0xc31   :  { %4855 = vmatpush3.bf16.msra.mxu1 %v4852_v28 }
 0xc32   :  { %4857 = vmatprep.subr.bf16.mxu1 %v4856_v39 }
 0xc35   :  { %4859 = vmatpush3.bf16.msra.mxu1 %v4856_v39 }
 0xcfb   :  { %v4585_v30 = vpop.f32.mrb[28].mxu1  ;;  %v4604_v26 = vpop.f32.mrb[24].mxu0 }
 0xcfc   :  { %3620 = vperm.xlu0 %5008, %v4604_v26   ;;  %v3456_v9 = vpop.f32.mrb[29].mxu1  ;;  %v3531_v54 = vpop.f32.mrb[25].mxu0 }
 0xcfd   :  { %v4840_v16 = vpack.c.bf16 %v4585_v30, %v3456_v9  ;;  %3615 = vperm.xlu1 %5007, %v3531_v54   ;;  %v3943_v30 = vld [vmem:[%s6513_s18 + $0x18] sm:$0xff]  ;;  %v3944_v9 = vld [vmem:[%s6513_s18 + $0x20] sm:$0xff]  ;;  %v3945_v54 = vld [vmem:[%s6513_s18 + $0x28] sm:$0xff] }
 0xcfe   :  { %v4864_v26 = vpack.c.bf16 %v3943_v30, %v3942_v19 }
 0xcff   :  { %4841 = vmatprep.subr.bf16.mxu0 %v4840_v16 }
 0xd00   :  { %4843 = vmatpush3.bf16.msra.mxu0 %v4840_v16  ;;  %v4868_v16 = vpack.c.bf16 %v3945_v54, %v3944_v9 }
 0xd01   :  { %4845 = vmatprep.subr.bf16.mxu0 %v4844_v27 }
 0xd03   :  { %v3609_v63 = vpop.f32.mrb[30].mxu1 }
 0xd04   :  { %v4611_v15 = vpop.f32.mrb[31].mxu1  ;;  %v3626_v7 = vrot.slane %v3609_v63, %v5457_v38  ;;  %v4166_v63 = vld [vmem:[%s6510_s15] ss:$0 sm:$0xff] }
 0xd7b   :  { %v3621_v12 = vpop.permute.xlu0 %3620 }
 0xd7c   :  { %v3628_v62 = vadd.f32 %v3626_v7, %v3621_v12  ;;  %v3616_v31 = vpop.permute.xlu1 %3615 }
 0xd7d   :  { %v3627_v35 = vadd.f32 %v3626_v7, %v3616_v31 }
 0xd7e   :  { %vm3630_vm1 = vcmp.gt.f32.partialorder %v3628_v62, 0.0  ;;  %v3632_v24 = vmul.f32 0.2, %v3628_v62 }
 0xd7f   :  { %vm3629_vm12 = vcmp.gt.f32.partialorder %v3627_v35, 0.0  ;;  %v3631_v51 = vmul.f32 0.2, %v3627_v35 }
 0xd80   :  { %v3634_v20 = vsel %vm3630_vm1, %v3628_v62, %v3632_v24  ;;  %v3946_v24 = vld [vmem:[%s6513_s18 + $0x30] sm:$0xff] }
 0xd81   :  { %v3636_v6 = vadd.f32 %v3634_v20, %v5473_v49  ;;  %v3633_v43 = vsel %vm3629_vm12, %v3627_v35, %v3631_v51  ;;  %v3947_v51 = vld [vmem:[%s6513_s18 + $0x38] sm:$0xff] }
 0xd82   :  { %v3635_v32 = vadd.f32 %v3633_v43, %v5541_v56  ;;  %v4872_v20 = vpack.c.bf16 %v3947_v51, %v3946_v24 }
 0xd83   :  { %v3640_v5 = vsel %vm354_vm6, %v3636_v6, -inf }
 0xd84   :  { %3641 = vmax.xlane.f32.xlu0 %v3640_v5  ;;  %v3637_v11 = vsel %vm354_vm6, %v3635_v32, -inf }
 0xd85   :  { %3638 = vmax.xlane.f32.xlu1 %v3637_v11 }
 0xe11   :  { %v3642_v38 = vpop.xlane.xlu0 %3641 }
 0xe12   :  { %v3644_v58 = vsub.f32 %v3636_v6, %v3642_v38  ;;  %v3639_v50 = vpop.xlane.xlu1 %3638  ;;  %v4169_v6 = vld [vmem:[%s6512_s17] ss:$0 sm:$0xff]  ;;  %s5275_s17 = smov [#allocation2]  }
 0xe13   :  { %v3643_v61 = vsub.f32 %v3635_v32, %v3639_v50  ;;  %v4172_v50 = vld [vmem:[%s6514_s19] ss:$0 sm:$0xff]  ;;  %s4055_s18 = sshll.u32 %s5275_s17, 4  ;;  %s4056_s18 = int_to_ptr.vmem [resolvable:$true] %s4055_s18 }
 0xe14   :  { %v3647_v33 = vmul.f32 1.442695, %v3644_v58  ;;  %s5225_s19 = scalar_lea.vmem %s4056_s18, 256  ;;  %p5230_p1 = scmp.lt.s32.totalorder %s4056_s18, %s4056_s18 }
 0xe15   :  { %v3645_v41 = vmul.f32 1.442695, %v3643_v61  ;;  %p5226_p0 = scmp.ne.s32.totalorder %s4056_s18, %s5225_s19  ;;  %p5231_p2 = scmp.lt.s32.totalorder %s5225_s19, %s5225_s19 }
 0xe16   :  { %5213 = vpow2.f32 %v3647_v33 }
 0xe17   :  { %5215 = vpow2.f32 %v3645_v41  ;;  %p5232_p3 = por %p5231_p2, %p5230_p1 }
 0xe19   :  { %p5233_p4 = pnand %p5232_p3, %p5226_p0 }
 0xe20   :  { %v5214_v17 = vpop.eup %5213 }
 0xe21   :  { %v5216_v59 = vpop.eup %5215  ;;  %v3652_v49 = vsel %vm354_vm6, %v5214_v17, 0.0 }
 0xe22   :  { %3653 = vadd.xlane.f32.xlu0 %v3652_v49  ;;  %v3649_v56 = vsel %vm354_vm6, %v5216_v59, 0.0 }
 0xe23   :  { %3650 = vadd.xlane.f32.xlu1 %v3649_v56 }
 0xeaf   :  { %v3654_v34 = vpop.xlane.xlu0 %3653 }
 0xeb0   :  { %5217 = vrcp.f32 %v3654_v34  ;;  %v3651_v13 = vpop.xlane.xlu1 %3650 }
 0xeb1   :  { %5219 = vrcp.f32 %v3651_v13 }
 0xeba   :  { %v5218_v21 = vpop.eup %5217 }
 0xebb   :  { %v5220_v36 = vpop.eup %5219  ;;  %v3658_v44 = vmul.f32 %v5218_v21, %v5214_v17 }
 0xebc   :  { %v3657_v40 = vmul.f32 %v5220_v36, %v5216_v59 }
 0xebe   :  { %4616 = vmatprep.mubr.msk.f32.mxu0 %vm354_vm6, %v3657_v40 }
 0xebf   :  { %4617 = vmatmul.mubr.msk.f32.vlgmr.msra.gmra.mrb[26].mxu0 %vm354_vm6, %v3658_v44 }
 0xec0   :  { %4847 = vmatpush3.bf16.msra.mxu0 %v4844_v27 }
 0xec1   :  { %4849 = vmatprep.subr.bf16.mxu0 %v4848_v42 }
 0xec4   :  { %4851 = vmatpush3.bf16.msra.mxu0 %v4848_v42 }
 0xec5   :  { %4861 = vmatprep.subr.bf16.mxu0 %v4860_v2 }
 0xf92   :  { %v4618_v18 = vpop.f32.mrb[26].mxu0 }
 0xf93   :  { %v3743_v25 = vmin.f32 %v4618_v18, 0.0  ;;  %v3731_v29 = vpop.f32.mrb[27].mxu0  ;;  %vm3741_vm15 = vcmp.gt.f32.partialorder %v4618_v18, 0.0 }
 0xf94   :  { %v3742_v37 = vmin.f32 %v3731_v29, 0.0  ;;  %vm3740_vm6 = vcmp.gt.f32.partialorder %v3731_v29, 0.0 }
 0xf95   :  { %v3746_v46 = vmul.f32 1.442695, %v3743_v25 }
 0xf96   :  { %v3744_v4 = vmul.f32 1.442695, %v3742_v37 }
 0xf97   :  { %5221 = vpow2.f32 %v3746_v46 }
 0xf98   :  { %5223 = vpow2.f32 %v3744_v4 }
 0xfa1   :  { %v5222_v1 = vpop.eup %5221 }
 0xfa2   :  { %v5224_v47 = vpop.eup %5223  ;;  %v4165_v60 = vadd.f32 -1.0, %v5222_v1 }
 0xfa3   :  { %v4164_v3 = vadd.f32 -1.0, %v5224_v47 }
 0xfa4   :  { %v3751_v14 = vsel %vm3741_vm15, %v4618_v18, %v4165_v60 }
 0xfa5   :  { %v3750_v8 = vsel %vm3740_vm6, %v3731_v29, %v4164_v3 }
 0xfa6   :  { %4627 = vmatprep.mubr.msk.f32.mxu0 %vm100_vm0, %v3750_v8 }
 0xfa7   :  { %4628 = vmatmul.mubr.msk.f32.vlgmr.msra.gmra.mrb[28].mxu0 %vm100_vm0, %v3751_v14 }
 0xfa8   :  { %4863 = vmatpush3.bf16.msra.mxu0 %v4860_v2 }
 0xfa9   :  { %4865 = vmatprep.subr.bf16.mxu0 %v4864_v26 }
 0xfac   :  { %4867 = vmatpush3.bf16.msra.mxu0 %v4864_v26 }
 0xfad   :  { %4869 = vmatprep.subr.bf16.mxu0 %v4868_v16 }
 0xfb0   :  { %4871 = vmatpush3.bf16.msra.mxu0 %v4868_v16 }
 0xfb1   :  { %4873 = vmatprep.subr.bf16.mxu0 %v4872_v20 }
 0xfb4   :  { %4875 = vmatpush3.bf16.msra.mxu0 %v4872_v20 }
0x107a   :  { %v4629_v15 = vpop.f32.mrb[28].mxu0 }
0x107b   :  { %v3841_v7 = vadd.f32 %v4629_v15, %v4166_v63  ;;  %v3835_v12 = vpop.f32.mrb[29].mxu0 }
0x107c   :  { %v3836_v62 = vadd.f32 %v4166_v63, %v3835_v12 }
0x107d   :  { %v3845_v35 = vmax.f32 %v3841_v7, 0.0 }
0x107e   :  { %v3844_v31 = vmax.f32 %v3836_v62, 0.0 }
0x1080   :  { %4638 = vmatprep.mubr.msk.f32.mxu1 %vm100_vm0, %v3844_v31 }
0x1081   :  { %4639 = vmatmul.mubr.msk.f32.vlgmr.msra.gmra.mrb[32].mxu1 %vm100_vm0, %v3845_v35 }
0x1154   :  { %v4640_v43 = vpop.f32.mrb[32].mxu1 }
0x1155   :  { %v3935_v32 = vadd.f32 %v4640_v43, %v4169_v6  ;;  %v3929_v5 = vpop.f32.mrb[33].mxu1 }
0x1156   :  { %v3930_v11 = vadd.f32 %v4169_v6, %v3929_v5 }
0x1157   :  { %v3939_v58 = vmax.f32 %v3935_v32, 0.0 }
0x1158   :  { %v3938_v38 = vmax.f32 %v3930_v11, 0.0 }
0x115a   :  { %4657 = vmatprep.mubr.msk.f32.mxu0 %vm1548_vm7, %v3938_v38 }
0x115b   :  { %4658 = vmatmul.mubr.msk.f32.vlgmr.msra.gmra.mrb[30].mxu0 %vm1548_vm7, %v3939_v58 }
0x122e   :  { %v4659_v61 = vpop.f32.mrb[30].mxu0 }
0x122f   :  { %v4033_v33 = vadd.f32 %v4659_v61, %v4172_v50  ;;  %v4027_v41 = vpop.f32.mrb[31].mxu0 }
0x1230   :  { %v4028_v17 = vadd.f32 %v4172_v50, %v4027_v41 }
0x1231   :  { %v4037_v59 = vmax.f32 %v4033_v33, 0.0 }
0x1232   :  { %v4036_v49 = vmax.f32 %v4028_v17, 0.0 }
0x1233   :  { %4042 = vrot.lane.b32.xlu0 %v4037_v59, %s5265_s25 }
0x1234   :  { %4040 = vrot.lane.b32.xlu1 %v4036_v49, %s5265_s25 }
0x12a5   :  { %v4043_v56 = vpop.permute.xlu0 %4042 }
0x12a6   :  { %v4047_v34 = vmul.f32 %v4043_v56, %v4037_v59  ;;  %v4041_v13 = vpop.permute.xlu1 %4040 }
0x12a7   :  { %v4046_v21 = vmul.f32 %v4041_v13, %v4036_v49 }
0x12a8   :  { %4049 = vst.msk [vmem:[#allocation2 + $0x8] sm:$0xff] %vm100_vm0, %v4047_v34 }
0x12a9   :  { %4048 = vst.msk [vmem:[#allocation2] sm:$0xff] %vm100_vm0, %v4046_v21 }
0x12aa   :  { %5236 = shalt.err (!%p5233_p4)
}
0x12ab   :  { %s5237_s7 = scalar_lea.hbm %s6515_s20, 256 }
0x12ac   :  { %p5238_p5 = scmp.ne.s32.totalorder %s6515_s20, %s5237_s7  ;;  %p5241_p6 = scmp.lt.u32.totalorder %s5237_s7, %s6515_s20 }
0x12ae   :  { %p5243_p7 = pnand %p5241_p6, %p5238_p5 }
0x12b0   :  { %5246 = shalt.err (!%p5243_p7)
}
0x12b1   :  { %s5276_s27 = smov 128  }
0x12b2   :  { %4061 = dma.vmem_to_hbm [thread:$0]  %s4056_s18, 256, %s6515_s20, [#allocation3], %s5276_s27, %s5276_s27, %s6547_s24  }
0x12b3   :  { %5247 = dma.done.wait [#allocation3], 256  }
0x12b4   :  { %5248 = vsyncadd [#allocation3], 4294967040 }
0x12b5   :  { %4065 = vsyncpa [#allocation3], 1 }

</bundles_post_ra>
